<compile_context>
chip_gen: v7x
topology: tpu7x:2x2x1
jax: 0.10.0
libtpu: 0.0.40
codegen_flags: <defaults>
</compile_context>

<pallas_src>
import jax
import jax.numpy as jnp
from jax import lax
from jax.experimental import pallas as pl
from jax.experimental.pallas import tpu as pltpu

_EPS = 1e-5  # nn.BatchNorm1d default eps


def _vmem():
    # whole-array block resident in VMEM (no grid; shapes here are tiny)
    return pl.BlockSpec(memory_space=pltpu.MemorySpace.VMEM)


# ------------------------------ fused kernel ---------------------------------

def _make_vqvae_kernel(N4, L4):
    """N4 = B * (L//4) rows; every flat activation is (N4, C) with batch-major
    rows and per-batch segments of length L4."""

    def kernel(*refs):
        (a1_ref, w1_ref, b1_ref, g1_ref, be1_ref, w2_ref, b2_ref) = refs[0:7]
        erb1 = refs[7:15]
        erb2 = refs[15:23]
        (embt_ref, emb_ref, ee_ref, l2ow_ref, l2ob_ref) = refs[23:28]
        drb1 = refs[28:36]
        drb2 = refs[36:44]
        (wd1_ref, bd1_ref, gd_ref, bed_ref, wd2_ref, bd2_ref) = refs[44:50]
        ze_ref, zq_ref, p_ref, xt_ref = refs[50:54]

        D = ze_ref.shape[1]

        # hoisted segment-boundary masks for the row-shift helpers (computed once)
        row = lax.broadcasted_iota(jnp.int32, (N4, D), 0)
        seg_first = (row % L4) == 0
        seg_last = (row % L4) == (L4 - 1)

        def shift_down(v):          # out[t] = v[t-1] within each length-L4 segment
            return jnp.where(seg_first, 0.0, pltpu.roll(v, 1, axis=0))

        def shift_up(v):            # out[t] = v[t+1] within each length-L4 segment
            return jnp.where(seg_last, 0.0, pltpu.roll(v, (N4 - 1) % N4, axis=0))

        def bn_fold(s, ss, n, gamma, beta):
            mean = s / n
            var = jnp.maximum(ss / n - mean * mean, 0.0)   # clamp f32 round-off
            scale = gamma * lax.rsqrt(var + _EPS)
            return scale, beta - mean * scale

        def bn_apply(h, n, gamma, beta):
            s = jnp.sum(h, axis=0, keepdims=True)
            ss = jnp.sum(h * h, axis=0, keepdims=True)
            scale, shift = bn_fold(s, ss, n, gamma, beta)
            return h * scale + shift

        def resblock(x, prm):
            (w3_ref, b3_ref, ga_ref, ba_ref, w1x_ref, b1x_ref, gb_ref, bb_ref) = prm
            r = jnp.maximum(x, 0.0)
            # Conv1d(k=3, p=1): taps concatenated along contraction -> one K=3D matmul
            taps = jnp.concatenate([shift_down(r), r, shift_up(r)], axis=-1)
            h = jnp.dot(taps, w3_ref[...], preferred_element_type=jnp.float32) + b3_ref[...]
            h = jnp.maximum(bn_apply(h, float(N4), ga_ref[...], ba_ref[...]), 0.0)
            h = jnp.dot(h, w1x_ref[...], preferred_element_type=jnp.float32) + b1x_ref[...]
            h = bn_apply(h, float(N4), gb_ref[...], bb_ref[...])
            return x + h

        # ------------------------------ encoder ------------------------------
        # Conv1d(C_in, D, 4, 2, 1): taps pre-gathered in the wrapper; rows [0:N4]
        # are even output positions (t=2m), rows [N4:2N4] odd (t=2m+1).
        h1 = jnp.dot(a1_ref[...], w1_ref[...], preferred_element_type=jnp.float32) + b1_ref[...]
        a1 = jnp.maximum(bn_apply(h1, float(2 * N4), g1_ref[...], be1_ref[...]), 0.0)
        a1_even = a1[:N4]
        a1_odd = a1[N4:]
        # Conv1d(D, D, 4, 2, 1) (no BN/ReLU): one K=4D matmul.
        #   z[t] = a1[2t-1]W0 + a1[2t]W1 + a1[2t+1]W2 + a1[2t+2]W3
        taps2 = jnp.concatenate(
            [shift_down(a1_odd), a1_even, a1_odd, shift_up(a1_even)], axis=-1)
        z = jnp.dot(taps2, w2_ref[...], preferred_element_type=jnp.float32) + b2_ref[...]
        z = resblock(resblock(z, erb1), erb2)
        ze_ref[...] = z

        # ------------------------ vector quantization ------------------------
        cross = jnp.dot(z, embt_ref[...], preferred_element_type=jnp.float32)   # (N4, K)
        d = ee_ref[...] - 2.0 * cross        # ||z||^2 dropped: argmin unchanged
        dmin = jnp.min(d, axis=1, keepdims=True)
        Kn = d.shape[1]
        ks = lax.broadcasted_iota(jnp.int32, d.shape, 1)
        idx = jnp.min(jnp.where(d <= dmin, ks, Kn), axis=1, keepdims=True)
        onehot = (ks == idx).astype(jnp.float32)                                # (N4, K)
        zq = jnp.dot(onehot, emb_ref[...], preferred_element_type=jnp.float32)  # (N4, D)
        zq_ref[...] = zq
        # fused latent2one projection (tiny (N4,1) output; codes never hit HBM)
        p_ref[...] = (jnp.dot(zq, l2ow_ref[...], preferred_element_type=jnp.float32)
                      + l2ob_ref[...])

        # ------------------------------ decoder ------------------------------
        dct = resblock(resblock(zq, drb1), drb2)
        r = jnp.maximum(dct, 0.0)
        # ConvTranspose1d(D, D, 4, 2, 1) as ONE matmul with a combined (3D, 2D)
        # weight: columns [0:D] = even output positions, [D:2D] = odd.
        taps_d1 = jnp.concatenate([shift_down(r), r, shift_up(r)], axis=-1)
        y = jnp.dot(taps_d1, wd1_ref[...], preferred_element_type=jnp.float32) + bd1_ref[...]
        # train-mode BN over both halves of the lane-packed layout
        s = jnp.sum(y, axis=0, keepdims=True)
        ss = jnp.sum(y * y, axis=0, keepdims=True)
        scale, shift = bn_fold(s[:, :D] + s[:, D:], ss[:, :D] + ss[:, D:],
                               float(2 * N4), gd_ref[...], bed_ref[...])
        y = jnp.maximum(y * jnp.concatenate([scale, scale], axis=-1)
                        + jnp.concatenate([shift, shift], axis=-1), 0.0)
        y_even = y[:, :D]
        y_odd = y[:, D:]
        # ConvTranspose1d(D, C_in, 4, 2, 1) + tanh as ONE matmul with a combined
        # (4D, 4*C_in) weight: column block j gives output position 4m+j.
        taps_d2 = jnp.concatenate(
            [shift_down(y_odd), y_even, y_odd, shift_up(y_even)], axis=-1)
        xt = jnp.dot(taps_d2, wd2_ref[...], preferred_element_type=jnp.float32) + bd2_ref[...]
        xt_ref[...] = jnp.tanh(xt)

    return kernel


# ------------------------------- forward pass ---------------------------------

def vqvae_forward(params, x_ncw):
    B, C_in, L = x_ncw.shape
    K, D = params["emb"].shape
    assert L % 4 == 0
    L4 = L // 4
    N4 = B * L4

    # ---- XLA-side layout prep (tiny, one pass over the inputs/weights) ----
    x = jnp.transpose(x_ncw, (0, 2, 1))                       # NCW -> (B, L, C_in)
    xp = jnp.pad(x, ((0, 0), (1, 1), (0, 0)))                 # zero pad = 1
    # conv1 taps: rows [0:N4] = even output positions, [N4:2N4] = odd;
    # each row = [x[2t-1], x[2t], x[2t+1], x[2t+2]] flattened over channels.
    a1_taps = jnp.concatenate(
        [xp[:, 0:L, :].reshape(N4, 4 * C_in),
         xp[:, 2:L + 2, :].reshape(N4, 4 * C_in)], axis=0)    # (2*N4, 4*C_in)

    w1cat = params["enc_w1"].reshape(4 * C_in, D)              # rows = k*C_in + ci
    w2cat = params["enc_w2"].reshape(4 * D, D)

    emb = params["emb"]
    emb_t = emb.T                                              # (D, K)
    ee = jnp.sum(emb * emb, axis=1)[None, :]                   # (1, K)

    # deconv1 combined weight: even out = x@W1 + x[-1]@W3 ; odd out = x@W2 + x[+1]@W0
    t1 = params["dec_tw1"]                                     # (4, D, D), t1[k]=V_k
    zdd = jnp.zeros((D, D), jnp.float32)
    wd1 = jnp.concatenate([jnp.concatenate([t1[3], zdd], axis=1),
                           jnp.concatenate([t1[1], t1[2]], axis=1),
                           jnp.concatenate([zdd, t1[0]], axis=1)], axis=0)  # (3D, 2D)
    bd1 = jnp.tile(params["dec_tb1"], (1, 2))                  # (1, 2D)

    # deconv2 combined weight: out[4m+j] from taps [y_odd[m-1], y_even[m], y_odd[m], y_even[m+1]]
    t2 = params["dec_tw2"]                                     # (4, D, C_in)
    zdc = jnp.zeros((D, C_in), jnp.float32)
    wd2 = jnp.concatenate(
        [jnp.concatenate([t2[3], zdc, zdc, zdc], axis=1),
         jnp.concatenate([t2[1], t2[2], t2[3], zdc], axis=1),
         jnp.concatenate([zdc, t2[0], t2[1], t2[2]], axis=1),
         jnp.concatenate([zdc, zdc, zdc, t2[0]], axis=1)], axis=0)  # (4D, 4*C_in)
    bd2 = jnp.tile(params["dec_tb2"], (1, 4))                  # (1, 4*C_in)

    def rb_args(p):
        return [p["w3"].reshape(3 * D, D), p["b3"],
                p["bn_a"]["gamma"], p["bn_a"]["beta"],
                p["w1"], p["b1"], p["bn_b"]["gamma"], p["bn_b"]["beta"]]

    args = ([a1_taps, w1cat, params["enc_b1"],
             params["enc_bn1"]["gamma"], params["enc_bn1"]["beta"],
             w2cat, params["enc_b2"]]
            + rb_args(params["enc_rb1"]) + rb_args(params["enc_rb2"])
            + [emb_t, emb, ee, params["l2o_w"], params["l2o_b"]]
            + rb_args(params["dec_rb1"]) + rb_args(params["dec_rb2"])
            + [wd1, bd1, params["dec_bn"]["gamma"], params["dec_bn"]["beta"],
               wd2, bd2])

    z_e, z_q, p_oh, xt_packed = pl.pallas_call(
        _make_vqvae_kernel(N4, L4),
        out_shape=(jax.ShapeDtypeStruct((N4, D), jnp.float32),        # z_e_x
                   jax.ShapeDtypeStruct((N4, D), jnp.float32),        # z_q_x
                   jax.ShapeDtypeStruct((N4, 1), jnp.float32),        # latent2one
                   jax.ShapeDtypeStruct((N4, 4 * C_in), jnp.float32)),# x_tilde packed
        in_specs=[_vmem()] * len(args),
        out_specs=(_vmem(), _vmem(), _vmem(), _vmem()),
    )(*args)

    # packed (b*L4+m, [4m..4m+3] x C_in) -> (B, L, C_in): free row-major reshape
    x_tilde = xt_packed.reshape(B, L, C_in)
    return (jnp.transpose(x_tilde, (0, 2, 1)),                    # (B, C_in, L)
            jnp.transpose(z_e.reshape(B, L4, D), (0, 2, 1)),      # (B, D, L/4)
            jnp.transpose(z_q.reshape(B, L4, D), (0, 2, 1)),      # (B, D, L/4)
            jnp.transpose(p_oh.reshape(B, L4, 1), (0, 2, 1)))     # (B, 1, L/4)


# ------------------------------ parameter init --------------------------------

def init_params(key, input_dim, dim, n_codes):
    keys = iter(jax.random.split(key, 24))

    def xavier(shape, fan_in, fan_out):
        a = (6.0 / (fan_in + fan_out)) ** 0.5
        return jax.random.uniform(next(keys), shape, jnp.float32, -a, a)

    def conv_w(cin, cout, k):
        # stored as (k, cin, cout); w[k, ci, co] == W_torch[co, ci, k]
        return xavier((k, cin, cout), cin * k, cout * k)

    def bn(c):
        return dict(gamma=jnp.ones((1, c), jnp.float32),
                    beta=jnp.zeros((1, c), jnp.float32))

    def resblock():
        return dict(w3=conv_w(dim, dim, 3), b3=jnp.zeros((1, dim), jnp.float32),
                    bn_a=bn(dim),
                    w1=xavier((dim, dim), dim, dim),
                    b1=jnp.zeros((1, dim), jnp.float32),
                    bn_b=bn(dim))

    return dict(
        enc_w1=conv_w(input_dim, dim, 4), enc_b1=jnp.zeros((1, dim), jnp.float32),
        enc_bn1=bn(dim),
        enc_w2=conv_w(dim, dim, 4), enc_b2=jnp.zeros((1, dim), jnp.float32),
        enc_rb1=resblock(), enc_rb2=resblock(),
        emb=jax.random.uniform(next(keys), (n_codes, dim), jnp.float32,
                               -1.0 / n_codes, 1.0 / n_codes),
        l2o_w=xavier((dim, 1), dim, 1), l2o_b=jnp.zeros((1, 1), jnp.float32),
        dec_rb1=resblock(), dec_rb2=resblock(),
        # ConvTranspose1d weights stored as (k, cin, cout); w[k, ci, co] == W_torch[ci, co, k]
        dec_tw1=xavier((4, dim, dim), dim * 4, dim * 4),
        dec_tb1=jnp.zeros((1, dim), jnp.float32),
        dec_bn=bn(dim),
        dec_tw2=xavier((4, dim, input_dim), dim * 4, input_dim * 4),
        dec_tb2=jnp.zeros((1, input_dim), jnp.float32),
    )


# ----------------------------------- main --------------------------------------

if __name__ == "__main__":
    B, C_IN, L, DIM, K = 2, 4, 32, 64, 512
    key = jax.random.PRNGKey(0)
    kp, kx = jax.random.split(key)
    params = init_params(kp, C_IN, DIM, K)
    x = jax.random.normal(kx, (B, C_IN, L), jnp.float32)

    outs = jax.jit(vqvae_forward)(params, x)
    outs = jax.block_until_ready(outs)

    x_tilde, z_e_x, z_q_x, z_q_x_onehot = outs
    assert x_tilde.shape == (B, C_IN, L)
    assert z_e_x.shape == (B, DIM, L // 4)
    assert z_q_x.shape == (B, DIM, L // 4)
    assert z_q_x_onehot.shape == (B, 1, L // 4)
    assert all(bool(jnp.all(jnp.isfinite(o))) for o in outs)
    print("KERNEL_OK")
</pallas_src>

<mosaic_0001>
module attributes {stable_mosaic.version = 11 : i64} {
  func.func @kernel(%arg0: memref<32x16xf32, #tpu.memory_space<vmem>>, %arg1: memref<16x64xf32, #tpu.memory_space<vmem>>, %arg2: memref<1x64xf32, #tpu.memory_space<vmem>>, %arg3: memref<1x64xf32, #tpu.memory_space<vmem>>, %arg4: memref<1x64xf32, #tpu.memory_space<vmem>>, %arg5: memref<256x64xf32, #tpu.memory_space<vmem>>, %arg6: memref<1x64xf32, #tpu.memory_space<vmem>>, %arg7: memref<192x64xf32, #tpu.memory_space<vmem>>, %arg8: memref<1x64xf32, #tpu.memory_space<vmem>>, %arg9: memref<1x64xf32, #tpu.memory_space<vmem>>, %arg10: memref<1x64xf32, #tpu.memory_space<vmem>>, %arg11: memref<64x64xf32, #tpu.memory_space<vmem>>, %arg12: memref<1x64xf32, #tpu.memory_space<vmem>>, %arg13: memref<1x64xf32, #tpu.memory_space<vmem>>, %arg14: memref<1x64xf32, #tpu.memory_space<vmem>>, %arg15: memref<192x64xf32, #tpu.memory_space<vmem>>, %arg16: memref<1x64xf32, #tpu.memory_space<vmem>>, %arg17: memref<1x64xf32, #tpu.memory_space<vmem>>, %arg18: memref<1x64xf32, #tpu.memory_space<vmem>>, %arg19: memref<64x64xf32, #tpu.memory_space<vmem>>, %arg20: memref<1x64xf32, #tpu.memory_space<vmem>>, %arg21: memref<1x64xf32, #tpu.memory_space<vmem>>, %arg22: memref<1x64xf32, #tpu.memory_space<vmem>>, %arg23: memref<64x512xf32, #tpu.memory_space<vmem>>, %arg24: memref<512x64xf32, #tpu.memory_space<vmem>>, %arg25: memref<1x512xf32, #tpu.memory_space<vmem>>, %arg26: memref<64x1xf32, #tpu.memory_space<vmem>>, %arg27: memref<1x1xf32, #tpu.memory_space<vmem>>, %arg28: memref<192x64xf32, #tpu.memory_space<vmem>>, %arg29: memref<1x64xf32, #tpu.memory_space<vmem>>, %arg30: memref<1x64xf32, #tpu.memory_space<vmem>>, %arg31: memref<1x64xf32, #tpu.memory_space<vmem>>, %arg32: memref<64x64xf32, #tpu.memory_space<vmem>>, %arg33: memref<1x64xf32, #tpu.memory_space<vmem>>, %arg34: memref<1x64xf32, #tpu.memory_space<vmem>>, %arg35: memref<1x64xf32, #tpu.memory_space<vmem>>, %arg36: memref<192x64xf32, #tpu.memory_space<vmem>>, %arg37: memref<1x64xf32, #tpu.memory_space<vmem>>, %arg38: memref<1x64xf32, #tpu.memory_space<vmem>>, %arg39: memref<1x64xf32, #tpu.memory_space<vmem>>, %arg40: memref<64x64xf32, #tpu.memory_space<vmem>>, %arg41: memref<1x64xf32, #tpu.memory_space<vmem>>, %arg42: memref<1x64xf32, #tpu.memory_space<vmem>>, %arg43: memref<1x64xf32, #tpu.memory_space<vmem>>, %arg44: memref<192x128xf32, #tpu.memory_space<vmem>>, %arg45: memref<1x128xf32, #tpu.memory_space<vmem>>, %arg46: memref<1x64xf32, #tpu.memory_space<vmem>>, %arg47: memref<1x64xf32, #tpu.memory_space<vmem>>, %arg48: memref<256x16xf32, #tpu.memory_space<vmem>>, %arg49: memref<1x16xf32, #tpu.memory_space<vmem>>, %arg50: memref<16x64xf32, #tpu.memory_space<vmem>>, %arg51: memref<16x64xf32, #tpu.memory_space<vmem>>, %arg52: memref<16x1xf32, #tpu.memory_space<vmem>>, %arg53: memref<16x16xf32, #tpu.memory_space<vmem>>) attributes {dimension_semantics = [], scalar_prefetch = 0 : i64, scratch_operands = 0 : i64, tpu.core_type = #tpu.core_type<tc>} {
    %0 = tpu.iota {dimensions = array<i32: 0>} : vector<16x64xi32>
    %c8_i32 = arith.constant 8 : i32
    %c0_i32 = arith.constant 0 : i32
    %1 = arith.cmpi eq, %c8_i32, %c0_i32 : i32
    %c1_i32 = arith.constant 1 : i32
    %2 = arith.select %1, %c1_i32, %c8_i32 : i32
    %3 = vector.broadcast %2 : i32 to vector<16x64xi32>
    %4 = arith.remsi %0, %3 : vector<16x64xi32>
    %c0_i32_0 = arith.constant 0 : i32
    %5 = vector.broadcast %c0_i32_0 : i32 to vector<16x64xi32>
    %6 = arith.cmpi ne, %4, %5 : vector<16x64xi32>
    %c0_i32_1 = arith.constant 0 : i32
    %7 = vector.broadcast %c0_i32_1 : i32 to vector<16x64xi32>
    %8 = arith.cmpi slt, %4, %7 : vector<16x64xi32>
    %c0_i32_2 = arith.constant 0 : i32
    %9 = arith.cmpi slt, %2, %c0_i32_2 : i32
    %10 = vector.broadcast %9 : i1 to vector<16x64xi1>
    %11 = vector.broadcast %10 : vector<16x64xi1> to vector<16x64xi1>
    %12 = arith.xori %8, %11 : vector<16x64xi1>
    %13 = arith.andi %12, %6 : vector<16x64xi1>
    %14 = vector.broadcast %2 : i32 to vector<16x64xi32>
    %15 = arith.addi %4, %14 : vector<16x64xi32>
    %16 = arith.select %13, %15, %4 : vector<16x64xi1>, vector<16x64xi32>
    %c0_i32_3 = arith.constant 0 : i32
    %17 = vector.broadcast %c0_i32_3 : i32 to vector<16x64xi32>
    %18 = arith.cmpi eq, %16, %17 : vector<16x64xi32>
    %c8_i32_4 = arith.constant 8 : i32
    %c0_i32_5 = arith.constant 0 : i32
    %19 = arith.cmpi eq, %c8_i32_4, %c0_i32_5 : i32
    %c1_i32_6 = arith.constant 1 : i32
    %20 = arith.select %19, %c1_i32_6, %c8_i32_4 : i32
    %21 = vector.broadcast %20 : i32 to vector<16x64xi32>
    %22 = arith.remsi %0, %21 : vector<16x64xi32>
    %c0_i32_7 = arith.constant 0 : i32
    %23 = vector.broadcast %c0_i32_7 : i32 to vector<16x64xi32>
    %24 = arith.cmpi ne, %22, %23 : vector<16x64xi32>
    %c0_i32_8 = arith.constant 0 : i32
    %25 = vector.broadcast %c0_i32_8 : i32 to vector<16x64xi32>
    %26 = arith.cmpi slt, %22, %25 : vector<16x64xi32>
    %c0_i32_9 = arith.constant 0 : i32
    %27 = arith.cmpi slt, %20, %c0_i32_9 : i32
    %28 = vector.broadcast %27 : i1 to vector<16x64xi1>
    %29 = vector.broadcast %28 : vector<16x64xi1> to vector<16x64xi1>
    %30 = arith.xori %26, %29 : vector<16x64xi1>
    %31 = arith.andi %30, %24 : vector<16x64xi1>
    %32 = vector.broadcast %20 : i32 to vector<16x64xi32>
    %33 = arith.addi %22, %32 : vector<16x64xi32>
    %34 = arith.select %31, %33, %22 : vector<16x64xi1>, vector<16x64xi32>
    %c7_i32 = arith.constant 7 : i32
    %35 = vector.broadcast %c7_i32 : i32 to vector<16x64xi32>
    %36 = arith.cmpi eq, %34, %35 : vector<16x64xi32>
    %c0 = arith.constant 0 : index
    %c0_10 = arith.constant 0 : index
    %37 = vector.load %arg0[%c0, %c0_10] : memref<32x16xf32, #tpu.memory_space<vmem>>, vector<32x16xf32>
    %c0_11 = arith.constant 0 : index
    %c0_12 = arith.constant 0 : index
    %38 = vector.load %arg1[%c0_11, %c0_12] : memref<16x64xf32, #tpu.memory_space<vmem>>, vector<16x64xf32>
    %cst = arith.constant dense<0.000000e+00> : vector<32x64xf32>
    %39 = tpu.matmul %37, %38, %cst {dimension_numbers = #tpu.dot_dimension_numbers<[1], [0], [0], [1], [0, 0, 1, 1], [], []>} : vector<32x16xf32>, vector<16x64xf32>, vector<32x64xf32> -> vector<32x64xf32>
    %c0_13 = arith.constant 0 : index
    %c0_14 = arith.constant 0 : index
    %40 = vector.load %arg2[%c0_13, %c0_14] : memref<1x64xf32, #tpu.memory_space<vmem>>, vector<1x64xf32>
    %41 = vector.broadcast %40 : vector<1x64xf32> to vector<32x64xf32>
    %42 = arith.addf %39, %41 : vector<32x64xf32>
    %c0_15 = arith.constant 0 : index
    %c0_16 = arith.constant 0 : index
    %43 = vector.load %arg3[%c0_15, %c0_16] : memref<1x64xf32, #tpu.memory_space<vmem>>, vector<1x64xf32>
    %c0_17 = arith.constant 0 : index
    %c0_18 = arith.constant 0 : index
    %44 = vector.load %arg4[%c0_17, %c0_18] : memref<1x64xf32, #tpu.memory_space<vmem>>, vector<1x64xf32>
    %cst_19 = arith.constant dense<0.000000e+00> : vector<64xf32>
    %45 = vector.multi_reduction <add>, %42, %cst_19 [0] : vector<32x64xf32> to vector<64xf32>
    %46 = vector.shape_cast %45 : vector<64xf32> to vector<1x64xf32>
    %47 = arith.mulf %42, %42 : vector<32x64xf32>
    %cst_20 = arith.constant dense<0.000000e+00> : vector<64xf32>
    %48 = vector.multi_reduction <add>, %47, %cst_20 [0] : vector<32x64xf32> to vector<64xf32>
    %49 = vector.shape_cast %48 : vector<64xf32> to vector<1x64xf32>
    %cst_21 = arith.constant 3.200000e+01 : f32
    %50 = vector.broadcast %cst_21 : f32 to vector<1x64xf32>
    %51 = arith.divf %46, %50 : vector<1x64xf32>
    %cst_22 = arith.constant 3.200000e+01 : f32
    %52 = vector.broadcast %cst_22 : f32 to vector<1x64xf32>
    %53 = arith.divf %49, %52 : vector<1x64xf32>
    %54 = arith.mulf %51, %51 : vector<1x64xf32>
    %55 = arith.subf %53, %54 : vector<1x64xf32>
    %cst_23 = arith.constant 0.000000e+00 : f32
    %56 = vector.broadcast %cst_23 : f32 to vector<1x64xf32>
    %57 = arith.maximumf %55, %56 : vector<1x64xf32>
    %cst_24 = arith.constant 9.99999974E-6 : f32
    %58 = vector.broadcast %cst_24 : f32 to vector<1x64xf32>
    %59 = arith.addf %57, %58 : vector<1x64xf32>
    %60 = math.rsqrt %59 : vector<1x64xf32>
    %61 = arith.mulf %43, %60 : vector<1x64xf32>
    %62 = arith.mulf %51, %61 : vector<1x64xf32>
    %63 = arith.subf %44, %62 : vector<1x64xf32>
    %64 = vector.broadcast %61 : vector<1x64xf32> to vector<32x64xf32>
    %65 = arith.mulf %42, %64 : vector<32x64xf32>
    %66 = vector.broadcast %63 : vector<1x64xf32> to vector<32x64xf32>
    %67 = arith.addf %65, %66 : vector<32x64xf32>
    %cst_25 = arith.constant 0.000000e+00 : f32
    %68 = vector.broadcast %cst_25 : f32 to vector<32x64xf32>
    %69 = arith.maximumf %67, %68 : vector<32x64xf32>
    %70 = vector.extract_strided_slice %69 {offsets = [0, 0], sizes = [16, 64], strides = [1, 1]} : vector<32x64xf32> to vector<16x64xf32>
    %71 = vector.extract_strided_slice %69 {offsets = [16, 0], sizes = [16, 64], strides = [1, 1]} : vector<32x64xf32> to vector<16x64xf32>
    %c1_i32_26 = arith.constant 1 : i32
    %72 = tpu.dynamic_rotate %71 by %c1_i32_26 dim 0 : vector<16x64xf32>, i32 -> vector<16x64xf32>
    %cst_27 = arith.constant 0.000000e+00 : f32
    %73 = vector.broadcast %cst_27 : f32 to vector<16x64xf32>
    %74 = arith.select %18, %73, %72 : vector<16x64xi1>, vector<16x64xf32>
    %c15_i32 = arith.constant 15 : i32
    %75 = tpu.dynamic_rotate %70 by %c15_i32 dim 0 : vector<16x64xf32>, i32 -> vector<16x64xf32>
    %cst_28 = arith.constant 0.000000e+00 : f32
    %76 = vector.broadcast %cst_28 : f32 to vector<16x64xf32>
    %77 = arith.select %36, %76, %75 : vector<16x64xi1>, vector<16x64xf32>
    %78 = tpu.concatenate %74, %70, %71, %77 in 1 : vector<16x64xf32>, vector<16x64xf32>, vector<16x64xf32>, vector<16x64xf32> -> vector<16x256xf32>
    %c0_29 = arith.constant 0 : index
    %c0_30 = arith.constant 0 : index
    %79 = vector.load %arg5[%c0_29, %c0_30] : memref<256x64xf32, #tpu.memory_space<vmem>>, vector<256x64xf32>
    %cst_31 = arith.constant dense<0.000000e+00> : vector<16x64xf32>
    %80 = tpu.matmul %78, %79, %cst_31 {dimension_numbers = #tpu.dot_dimension_numbers<[1], [0], [0], [1], [0, 0, 1, 1], [], []>} : vector<16x256xf32>, vector<256x64xf32>, vector<16x64xf32> -> vector<16x64xf32>
    %c0_32 = arith.constant 0 : index
    %c0_33 = arith.constant 0 : index
    %81 = vector.load %arg6[%c0_32, %c0_33] : memref<1x64xf32, #tpu.memory_space<vmem>>, vector<1x64xf32>
    %82 = vector.broadcast %81 : vector<1x64xf32> to vector<16x64xf32>
    %83 = arith.addf %80, %82 : vector<16x64xf32>
    %cst_34 = arith.constant 0.000000e+00 : f32
    %84 = vector.broadcast %cst_34 : f32 to vector<16x64xf32>
    %85 = arith.maximumf %83, %84 : vector<16x64xf32>
    %c1_i32_35 = arith.constant 1 : i32
    %86 = tpu.dynamic_rotate %85 by %c1_i32_35 dim 0 : vector<16x64xf32>, i32 -> vector<16x64xf32>
    %cst_36 = arith.constant 0.000000e+00 : f32
    %87 = vector.broadcast %cst_36 : f32 to vector<16x64xf32>
    %88 = arith.select %18, %87, %86 : vector<16x64xi1>, vector<16x64xf32>
    %c15_i32_37 = arith.constant 15 : i32
    %89 = tpu.dynamic_rotate %85 by %c15_i32_37 dim 0 : vector<16x64xf32>, i32 -> vector<16x64xf32>
    %cst_38 = arith.constant 0.000000e+00 : f32
    %90 = vector.broadcast %cst_38 : f32 to vector<16x64xf32>
    %91 = arith.select %36, %90, %89 : vector<16x64xi1>, vector<16x64xf32>
    %92 = tpu.concatenate %88, %85, %91 in 1 : vector<16x64xf32>, vector<16x64xf32>, vector<16x64xf32> -> vector<16x192xf32>
    %c0_39 = arith.constant 0 : index
    %c0_40 = arith.constant 0 : index
    %93 = vector.load %arg7[%c0_39, %c0_40] : memref<192x64xf32, #tpu.memory_space<vmem>>, vector<192x64xf32>
    %cst_41 = arith.constant dense<0.000000e+00> : vector<16x64xf32>
    %94 = tpu.matmul %92, %93, %cst_41 {dimension_numbers = #tpu.dot_dimension_numbers<[1], [0], [0], [1], [0, 0, 1, 1], [], []>} : vector<16x192xf32>, vector<192x64xf32>, vector<16x64xf32> -> vector<16x64xf32>
    %c0_42 = arith.constant 0 : index
    %c0_43 = arith.constant 0 : index
    %95 = vector.load %arg8[%c0_42, %c0_43] : memref<1x64xf32, #tpu.memory_space<vmem>>, vector<1x64xf32>
    %96 = vector.broadcast %95 : vector<1x64xf32> to vector<16x64xf32>
    %97 = arith.addf %94, %96 : vector<16x64xf32>
    %c0_44 = arith.constant 0 : index
    %c0_45 = arith.constant 0 : index
    %98 = vector.load %arg9[%c0_44, %c0_45] : memref<1x64xf32, #tpu.memory_space<vmem>>, vector<1x64xf32>
    %c0_46 = arith.constant 0 : index
    %c0_47 = arith.constant 0 : index
    %99 = vector.load %arg10[%c0_46, %c0_47] : memref<1x64xf32, #tpu.memory_space<vmem>>, vector<1x64xf32>
    %cst_48 = arith.constant dense<0.000000e+00> : vector<64xf32>
    %100 = vector.multi_reduction <add>, %97, %cst_48 [0] : vector<16x64xf32> to vector<64xf32>
    %101 = vector.shape_cast %100 : vector<64xf32> to vector<1x64xf32>
    %102 = arith.mulf %97, %97 : vector<16x64xf32>
    %cst_49 = arith.constant dense<0.000000e+00> : vector<64xf32>
    %103 = vector.multi_reduction <add>, %102, %cst_49 [0] : vector<16x64xf32> to vector<64xf32>
    %104 = vector.shape_cast %103 : vector<64xf32> to vector<1x64xf32>
    %cst_50 = arith.constant 1.600000e+01 : f32
    %105 = vector.broadcast %cst_50 : f32 to vector<1x64xf32>
    %106 = arith.divf %101, %105 : vector<1x64xf32>
    %cst_51 = arith.constant 1.600000e+01 : f32
    %107 = vector.broadcast %cst_51 : f32 to vector<1x64xf32>
    %108 = arith.divf %104, %107 : vector<1x64xf32>
    %109 = arith.mulf %106, %106 : vector<1x64xf32>
    %110 = arith.subf %108, %109 : vector<1x64xf32>
    %cst_52 = arith.constant 0.000000e+00 : f32
    %111 = vector.broadcast %cst_52 : f32 to vector<1x64xf32>
    %112 = arith.maximumf %110, %111 : vector<1x64xf32>
    %cst_53 = arith.constant 9.99999974E-6 : f32
    %113 = vector.broadcast %cst_53 : f32 to vector<1x64xf32>
    %114 = arith.addf %112, %113 : vector<1x64xf32>
    %115 = math.rsqrt %114 : vector<1x64xf32>
    %116 = arith.mulf %98, %115 : vector<1x64xf32>
    %117 = arith.mulf %106, %116 : vector<1x64xf32>
    %118 = arith.subf %99, %117 : vector<1x64xf32>
    %119 = vector.broadcast %116 : vector<1x64xf32> to vector<16x64xf32>
    %120 = arith.mulf %97, %119 : vector<16x64xf32>
    %121 = vector.broadcast %118 : vector<1x64xf32> to vector<16x64xf32>
    %122 = arith.addf %120, %121 : vector<16x64xf32>
    %cst_54 = arith.constant 0.000000e+00 : f32
    %123 = vector.broadcast %cst_54 : f32 to vector<16x64xf32>
    %124 = arith.maximumf %122, %123 : vector<16x64xf32>
    %c0_55 = arith.constant 0 : index
    %c0_56 = arith.constant 0 : index
    %125 = vector.load %arg11[%c0_55, %c0_56] : memref<64x64xf32, #tpu.memory_space<vmem>>, vector<64x64xf32>
    %cst_57 = arith.constant dense<0.000000e+00> : vector<16x64xf32>
    %126 = tpu.matmul %124, %125, %cst_57 {dimension_numbers = #tpu.dot_dimension_numbers<[1], [0], [0], [1], [0, 0, 1, 1], [], []>} : vector<16x64xf32>, vector<64x64xf32>, vector<16x64xf32> -> vector<16x64xf32>
    %c0_58 = arith.constant 0 : index
    %c0_59 = arith.constant 0 : index
    %127 = vector.load %arg12[%c0_58, %c0_59] : memref<1x64xf32, #tpu.memory_space<vmem>>, vector<1x64xf32>
    %128 = vector.broadcast %127 : vector<1x64xf32> to vector<16x64xf32>
    %129 = arith.addf %126, %128 : vector<16x64xf32>
    %c0_60 = arith.constant 0 : index
    %c0_61 = arith.constant 0 : index
    %130 = vector.load %arg13[%c0_60, %c0_61] : memref<1x64xf32, #tpu.memory_space<vmem>>, vector<1x64xf32>
    %c0_62 = arith.constant 0 : index
    %c0_63 = arith.constant 0 : index
    %131 = vector.load %arg14[%c0_62, %c0_63] : memref<1x64xf32, #tpu.memory_space<vmem>>, vector<1x64xf32>
    %cst_64 = arith.constant dense<0.000000e+00> : vector<64xf32>
    %132 = vector.multi_reduction <add>, %129, %cst_64 [0] : vector<16x64xf32> to vector<64xf32>
    %133 = vector.shape_cast %132 : vector<64xf32> to vector<1x64xf32>
    %134 = arith.mulf %129, %129 : vector<16x64xf32>
    %cst_65 = arith.constant dense<0.000000e+00> : vector<64xf32>
    %135 = vector.multi_reduction <add>, %134, %cst_65 [0] : vector<16x64xf32> to vector<64xf32>
    %136 = vector.shape_cast %135 : vector<64xf32> to vector<1x64xf32>
    %cst_66 = arith.constant 1.600000e+01 : f32
    %137 = vector.broadcast %cst_66 : f32 to vector<1x64xf32>
    %138 = arith.divf %133, %137 : vector<1x64xf32>
    %cst_67 = arith.constant 1.600000e+01 : f32
    %139 = vector.broadcast %cst_67 : f32 to vector<1x64xf32>
    %140 = arith.divf %136, %139 : vector<1x64xf32>
    %141 = arith.mulf %138, %138 : vector<1x64xf32>
    %142 = arith.subf %140, %141 : vector<1x64xf32>
    %cst_68 = arith.constant 0.000000e+00 : f32
    %143 = vector.broadcast %cst_68 : f32 to vector<1x64xf32>
    %144 = arith.maximumf %142, %143 : vector<1x64xf32>
    %cst_69 = arith.constant 9.99999974E-6 : f32
    %145 = vector.broadcast %cst_69 : f32 to vector<1x64xf32>
    %146 = arith.addf %144, %145 : vector<1x64xf32>
    %147 = math.rsqrt %146 : vector<1x64xf32>
    %148 = arith.mulf %130, %147 : vector<1x64xf32>
    %149 = arith.mulf %138, %148 : vector<1x64xf32>
    %150 = arith.subf %131, %149 : vector<1x64xf32>
    %151 = vector.broadcast %148 : vector<1x64xf32> to vector<16x64xf32>
    %152 = arith.mulf %129, %151 : vector<16x64xf32>
    %153 = vector.broadcast %150 : vector<1x64xf32> to vector<16x64xf32>
    %154 = arith.addf %152, %153 : vector<16x64xf32>
    %155 = arith.addf %83, %154 : vector<16x64xf32>
    %cst_70 = arith.constant 0.000000e+00 : f32
    %156 = vector.broadcast %cst_70 : f32 to vector<16x64xf32>
    %157 = arith.maximumf %155, %156 : vector<16x64xf32>
    %c1_i32_71 = arith.constant 1 : i32
    %158 = tpu.dynamic_rotate %157 by %c1_i32_71 dim 0 : vector<16x64xf32>, i32 -> vector<16x64xf32>
    %cst_72 = arith.constant 0.000000e+00 : f32
    %159 = vector.broadcast %cst_72 : f32 to vector<16x64xf32>
    %160 = arith.select %18, %159, %158 : vector<16x64xi1>, vector<16x64xf32>
    %c15_i32_73 = arith.constant 15 : i32
    %161 = tpu.dynamic_rotate %157 by %c15_i32_73 dim 0 : vector<16x64xf32>, i32 -> vector<16x64xf32>
    %cst_74 = arith.constant 0.000000e+00 : f32
    %162 = vector.broadcast %cst_74 : f32 to vector<16x64xf32>
    %163 = arith.select %36, %162, %161 : vector<16x64xi1>, vector<16x64xf32>
    %164 = tpu.concatenate %160, %157, %163 in 1 : vector<16x64xf32>, vector<16x64xf32>, vector<16x64xf32> -> vector<16x192xf32>
    %c0_75 = arith.constant 0 : index
    %c0_76 = arith.constant 0 : index
    %165 = vector.load %arg15[%c0_75, %c0_76] : memref<192x64xf32, #tpu.memory_space<vmem>>, vector<192x64xf32>
    %cst_77 = arith.constant dense<0.000000e+00> : vector<16x64xf32>
    %166 = tpu.matmul %164, %165, %cst_77 {dimension_numbers = #tpu.dot_dimension_numbers<[1], [0], [0], [1], [0, 0, 1, 1], [], []>} : vector<16x192xf32>, vector<192x64xf32>, vector<16x64xf32> -> vector<16x64xf32>
    %c0_78 = arith.constant 0 : index
    %c0_79 = arith.constant 0 : index
    %167 = vector.load %arg16[%c0_78, %c0_79] : memref<1x64xf32, #tpu.memory_space<vmem>>, vector<1x64xf32>
    %168 = vector.broadcast %167 : vector<1x64xf32> to vector<16x64xf32>
    %169 = arith.addf %166, %168 : vector<16x64xf32>
    %c0_80 = arith.constant 0 : index
    %c0_81 = arith.constant 0 : index
    %170 = vector.load %arg17[%c0_80, %c0_81] : memref<1x64xf32, #tpu.memory_space<vmem>>, vector<1x64xf32>
    %c0_82 = arith.constant 0 : index
    %c0_83 = arith.constant 0 : index
    %171 = vector.load %arg18[%c0_82, %c0_83] : memref<1x64xf32, #tpu.memory_space<vmem>>, vector<1x64xf32>
    %cst_84 = arith.constant dense<0.000000e+00> : vector<64xf32>
    %172 = vector.multi_reduction <add>, %169, %cst_84 [0] : vector<16x64xf32> to vector<64xf32>
    %173 = vector.shape_cast %172 : vector<64xf32> to vector<1x64xf32>
    %174 = arith.mulf %169, %169 : vector<16x64xf32>
    %cst_85 = arith.constant dense<0.000000e+00> : vector<64xf32>
    %175 = vector.multi_reduction <add>, %174, %cst_85 [0] : vector<16x64xf32> to vector<64xf32>
    %176 = vector.shape_cast %175 : vector<64xf32> to vector<1x64xf32>
    %cst_86 = arith.constant 1.600000e+01 : f32
    %177 = vector.broadcast %cst_86 : f32 to vector<1x64xf32>
    %178 = arith.divf %173, %177 : vector<1x64xf32>
    %cst_87 = arith.constant 1.600000e+01 : f32
    %179 = vector.broadcast %cst_87 : f32 to vector<1x64xf32>
    %180 = arith.divf %176, %179 : vector<1x64xf32>
    %181 = arith.mulf %178, %178 : vector<1x64xf32>
    %182 = arith.subf %180, %181 : vector<1x64xf32>
    %cst_88 = arith.constant 0.000000e+00 : f32
    %183 = vector.broadcast %cst_88 : f32 to vector<1x64xf32>
    %184 = arith.maximumf %182, %183 : vector<1x64xf32>
    %cst_89 = arith.constant 9.99999974E-6 : f32
    %185 = vector.broadcast %cst_89 : f32 to vector<1x64xf32>
    %186 = arith.addf %184, %185 : vector<1x64xf32>
    %187 = math.rsqrt %186 : vector<1x64xf32>
    %188 = arith.mulf %170, %187 : vector<1x64xf32>
    %189 = arith.mulf %178, %188 : vector<1x64xf32>
    %190 = arith.subf %171, %189 : vector<1x64xf32>
    %191 = vector.broadcast %188 : vector<1x64xf32> to vector<16x64xf32>
    %192 = arith.mulf %169, %191 : vector<16x64xf32>
    %193 = vector.broadcast %190 : vector<1x64xf32> to vector<16x64xf32>
    %194 = arith.addf %192, %193 : vector<16x64xf32>
    %cst_90 = arith.constant 0.000000e+00 : f32
    %195 = vector.broadcast %cst_90 : f32 to vector<16x64xf32>
    %196 = arith.maximumf %194, %195 : vector<16x64xf32>
    %c0_91 = arith.constant 0 : index
    %c0_92 = arith.constant 0 : index
    %197 = vector.load %arg19[%c0_91, %c0_92] : memref<64x64xf32, #tpu.memory_space<vmem>>, vector<64x64xf32>
    %cst_93 = arith.constant dense<0.000000e+00> : vector<16x64xf32>
    %198 = tpu.matmul %196, %197, %cst_93 {dimension_numbers = #tpu.dot_dimension_numbers<[1], [0], [0], [1], [0, 0, 1, 1], [], []>} : vector<16x64xf32>, vector<64x64xf32>, vector<16x64xf32> -> vector<16x64xf32>
    %c0_94 = arith.constant 0 : index
    %c0_95 = arith.constant 0 : index
    %199 = vector.load %arg20[%c0_94, %c0_95] : memref<1x64xf32, #tpu.memory_space<vmem>>, vector<1x64xf32>
    %200 = vector.broadcast %199 : vector<1x64xf32> to vector<16x64xf32>
    %201 = arith.addf %198, %200 : vector<16x64xf32>
    %c0_96 = arith.constant 0 : index
    %c0_97 = arith.constant 0 : index
    %202 = vector.load %arg21[%c0_96, %c0_97] : memref<1x64xf32, #tpu.memory_space<vmem>>, vector<1x64xf32>
    %c0_98 = arith.constant 0 : index
    %c0_99 = arith.constant 0 : index
    %203 = vector.load %arg22[%c0_98, %c0_99] : memref<1x64xf32, #tpu.memory_space<vmem>>, vector<1x64xf32>
    %cst_100 = arith.constant dense<0.000000e+00> : vector<64xf32>
    %204 = vector.multi_reduction <add>, %201, %cst_100 [0] : vector<16x64xf32> to vector<64xf32>
    %205 = vector.shape_cast %204 : vector<64xf32> to vector<1x64xf32>
    %206 = arith.mulf %201, %201 : vector<16x64xf32>
    %cst_101 = arith.constant dense<0.000000e+00> : vector<64xf32>
    %207 = vector.multi_reduction <add>, %206, %cst_101 [0] : vector<16x64xf32> to vector<64xf32>
    %208 = vector.shape_cast %207 : vector<64xf32> to vector<1x64xf32>
    %cst_102 = arith.constant 1.600000e+01 : f32
    %209 = vector.broadcast %cst_102 : f32 to vector<1x64xf32>
    %210 = arith.divf %205, %209 : vector<1x64xf32>
    %cst_103 = arith.constant 1.600000e+01 : f32
    %211 = vector.broadcast %cst_103 : f32 to vector<1x64xf32>
    %212 = arith.divf %208, %211 : vector<1x64xf32>
    %213 = arith.mulf %210, %210 : vector<1x64xf32>
    %214 = arith.subf %212, %213 : vector<1x64xf32>
    %cst_104 = arith.constant 0.000000e+00 : f32
    %215 = vector.broadcast %cst_104 : f32 to vector<1x64xf32>
    %216 = arith.maximumf %214, %215 : vector<1x64xf32>
    %cst_105 = arith.constant 9.99999974E-6 : f32
    %217 = vector.broadcast %cst_105 : f32 to vector<1x64xf32>
    %218 = arith.addf %216, %217 : vector<1x64xf32>
    %219 = math.rsqrt %218 : vector<1x64xf32>
    %220 = arith.mulf %202, %219 : vector<1x64xf32>
    %221 = arith.mulf %210, %220 : vector<1x64xf32>
    %222 = arith.subf %203, %221 : vector<1x64xf32>
    %223 = vector.broadcast %220 : vector<1x64xf32> to vector<16x64xf32>
    %224 = arith.mulf %201, %223 : vector<16x64xf32>
    %225 = vector.broadcast %222 : vector<1x64xf32> to vector<16x64xf32>
    %226 = arith.addf %224, %225 : vector<16x64xf32>
    %227 = arith.addf %155, %226 : vector<16x64xf32>
    %c0_106 = arith.constant 0 : index
    %c0_107 = arith.constant 0 : index
    %228 = vector.load %arg50[%c0_106, %c0_107] : memref<16x64xf32, #tpu.memory_space<vmem>>, vector<16x64xf32>
    tpu.vector_store %arg50[%c0_106, %c0_107], %227 {strides = array<i32>} : memref<16x64xf32, #tpu.memory_space<vmem>>, vector<16x64xf32>,
    %c0_108 = arith.constant 0 : index
    %c0_109 = arith.constant 0 : index
    %229 = vector.load %arg23[%c0_108, %c0_109] : memref<64x512xf32, #tpu.memory_space<vmem>>, vector<64x512xf32>
    %cst_110 = arith.constant dense<0.000000e+00> : vector<16x512xf32>
    %230 = tpu.matmul %227, %229, %cst_110 {dimension_numbers = #tpu.dot_dimension_numbers<[1], [0], [0], [1], [0, 0, 1, 1], [], []>} : vector<16x64xf32>, vector<64x512xf32>, vector<16x512xf32> -> vector<16x512xf32>
    %c0_111 = arith.constant 0 : index
    %c0_112 = arith.constant 0 : index
    %231 = vector.load %arg25[%c0_111, %c0_112] : memref<1x512xf32, #tpu.memory_space<vmem>>, vector<1x512xf32>
    %cst_113 = arith.constant 2.000000e+00 : f32
    %232 = vector.broadcast %cst_113 : f32 to vector<16x512xf32>
    %233 = arith.mulf %232, %230 : vector<16x512xf32>
    %234 = vector.broadcast %231 : vector<1x512xf32> to vector<16x512xf32>
    %235 = arith.subf %234, %233 : vector<16x512xf32>
    %cst_114 = arith.constant dense<0x7F800000> : vector<16xf32>
    %236 = vector.multi_reduction <minimumf>, %235, %cst_114 [1] : vector<16x512xf32> to vector<16xf32>
    %237 = vector.shape_cast %236 : vector<16xf32> to vector<16x1xf32>
    %238 = tpu.iota {dimensions = array<i32: 1>} : vector<16x512xi32>
    %239 = vector.broadcast %237 : vector<16x1xf32> to vector<16x512xf32>
    %240 = arith.cmpf ole, %235, %239 : vector<16x512xf32>
    %c512_i32 = arith.constant 512 : i32
    %241 = vector.broadcast %c512_i32 : i32 to vector<16x512xi32>
    %242 = arith.select %240, %238, %241 : vector<16x512xi1>, vector<16x512xi32>
    %cst_115 = arith.constant dense<2147483647> : vector<16xi32>
    %243 = vector.multi_reduction <minsi>, %242, %cst_115 [1] : vector<16x512xi32> to vector<16xi32>
    %244 = vector.shape_cast %243 : vector<16xi32> to vector<16x1xi32>
    %245 = vector.broadcast %244 : vector<16x1xi32> to vector<16x512xi32>
    %246 = arith.cmpi eq, %238, %245 : vector<16x512xi32>
    %247 = arith.extui %246 : vector<16x512xi1> to vector<16x512xi32>
    %248 = arith.sitofp %247 : vector<16x512xi32> to vector<16x512xf32>
    %c0_116 = arith.constant 0 : index
    %c0_117 = arith.constant 0 : index
    %249 = vector.load %arg24[%c0_116, %c0_117] : memref<512x64xf32, #tpu.memory_space<vmem>>, vector<512x64xf32>
    %cst_118 = arith.constant dense<0.000000e+00> : vector<16x64xf32>
    %250 = tpu.matmul %248, %249, %cst_118 {dimension_numbers = #tpu.dot_dimension_numbers<[1], [0], [0], [1], [0, 0, 1, 1], [], []>} : vector<16x512xf32>, vector<512x64xf32>, vector<16x64xf32> -> vector<16x64xf32>
    %c0_119 = arith.constant 0 : index
    %c0_120 = arith.constant 0 : index
    %251 = vector.load %arg51[%c0_119, %c0_120] : memref<16x64xf32, #tpu.memory_space<vmem>>, vector<16x64xf32>
    tpu.vector_store %arg51[%c0_119, %c0_120], %250 {strides = array<i32>} : memref<16x64xf32, #tpu.memory_space<vmem>>, vector<16x64xf32>,
    %c0_121 = arith.constant 0 : index
    %c0_122 = arith.constant 0 : index
    %252 = vector.load %arg26[%c0_121, %c0_122] : memref<64x1xf32, #tpu.memory_space<vmem>>, vector<64x1xf32>
    %cst_123 = arith.constant dense<0.000000e+00> : vector<16x1xf32>
    %253 = tpu.matmul %250, %252, %cst_123 {dimension_numbers = #tpu.dot_dimension_numbers<[1], [0], [0], [1], [0, 0, 1, 1], [], []>} : vector<16x64xf32>, vector<64x1xf32>, vector<16x1xf32> -> vector<16x1xf32>
    %c0_124 = arith.constant 0 : index
    %c0_125 = arith.constant 0 : index
    %254 = vector.load %arg27[%c0_124, %c0_125] : memref<1x1xf32, #tpu.memory_space<vmem>>, vector<1x1xf32>
    %255 = vector.broadcast %254 : vector<1x1xf32> to vector<16x1xf32>
    %256 = arith.addf %253, %255 : vector<16x1xf32>
    %c0_126 = arith.constant 0 : index
    %c0_127 = arith.constant 0 : index
    %257 = vector.load %arg52[%c0_126, %c0_127] : memref<16x1xf32, #tpu.memory_space<vmem>>, vector<16x1xf32>
    tpu.vector_store %arg52[%c0_126, %c0_127], %256 {strides = array<i32>} : memref<16x1xf32, #tpu.memory_space<vmem>>, vector<16x1xf32>,
    %cst_128 = arith.constant 0.000000e+00 : f32
    %258 = vector.broadcast %cst_128 : f32 to vector<16x64xf32>
    %259 = arith.maximumf %250, %258 : vector<16x64xf32>
    %c1_i32_129 = arith.constant 1 : i32
    %260 = tpu.dynamic_rotate %259 by %c1_i32_129 dim 0 : vector<16x64xf32>, i32 -> vector<16x64xf32>
    %cst_130 = arith.constant 0.000000e+00 : f32
    %261 = vector.broadcast %cst_130 : f32 to vector<16x64xf32>
    %262 = arith.select %18, %261, %260 : vector<16x64xi1>, vector<16x64xf32>
    %c15_i32_131 = arith.constant 15 : i32
    %263 = tpu.dynamic_rotate %259 by %c15_i32_131 dim 0 : vector<16x64xf32>, i32 -> vector<16x64xf32>
    %cst_132 = arith.constant 0.000000e+00 : f32
    %264 = vector.broadcast %cst_132 : f32 to vector<16x64xf32>
    %265 = arith.select %36, %264, %263 : vector<16x64xi1>, vector<16x64xf32>
    %266 = tpu.concatenate %262, %259, %265 in 1 : vector<16x64xf32>, vector<16x64xf32>, vector<16x64xf32> -> vector<16x192xf32>
    %c0_133 = arith.constant 0 : index
    %c0_134 = arith.constant 0 : index
    %267 = vector.load %arg28[%c0_133, %c0_134] : memref<192x64xf32, #tpu.memory_space<vmem>>, vector<192x64xf32>
    %cst_135 = arith.constant dense<0.000000e+00> : vector<16x64xf32>
    %268 = tpu.matmul %266, %267, %cst_135 {dimension_numbers = #tpu.dot_dimension_numbers<[1], [0], [0], [1], [0, 0, 1, 1], [], []>} : vector<16x192xf32>, vector<192x64xf32>, vector<16x64xf32> -> vector<16x64xf32>
    %c0_136 = arith.constant 0 : index
    %c0_137 = arith.constant 0 : index
    %269 = vector.load %arg29[%c0_136, %c0_137] : memref<1x64xf32, #tpu.memory_space<vmem>>, vector<1x64xf32>
    %270 = vector.broadcast %269 : vector<1x64xf32> to vector<16x64xf32>
    %271 = arith.addf %268, %270 : vector<16x64xf32>
    %c0_138 = arith.constant 0 : index
    %c0_139 = arith.constant 0 : index
    %272 = vector.load %arg30[%c0_138, %c0_139] : memref<1x64xf32, #tpu.memory_space<vmem>>, vector<1x64xf32>
    %c0_140 = arith.constant 0 : index
    %c0_141 = arith.constant 0 : index
    %273 = vector.load %arg31[%c0_140, %c0_141] : memref<1x64xf32, #tpu.memory_space<vmem>>, vector<1x64xf32>
    %cst_142 = arith.constant dense<0.000000e+00> : vector<64xf32>
    %274 = vector.multi_reduction <add>, %271, %cst_142 [0] : vector<16x64xf32> to vector<64xf32>
    %275 = vector.shape_cast %274 : vector<64xf32> to vector<1x64xf32>
    %276 = arith.mulf %271, %271 : vector<16x64xf32>
    %cst_143 = arith.constant dense<0.000000e+00> : vector<64xf32>
    %277 = vector.multi_reduction <add>, %276, %cst_143 [0] : vector<16x64xf32> to vector<64xf32>
    %278 = vector.shape_cast %277 : vector<64xf32> to vector<1x64xf32>
    %cst_144 = arith.constant 1.600000e+01 : f32
    %279 = vector.broadcast %cst_144 : f32 to vector<1x64xf32>
    %280 = arith.divf %275, %279 : vector<1x64xf32>
    %cst_145 = arith.constant 1.600000e+01 : f32
    %281 = vector.broadcast %cst_145 : f32 to vector<1x64xf32>
    %282 = arith.divf %278, %281 : vector<1x64xf32>
    %283 = arith.mulf %280, %280 : vector<1x64xf32>
    %284 = arith.subf %282, %283 : vector<1x64xf32>
    %cst_146 = arith.constant 0.000000e+00 : f32
    %285 = vector.broadcast %cst_146 : f32 to vector<1x64xf32>
    %286 = arith.maximumf %284, %285 : vector<1x64xf32>
    %cst_147 = arith.constant 9.99999974E-6 : f32
    %287 = vector.broadcast %cst_147 : f32 to vector<1x64xf32>
    %288 = arith.addf %286, %287 : vector<1x64xf32>
    %289 = math.rsqrt %288 : vector<1x64xf32>
    %290 = arith.mulf %272, %289 : vector<1x64xf32>
    %291 = arith.mulf %280, %290 : vector<1x64xf32>
    %292 = arith.subf %273, %291 : vector<1x64xf32>
    %293 = vector.broadcast %290 : vector<1x64xf32> to vector<16x64xf32>
    %294 = arith.mulf %271, %293 : vector<16x64xf32>
    %295 = vector.broadcast %292 : vector<1x64xf32> to vector<16x64xf32>
    %296 = arith.addf %294, %295 : vector<16x64xf32>
    %cst_148 = arith.constant 0.000000e+00 : f32
    %297 = vector.broadcast %cst_148 : f32 to vector<16x64xf32>
    %298 = arith.maximumf %296, %297 : vector<16x64xf32>
    %c0_149 = arith.constant 0 : index
    %c0_150 = arith.constant 0 : index
    %299 = vector.load %arg32[%c0_149, %c0_150] : memref<64x64xf32, #tpu.memory_space<vmem>>, vector<64x64xf32>
    %cst_151 = arith.constant dense<0.000000e+00> : vector<16x64xf32>
    %300 = tpu.matmul %298, %299, %cst_151 {dimension_numbers = #tpu.dot_dimension_numbers<[1], [0], [0], [1], [0, 0, 1, 1], [], []>} : vector<16x64xf32>, vector<64x64xf32>, vector<16x64xf32> -> vector<16x64xf32>
    %c0_152 = arith.constant 0 : index
    %c0_153 = arith.constant 0 : index
    %301 = vector.load %arg33[%c0_152, %c0_153] : memref<1x64xf32, #tpu.memory_space<vmem>>, vector<1x64xf32>
    %302 = vector.broadcast %301 : vector<1x64xf32> to vector<16x64xf32>
    %303 = arith.addf %300, %302 : vector<16x64xf32>
    %c0_154 = arith.constant 0 : index
    %c0_155 = arith.constant 0 : index
    %304 = vector.load %arg34[%c0_154, %c0_155] : memref<1x64xf32, #tpu.memory_space<vmem>>, vector<1x64xf32>
    %c0_156 = arith.constant 0 : index
    %c0_157 = arith.constant 0 : index
    %305 = vector.load %arg35[%c0_156, %c0_157] : memref<1x64xf32, #tpu.memory_space<vmem>>, vector<1x64xf32>
    %cst_158 = arith.constant dense<0.000000e+00> : vector<64xf32>
    %306 = vector.multi_reduction <add>, %303, %cst_158 [0] : vector<16x64xf32> to vector<64xf32>
    %307 = vector.shape_cast %306 : vector<64xf32> to vector<1x64xf32>
    %308 = arith.mulf %303, %303 : vector<16x64xf32>
    %cst_159 = arith.constant dense<0.000000e+00> : vector<64xf32>
    %309 = vector.multi_reduction <add>, %308, %cst_159 [0] : vector<16x64xf32> to vector<64xf32>
    %310 = vector.shape_cast %309 : vector<64xf32> to vector<1x64xf32>
    %cst_160 = arith.constant 1.600000e+01 : f32
    %311 = vector.broadcast %cst_160 : f32 to vector<1x64xf32>
    %312 = arith.divf %307, %311 : vector<1x64xf32>
    %cst_161 = arith.constant 1.600000e+01 : f32
    %313 = vector.broadcast %cst_161 : f32 to vector<1x64xf32>
    %314 = arith.divf %310, %313 : vector<1x64xf32>
    %315 = arith.mulf %312, %312 : vector<1x64xf32>
    %316 = arith.subf %314, %315 : vector<1x64xf32>
    %cst_162 = arith.constant 0.000000e+00 : f32
    %317 = vector.broadcast %cst_162 : f32 to vector<1x64xf32>
    %318 = arith.maximumf %316, %317 : vector<1x64xf32>
    %cst_163 = arith.constant 9.99999974E-6 : f32
    %319 = vector.broadcast %cst_163 : f32 to vector<1x64xf32>
    %320 = arith.addf %318, %319 : vector<1x64xf32>
    %321 = math.rsqrt %320 : vector<1x64xf32>
    %322 = arith.mulf %304, %321 : vector<1x64xf32>
    %323 = arith.mulf %312, %322 : vector<1x64xf32>
    %324 = arith.subf %305, %323 : vector<1x64xf32>
    %325 = vector.broadcast %322 : vector<1x64xf32> to vector<16x64xf32>
    %326 = arith.mulf %303, %325 : vector<16x64xf32>
    %327 = vector.broadcast %324 : vector<1x64xf32> to vector<16x64xf32>
    %328 = arith.addf %326, %327 : vector<16x64xf32>
    %329 = arith.addf %250, %328 : vector<16x64xf32>
    %cst_164 = arith.constant 0.000000e+00 : f32
    %330 = vector.broadcast %cst_164 : f32 to vector<16x64xf32>
    %331 = arith.maximumf %329, %330 : vector<16x64xf32>
    %c1_i32_165 = arith.constant 1 : i32
    %332 = tpu.dynamic_rotate %331 by %c1_i32_165 dim 0 : vector<16x64xf32>, i32 -> vector<16x64xf32>
    %cst_166 = arith.constant 0.000000e+00 : f32
    %333 = vector.broadcast %cst_166 : f32 to vector<16x64xf32>
    %334 = arith.select %18, %333, %332 : vector<16x64xi1>, vector<16x64xf32>
    %c15_i32_167 = arith.constant 15 : i32
    %335 = tpu.dynamic_rotate %331 by %c15_i32_167 dim 0 : vector<16x64xf32>, i32 -> vector<16x64xf32>
    %cst_168 = arith.constant 0.000000e+00 : f32
    %336 = vector.broadcast %cst_168 : f32 to vector<16x64xf32>
    %337 = arith.select %36, %336, %335 : vector<16x64xi1>, vector<16x64xf32>
    %338 = tpu.concatenate %334, %331, %337 in 1 : vector<16x64xf32>, vector<16x64xf32>, vector<16x64xf32> -> vector<16x192xf32>
    %c0_169 = arith.constant 0 : index
    %c0_170 = arith.constant 0 : index
    %339 = vector.load %arg36[%c0_169, %c0_170] : memref<192x64xf32, #tpu.memory_space<vmem>>, vector<192x64xf32>
    %cst_171 = arith.constant dense<0.000000e+00> : vector<16x64xf32>
    %340 = tpu.matmul %338, %339, %cst_171 {dimension_numbers = #tpu.dot_dimension_numbers<[1], [0], [0], [1], [0, 0, 1, 1], [], []>} : vector<16x192xf32>, vector<192x64xf32>, vector<16x64xf32> -> vector<16x64xf32>
    %c0_172 = arith.constant 0 : index
    %c0_173 = arith.constant 0 : index
    %341 = vector.load %arg37[%c0_172, %c0_173] : memref<1x64xf32, #tpu.memory_space<vmem>>, vector<1x64xf32>
    %342 = vector.broadcast %341 : vector<1x64xf32> to vector<16x64xf32>
    %343 = arith.addf %340, %342 : vector<16x64xf32>
    %c0_174 = arith.constant 0 : index
    %c0_175 = arith.constant 0 : index
    %344 = vector.load %arg38[%c0_174, %c0_175] : memref<1x64xf32, #tpu.memory_space<vmem>>, vector<1x64xf32>
    %c0_176 = arith.constant 0 : index
    %c0_177 = arith.constant 0 : index
    %345 = vector.load %arg39[%c0_176, %c0_177] : memref<1x64xf32, #tpu.memory_space<vmem>>, vector<1x64xf32>
    %cst_178 = arith.constant dense<0.000000e+00> : vector<64xf32>
    %346 = vector.multi_reduction <add>, %343, %cst_178 [0] : vector<16x64xf32> to vector<64xf32>
    %347 = vector.shape_cast %346 : vector<64xf32> to vector<1x64xf32>
    %348 = arith.mulf %343, %343 : vector<16x64xf32>
    %cst_179 = arith.constant dense<0.000000e+00> : vector<64xf32>
    %349 = vector.multi_reduction <add>, %348, %cst_179 [0] : vector<16x64xf32> to vector<64xf32>
    %350 = vector.shape_cast %349 : vector<64xf32> to vector<1x64xf32>
    %cst_180 = arith.constant 1.600000e+01 : f32
    %351 = vector.broadcast %cst_180 : f32 to vector<1x64xf32>
    %352 = arith.divf %347, %351 : vector<1x64xf32>
    %cst_181 = arith.constant 1.600000e+01 : f32
    %353 = vector.broadcast %cst_181 : f32 to vector<1x64xf32>
    %354 = arith.divf %350, %353 : vector<1x64xf32>
    %355 = arith.mulf %352, %352 : vector<1x64xf32>
    %356 = arith.subf %354, %355 : vector<1x64xf32>
    %cst_182 = arith.constant 0.000000e+00 : f32
    %357 = vector.broadcast %cst_182 : f32 to vector<1x64xf32>
    %358 = arith.maximumf %356, %357 : vector<1x64xf32>
    %cst_183 = arith.constant 9.99999974E-6 : f32
    %359 = vector.broadcast %cst_183 : f32 to vector<1x64xf32>
    %360 = arith.addf %358, %359 : vector<1x64xf32>
    %361 = math.rsqrt %360 : vector<1x64xf32>
    %362 = arith.mulf %344, %361 : vector<1x64xf32>
    %363 = arith.mulf %352, %362 : vector<1x64xf32>
    %364 = arith.subf %345, %363 : vector<1x64xf32>
    %365 = vector.broadcast %362 : vector<1x64xf32> to vector<16x64xf32>
    %366 = arith.mulf %343, %365 : vector<16x64xf32>
    %367 = vector.broadcast %364 : vector<1x64xf32> to vector<16x64xf32>
    %368 = arith.addf %366, %367 : vector<16x64xf32>
    %cst_184 = arith.constant 0.000000e+00 : f32
    %369 = vector.broadcast %cst_184 : f32 to vector<16x64xf32>
    %370 = arith.maximumf %368, %369 : vector<16x64xf32>
    %c0_185 = arith.constant 0 : index
    %c0_186 = arith.constant 0 : index
    %371 = vector.load %arg40[%c0_185, %c0_186] : memref<64x64xf32, #tpu.memory_space<vmem>>, vector<64x64xf32>
    %cst_187 = arith.constant dense<0.000000e+00> : vector<16x64xf32>
    %372 = tpu.matmul %370, %371, %cst_187 {dimension_numbers = #tpu.dot_dimension_numbers<[1], [0], [0], [1], [0, 0, 1, 1], [], []>} : vector<16x64xf32>, vector<64x64xf32>, vector<16x64xf32> -> vector<16x64xf32>
    %c0_188 = arith.constant 0 : index
    %c0_189 = arith.constant 0 : index
    %373 = vector.load %arg41[%c0_188, %c0_189] : memref<1x64xf32, #tpu.memory_space<vmem>>, vector<1x64xf32>
    %374 = vector.broadcast %373 : vector<1x64xf32> to vector<16x64xf32>
    %375 = arith.addf %372, %374 : vector<16x64xf32>
    %c0_190 = arith.constant 0 : index
    %c0_191 = arith.constant 0 : index
    %376 = vector.load %arg42[%c0_190, %c0_191] : memref<1x64xf32, #tpu.memory_space<vmem>>, vector<1x64xf32>
    %c0_192 = arith.constant 0 : index
    %c0_193 = arith.constant 0 : index
    %377 = vector.load %arg43[%c0_192, %c0_193] : memref<1x64xf32, #tpu.memory_space<vmem>>, vector<1x64xf32>
    %cst_194 = arith.constant dense<0.000000e+00> : vector<64xf32>
    %378 = vector.multi_reduction <add>, %375, %cst_194 [0] : vector<16x64xf32> to vector<64xf32>
    %379 = vector.shape_cast %378 : vector<64xf32> to vector<1x64xf32>
    %380 = arith.mulf %375, %375 : vector<16x64xf32>
    %cst_195 = arith.constant dense<0.000000e+00> : vector<64xf32>
    %381 = vector.multi_reduction <add>, %380, %cst_195 [0] : vector<16x64xf32> to vector<64xf32>
    %382 = vector.shape_cast %381 : vector<64xf32> to vector<1x64xf32>
    %cst_196 = arith.constant 1.600000e+01 : f32
    %383 = vector.broadcast %cst_196 : f32 to vector<1x64xf32>
    %384 = arith.divf %379, %383 : vector<1x64xf32>
    %cst_197 = arith.constant 1.600000e+01 : f32
    %385 = vector.broadcast %cst_197 : f32 to vector<1x64xf32>
    %386 = arith.divf %382, %385 : vector<1x64xf32>
    %387 = arith.mulf %384, %384 : vector<1x64xf32>
    %388 = arith.subf %386, %387 : vector<1x64xf32>
    %cst_198 = arith.constant 0.000000e+00 : f32
    %389 = vector.broadcast %cst_198 : f32 to vector<1x64xf32>
    %390 = arith.maximumf %388, %389 : vector<1x64xf32>
    %cst_199 = arith.constant 9.99999974E-6 : f32
    %391 = vector.broadcast %cst_199 : f32 to vector<1x64xf32>
    %392 = arith.addf %390, %391 : vector<1x64xf32>
    %393 = math.rsqrt %392 : vector<1x64xf32>
    %394 = arith.mulf %376, %393 : vector<1x64xf32>
    %395 = arith.mulf %384, %394 : vector<1x64xf32>
    %396 = arith.subf %377, %395 : vector<1x64xf32>
    %397 = vector.broadcast %394 : vector<1x64xf32> to vector<16x64xf32>
    %398 = arith.mulf %375, %397 : vector<16x64xf32>
    %399 = vector.broadcast %396 : vector<1x64xf32> to vector<16x64xf32>
    %400 = arith.addf %398, %399 : vector<16x64xf32>
    %401 = arith.addf %329, %400 : vector<16x64xf32>
    %cst_200 = arith.constant 0.000000e+00 : f32
    %402 = vector.broadcast %cst_200 : f32 to vector<16x64xf32>
    %403 = arith.maximumf %401, %402 : vector<16x64xf32>
    %c1_i32_201 = arith.constant 1 : i32
    %404 = tpu.dynamic_rotate %403 by %c1_i32_201 dim 0 : vector<16x64xf32>, i32 -> vector<16x64xf32>
    %cst_202 = arith.constant 0.000000e+00 : f32
    %405 = vector.broadcast %cst_202 : f32 to vector<16x64xf32>
    %406 = arith.select %18, %405, %404 : vector<16x64xi1>, vector<16x64xf32>
    %c15_i32_203 = arith.constant 15 : i32
    %407 = tpu.dynamic_rotate %403 by %c15_i32_203 dim 0 : vector<16x64xf32>, i32 -> vector<16x64xf32>
    %cst_204 = arith.constant 0.000000e+00 : f32
    %408 = vector.broadcast %cst_204 : f32 to vector<16x64xf32>
    %409 = arith.select %36, %408, %407 : vector<16x64xi1>, vector<16x64xf32>
    %410 = tpu.concatenate %406, %403, %409 in 1 : vector<16x64xf32>, vector<16x64xf32>, vector<16x64xf32> -> vector<16x192xf32>
    %c0_205 = arith.constant 0 : index
    %c0_206 = arith.constant 0 : index
    %411 = vector.load %arg44[%c0_205, %c0_206] : memref<192x128xf32, #tpu.memory_space<vmem>>, vector<192x128xf32>
    %cst_207 = arith.constant dense<0.000000e+00> : vector<16x128xf32>
    %412 = tpu.matmul %410, %411, %cst_207 {dimension_numbers = #tpu.dot_dimension_numbers<[1], [0], [0], [1], [0, 0, 1, 1], [], []>} : vector<16x192xf32>, vector<192x128xf32>, vector<16x128xf32> -> vector<16x128xf32>
    %c0_208 = arith.constant 0 : index
    %c0_209 = arith.constant 0 : index
    %413 = vector.load %arg45[%c0_208, %c0_209] : memref<1x128xf32, #tpu.memory_space<vmem>>, vector<1x128xf32>
    %414 = vector.broadcast %413 : vector<1x128xf32> to vector<16x128xf32>
    %415 = arith.addf %412, %414 : vector<16x128xf32>
    %cst_210 = arith.constant dense<0.000000e+00> : vector<128xf32>
    %416 = vector.multi_reduction <add>, %415, %cst_210 [0] : vector<16x128xf32> to vector<128xf32>
    %417 = vector.shape_cast %416 : vector<128xf32> to vector<1x128xf32>
    %418 = arith.mulf %415, %415 : vector<16x128xf32>
    %cst_211 = arith.constant dense<0.000000e+00> : vector<128xf32>
    %419 = vector.multi_reduction <add>, %418, %cst_211 [0] : vector<16x128xf32> to vector<128xf32>
    %420 = vector.shape_cast %419 : vector<128xf32> to vector<1x128xf32>
    %421 = vector.extract_strided_slice %417 {offsets = [0, 0], sizes = [1, 64], strides = [1, 1]} : vector<1x128xf32> to vector<1x64xf32>
    %422 = vector.extract_strided_slice %417 {offsets = [0, 64], sizes = [1, 64], strides = [1, 1]} : vector<1x128xf32> to vector<1x64xf32>
    %423 = arith.addf %421, %422 : vector<1x64xf32>
    %424 = vector.extract_strided_slice %420 {offsets = [0, 0], sizes = [1, 64], strides = [1, 1]} : vector<1x128xf32> to vector<1x64xf32>
    %425 = vector.extract_strided_slice %420 {offsets = [0, 64], sizes = [1, 64], strides = [1, 1]} : vector<1x128xf32> to vector<1x64xf32>
    %426 = arith.addf %424, %425 : vector<1x64xf32>
    %c0_212 = arith.constant 0 : index
    %c0_213 = arith.constant 0 : index
    %427 = vector.load %arg46[%c0_212, %c0_213] : memref<1x64xf32, #tpu.memory_space<vmem>>, vector<1x64xf32>
    %c0_214 = arith.constant 0 : index
    %c0_215 = arith.constant 0 : index
    %428 = vector.load %arg47[%c0_214, %c0_215] : memref<1x64xf32, #tpu.memory_space<vmem>>, vector<1x64xf32>
    %cst_216 = arith.constant 3.200000e+01 : f32
    %429 = vector.broadcast %cst_216 : f32 to vector<1x64xf32>
    %430 = arith.divf %423, %429 : vector<1x64xf32>
    %cst_217 = arith.constant 3.200000e+01 : f32
    %431 = vector.broadcast %cst_217 : f32 to vector<1x64xf32>
    %432 = arith.divf %426, %431 : vector<1x64xf32>
    %433 = arith.mulf %430, %430 : vector<1x64xf32>
    %434 = arith.subf %432, %433 : vector<1x64xf32>
    %cst_218 = arith.constant 0.000000e+00 : f32
    %435 = vector.broadcast %cst_218 : f32 to vector<1x64xf32>
    %436 = arith.maximumf %434, %435 : vector<1x64xf32>
    %cst_219 = arith.constant 9.99999974E-6 : f32
    %437 = vector.broadcast %cst_219 : f32 to vector<1x64xf32>
    %438 = arith.addf %436, %437 : vector<1x64xf32>
    %439 = math.rsqrt %438 : vector<1x64xf32>
    %440 = arith.mulf %427, %439 : vector<1x64xf32>
    %441 = arith.mulf %430, %440 : vector<1x64xf32>
    %442 = arith.subf %428, %441 : vector<1x64xf32>
    %443 = tpu.concatenate %440, %440 in 1 : vector<1x64xf32>, vector<1x64xf32> -> vector<1x128xf32>
    %444 = vector.broadcast %443 : vector<1x128xf32> to vector<16x128xf32>
    %445 = arith.mulf %415, %444 : vector<16x128xf32>
    %446 = tpu.concatenate %442, %442 in 1 : vector<1x64xf32>, vector<1x64xf32> -> vector<1x128xf32>
    %447 = vector.broadcast %446 : vector<1x128xf32> to vector<16x128xf32>
    %448 = arith.addf %445, %447 : vector<16x128xf32>
    %cst_220 = arith.constant 0.000000e+00 : f32
    %449 = vector.broadcast %cst_220 : f32 to vector<16x128xf32>
    %450 = arith.maximumf %448, %449 : vector<16x128xf32>
    %451 = vector.extract_strided_slice %450 {offsets = [0, 0], sizes = [16, 64], strides = [1, 1]} : vector<16x128xf32> to vector<16x64xf32>
    %452 = vector.extract_strided_slice %450 {offsets = [0, 64], sizes = [16, 64], strides = [1, 1]} : vector<16x128xf32> to vector<16x64xf32>
    %c1_i32_221 = arith.constant 1 : i32
    %453 = tpu.dynamic_rotate %452 by %c1_i32_221 dim 0 : vector<16x64xf32>, i32 -> vector<16x64xf32>
    %cst_222 = arith.constant 0.000000e+00 : f32
    %454 = vector.broadcast %cst_222 : f32 to vector<16x64xf32>
    %455 = arith.select %18, %454, %453 : vector<16x64xi1>, vector<16x64xf32>
    %c15_i32_223 = arith.constant 15 : i32
    %456 = tpu.dynamic_rotate %451 by %c15_i32_223 dim 0 : vector<16x64xf32>, i32 -> vector<16x64xf32>
    %cst_224 = arith.constant 0.000000e+00 : f32
    %457 = vector.broadcast %cst_224 : f32 to vector<16x64xf32>
    %458 = arith.select %36, %457, %456 : vector<16x64xi1>, vector<16x64xf32>
    %459 = tpu.concatenate %455, %451, %452, %458 in 1 : vector<16x64xf32>, vector<16x64xf32>, vector<16x64xf32>, vector<16x64xf32> -> vector<16x256xf32>
    %c0_225 = arith.constant 0 : index
    %c0_226 = arith.constant 0 : index
    %460 = vector.load %arg48[%c0_225, %c0_226] : memref<256x16xf32, #tpu.memory_space<vmem>>, vector<256x16xf32>
    %cst_227 = arith.constant dense<0.000000e+00> : vector<16x16xf32>
    %461 = tpu.matmul %459, %460, %cst_227 {dimension_numbers = #tpu.dot_dimension_numbers<[1], [0], [0], [1], [0, 0, 1, 1], [], []>} : vector<16x256xf32>, vector<256x16xf32>, vector<16x16xf32> -> vector<16x16xf32>
    %c0_228 = arith.constant 0 : index
    %c0_229 = arith.constant 0 : index
    %462 = vector.load %arg49[%c0_228, %c0_229] : memref<1x16xf32, #tpu.memory_space<vmem>>, vector<1x16xf32>
    %463 = vector.broadcast %462 : vector<1x16xf32> to vector<16x16xf32>
    %464 = arith.addf %461, %463 : vector<16x16xf32>
    %465 = math.tanh %464 : vector<16x16xf32>
    %c0_230 = arith.constant 0 : index
    %c0_231 = arith.constant 0 : index
    %466 = vector.load %arg53[%c0_230, %c0_231] : memref<16x16xf32, #tpu.memory_space<vmem>>, vector<16x16xf32>
    tpu.vector_store %arg53[%c0_230, %c0_231], %465 {strides = array<i32>} : memref<16x16xf32, #tpu.memory_space<vmem>>, vector<16x16xf32>,
    return
  }
}

</mosaic_0001>

<bundles_post_ra>
// kernel: vqvae_forward.1
= control target key start
LH: loop header
LB: loop body
LE: loop exit
PB: predicated region body
PF: predicated region fallthrough
CT: control target
= control target key end

     0   :  { %s4013_s6 = smov 1   ;;  %s4014_s10 = smov 2   ;;  %s5175_s0 = inlined_call_operand.smem [shape: u32[54], index: -1, kind: input, shape index: {}] }
   0x1   :  { %s4084_s5 = sld [smem:[%s5175_s0]]   ;;  %s4015_s14 = smov 3  }
   0x2   :  { %s4089_s9 = sld [smem:[%s5175_s0 + %s4013_s6]]   ;;  %s4016_s18 = smov 4  }
   0x3   :  { %s4094_s13 = sld [smem:[%s5175_s0 + %s4014_s10]]   ;;  %s4017_s22 = smov 5  }
   0x4   :  { %s4099_s17 = sld [smem:[%s5175_s0 + %s4015_s14]]   ;;  %s4018_s26 = smov 6  }
   0x5   :  { %s4104_s21 = sld [smem:[%s5175_s0 + %s4016_s18]]   ;;  %s4019_s30 = smov 7  }
   0x6   :  { %s4109_s25 = sld [smem:[%s5175_s0 + %s4017_s22]]   ;;  %s4020_s4 = smov 8  }
   0x7   :  { %s4114_s29 = sld [smem:[%s5175_s0 + %s4018_s26]]   ;;  %s4021_s10 = smov 9  }
   0x8   :  { %s4119_s3 = sld [smem:[%s5175_s0 + %s4019_s30]]   ;;  %s4022_s15 = smov 10  }
   0x9   :  { %s4124_s8 = sld [smem:[%s5175_s0 + %s4020_s4]]   ;;  %s4023_s20 = smov 11  }
   0xa   :  { %s4129_s14 = sld [smem:[%s5175_s0 + %s4021_s10]]   ;;  %s4024_s26 = smov 12  }
   0xb   :  { %s4134_s19 = sld [smem:[%s5175_s0 + %s4022_s15]]   ;;  %s4025_s1 = smov 13  }
   0xc   :  { %s4139_s24 = sld [smem:[%s5175_s0 + %s4023_s20]]   ;;  %s4026_s7 = smov 14  }
   0xd   :  { %s4144_s30 = sld [smem:[%s5175_s0 + %s4024_s26]]   ;;  %s4027_s15 = smov 15  }
   0xe   :  { %s4149_s6 = sld [smem:[%s5175_s0 + %s4025_s1]]   ;;  %s4028_s22 = smov 16  }
   0xf   :  { %s4154_s12 = sld [smem:[%s5175_s0 + %s4026_s7]]   ;;  %s4029_s28 = smov 17  }
  0x10   :  { %s4159_s20 = sld [smem:[%s5175_s0 + %s4027_s15]]   ;;  %s4030_s7 = smov 18  }
  0x11   :  { %s4164_s27 = sld [smem:[%s5175_s0 + %s4028_s22]]   ;;  %s4031_s15 = smov 19  }
  0x12   :  { %s4169_s4 = sld [smem:[%s5175_s0 + %s4029_s28]]   ;;  %s4032_s22 = smov 20  }
  0x13   :  { %5189 = sst [smem:[#allocation15_spill]] %s4144_s30  ;;  %s4033_s28 = smov 21  }
  0x14   :  { %5190 = sst [smem:[#allocation16_spill]] %s4149_s6  ;;  %s4040_s23 = smov 28  }
  0x15   :  { %5191 = sst [smem:[#allocation17_spill]] %s4154_s12  ;;  %s4041_s1 = smov 29  }
  0x16   :  { %5192 = sst [smem:[#allocation18_spill]] %s4159_s20  ;;  %s4042_s10 = smov 30  }
  0x17   :  { %5193 = sst [smem:[#allocation19_spill]] %s4164_s27  ;;  %s4043_s16 = smov 31  }
  0x18   :  { %5194 = sst [smem:[#allocation20_spill]] %s4169_s4 }
  0x19   :  { %s4174_s12 = sld [smem:[%s5175_s0 + %s4030_s7]]   ;;  %s4034_s7 = smov 22  }
  0x1a   :  { %s4179_s6 = sld [smem:[%s5175_s0 + %s4031_s15]]   ;;  %s4035_s15 = smov 23  }
  0x1b   :  { %s4184_s27 = sld [smem:[%s5175_s0 + %s4032_s22]]   ;;  %s4036_s22 = smov 24  }
  0x1c   :  { %s4189_s4 = sld [smem:[%s5175_s0 + %s4033_s28]]   ;;  %s4037_s28 = smov 25  }
  0x1d   :  { %s4237_s30 = sld [smem:[%s5175_s0 + %s4043_s16]]   ;;  %s4047_s16 = smov 35  }
  0x1f   :  { %5195 = sst [smem:[#allocation21_spill]] %s4174_s12 }
  0x20   :  { %5196 = sst [smem:[#allocation22_spill]] %s4179_s6 }
  0x21   :  { %5197 = sst [smem:[#allocation23_spill]] %s4184_s27 }
  0x22   :  { %5198 = sst [smem:[#allocation24_spill]] %s4189_s4 }
  0x23   :  { %s4194_s12 = sld [smem:[%s5175_s0 + %s4034_s7]]   ;;  %s4038_s7 = smov 26  }
  0x24   :  { %s4199_s6 = sld [smem:[%s5175_s0 + %s4035_s15]]   ;;  %s4039_s15 = smov 27  }
  0x25   :  { %s4204_s27 = sld [smem:[%s5175_s0 + %s4036_s22]]   ;;  %s4048_s22 = smov 36  }
  0x26   :  { %s4209_s4 = sld [smem:[%s5175_s0 + %s4037_s28]]  }
  0x27   :  { %5207 = sst [smem:[#allocation33_spill]] %s4237_s30  ;;  %s4051_s30 = smov 39  }
  0x29   :  { %5199 = sst [smem:[#allocation25_spill]] %s4194_s12 }
  0x2a   :  { %5200 = sst [smem:[#allocation26_spill]] %s4199_s6 }
  0x2b   :  { %5201 = sst [smem:[#allocation27_spill]] %s4204_s27 }
  0x2c   :  { %5202 = sst [smem:[#allocation28_spill]] %s4209_s4 }
  0x2d   :  { %s4214_s12 = sld [smem:[%s5175_s0 + %s4038_s7]]  }
  0x2e   :  { %s2994_s6 = sld [smem:[%s5175_s0 + %s4039_s15]]  }
  0x2f   :  { %s4222_s27 = sld [smem:[%s5175_s0 + %s4040_s23]]   ;;  %s4044_s23 = smov 32  }
  0x30   :  { %s4227_s4 = sld [smem:[%s5175_s0 + %s4041_s1]]   ;;  %s4045_s1 = smov 33  }
  0x33   :  { %5203 = sst [smem:[#allocation29_spill]] %s4214_s12 }
  0x34   :  { %s4232_s12 = sld [smem:[%s5175_s0 + %s4042_s10]]   ;;  %v113_v0 = vstv %s2994_s6  ;;  %s4046_s10 = smov 34  }
  0x35   :  { %5204 = sst [smem:[#allocation30_spill]] %s4222_s27  ;;  %114 = vst [vmem:[#allocation2] sm:$0x1] %v113_v0  ;;  %s4049_s6 = smov 37  }
  0x36   :  { %5205 = sst [smem:[#allocation31_spill]] %s4227_s4 }
  0x37   :  { %s4242_s27 = sld [smem:[%s5175_s0 + %s4044_s23]]  }
  0x38   :  { %s4247_s4 = sld [smem:[%s5175_s0 + %s4045_s1]]  }
  0x39   :  { %s4252_s15 = sld [smem:[%s5175_s0 + %s4046_s10]]   ;;  %s4050_s10 = smov 38  }
  0x3a   :  { %5206 = sst [smem:[#allocation32_spill]] %s4232_s12  ;;  %s4052_s12 = smov 40  }
  0x3b   :  { %s4257_s23 = sld [smem:[%s5175_s0 + %s4047_s16]]  }
  0x3c   :  { %s4262_s1 = sld [smem:[%s5175_s0 + %s4048_s22]]  }
  0x3d   :  { %5208 = sst [smem:[#allocation34_spill]] %s4242_s27 }
  0x3e   :  { %5209 = sst [smem:[#allocation35_spill]] %s4247_s4 }
  0x3f   :  { %5210 = sst [smem:[#allocation36_spill]] %s4252_s15  ;;  %s4054_s15 = smov 42  }
  0x40   :  { %s4267_s7 = sld [smem:[%s5175_s0 + %s4049_s6]]   ;;  %s4053_s6 = smov 41  }
  0x41   :  { %5211 = sst [smem:[#allocation37_spill]] %s4257_s23 }
  0x42   :  { %5212 = sst [smem:[#allocation38_spill]] %s4262_s1 }
  0x43   :  { %s4272_s4 = sld [smem:[%s5175_s0 + %s4050_s10]]  }
  0x44   :  { %s4277_s23 = sld [smem:[%s5175_s0 + %s4051_s30]]   ;;  %s4055_s30 = smov 43  }
  0x45   :  { %s4282_s1 = sld [smem:[%s5175_s0 + %s4052_s12]]   ;;  %s4056_s12 = smov 44  }
  0x46   :  { %5213 = sst [smem:[#allocation39_spill]] %s4267_s7 }
  0x47   :  { %s4287_s7 = sld [smem:[%s5175_s0 + %s4053_s6]]   ;;  %s4057_s6 = smov 45  }
  0x49   :  { %5214 = sst [smem:[#allocation40_spill]] %s4272_s4 }
  0x4a   :  { %5215 = sst [smem:[#allocation41_spill]] %s4277_s23 }
  0x4b   :  { %5216 = sst [smem:[#allocation42_spill]] %s4282_s1 }
  0x4c   :  { %s4292_s4 = sld [smem:[%s5175_s0 + %s4054_s15]]   ;;  %s4058_s15 = smov 46  }
  0x4d   :  { %5217 = sst [smem:[#allocation43_spill]] %s4287_s7 }
  0x4e   :  { %s4297_s23 = sld [smem:[%s5175_s0 + %s4055_s30]]   ;;  %s4059_s30 = smov 47  }
  0x4f   :  { %s4302_s1 = sld [smem:[%s5175_s0 + %s4056_s12]]   ;;  %s4060_s12 = smov 48  }
  0x50   :  { %s4307_s7 = sld [smem:[%s5175_s0 + %s4057_s6]]   ;;  %s4061_s6 = smov 49  }
  0x52   :  { %5218 = sst [smem:[#allocation44_spill]] %s4292_s4 }
  0x53   :  { %s4312_s4 = sld [smem:[%s5175_s0 + %s4058_s15]]   ;;  %s4062_s15 = smov 50  }
  0x54   :  { %5219 = sst [smem:[#allocation45_spill]] %s4297_s23 }
  0x55   :  { %5220 = sst [smem:[#allocation46_spill]] %s4302_s1 }
  0x56   :  { %5221 = sst [smem:[#allocation47_spill]] %s4307_s7 }
  0x57   :  { %s4317_s23 = sld [smem:[%s5175_s0 + %s4059_s30]]   ;;  %s4063_s30 = smov 51  }
  0x58   :  { %s4322_s1 = sld [smem:[%s5175_s0 + %s4060_s12]]   ;;  %s4064_s12 = smov 52  }
  0x59   :  { %s4327_s7 = sld [smem:[%s5175_s0 + %s4061_s6]]   ;;  %s4065_s6 = smov 53  }
  0x5a   :  { %s4332_s27 = sld [smem:[%s5175_s0 + %s4062_s15]]  }
  0x5b   :  { %s4337_s20 = sld [smem:[%s5175_s0 + %s4063_s30]]  }
  0x5e   :  { %5222 = sst [smem:[#allocation48_spill]] %s4322_s1 }
  0x5f   :  { %5223 = sst [smem:[#allocation49_spill]] %s4327_s7 }
  0x60   :  { %s4342_s1 = sld [smem:[%s5175_s0 + %s4064_s12]]  }
  0x61   :  { %s4347_s7 = sld [smem:[%s5175_s0 + %s4065_s6]]  }
  0x62   :  { %115 = vsyncpa [#allocation4], 0 }
  0x63   :  { %116 = vsyncpa [#allocation7], 0 }
  0x64   :  { %117 = vsyncpa [#allocation5], 0 }
  0x65   :  { %118 = vsyncpa [#allocation10], 0  ;;  %s4066_s15 = smov [#allocation3]   ;;  %s4067_s11 = smov [#allocation6]  }
  0x66   :  { %s217_s10 = sshll.u32 %s4066_s15, 4  ;;  %s227_s30 = sshll.u32 %s4067_s11, 4  ;;  %s218_s10 = int_to_ptr.vmem [resolvable:$true] %s217_s10  ;;  %s228_s30 = int_to_ptr.vmem [resolvable:$true] %s227_s30 }
  0x67   :  { %s3917_s16 = scalar_lea.hbm %s4312_s4, 16 }
  0x68   :  { %p3918_p0 = scmp.ne.s32.totalorder %s4312_s4, %s3917_s16  ;;  %p3921_p1 = scmp.lt.u32.totalorder %s3917_s16, %s4312_s4 }
  0x6a   :  { %p3923_p2 = pnand %p3921_p1, %p3918_p0 }
  0x6c   :  { %3926 = shalt.err (!%p3923_p2)
}
  0x6d   :  { %s3927_s0 = scalar_lea.vmem %s218_s10, 16  ;;  %s3931_s18 = scalar_lea.vmem %s218_s10, 32 }
  0x6e   :  { %p3928_p3 = scmp.ne.s32.totalorder %s218_s10, %s3927_s0  ;;  %p3932_p4 = scmp.lt.s32.totalorder %s218_s10, %s218_s10 }
  0x6f   :  { %p3933_p5 = scmp.lt.s32.totalorder %s3931_s18, %s3927_s0 }
  0x71   :  { %p3934_p6 = por %p3933_p5, %p3932_p4 }
  0x73   :  { %p3935_p7 = pnand %p3934_p6, %p3928_p3 }
  0x75   :  { %3938 = shalt.err (!%p3935_p7)
}
  0x76   :  { %220 = dma.hbm_to_vmem [thread:$0]  %s4312_s4, 16, %s218_s10, [#allocation4]  }
  0x77   :  { %s3939_s12 = scalar_lea.hbm %s4317_s23, 16 }
  0x78   :  { %p3940_p8 = scmp.ne.s32.totalorder %s4317_s23, %s3939_s12  ;;  %p3943_p9 = scmp.lt.u32.totalorder %s3939_s12, %s4317_s23 }
  0x7a   :  { %p3945_p10 = pnand %p3943_p9, %p3940_p8 }
  0x7c   :  { %3948 = shalt.err (!%p3945_p10)
}
  0x7d   :  { %s3949_s22 = scalar_lea.vmem %s228_s30, 16  ;;  %s3953_s26 = scalar_lea.vmem %s228_s30, 32 }
  0x7e   :  { %p3950_p11 = scmp.ne.s32.totalorder %s228_s30, %s3949_s22  ;;  %p3954_p12 = scmp.lt.s32.totalorder %s228_s30, %s228_s30 }
  0x7f   :  { %p3955_p13 = scmp.lt.s32.totalorder %s3953_s26, %s3949_s22 }
  0x81   :  { %p3956_p0 = por %p3955_p13, %p3954_p12 }
  0x83   :  { %p3957_p1 = pnand %p3956_p0, %p3950_p11 }
  0x85   :  { %3960 = shalt.err (!%p3957_p1)
}
  0x86   :  { %230 = dma.hbm_to_vmem [thread:$0]  %s4317_s23, 16, %s228_s30, [#allocation7]  }
  0x87   :  { %4005 = dma.done.wait [#allocation4], 16  }
  0x88   :  { %4006 = vsyncadd [#allocation4], 4294967280 }
  0x89   :  { %4007 = dma.done.wait [#allocation7], 16  }
  0x8a   :  { %4008 = vsyncadd [#allocation7], 4294967280  ;;  %vm5187_vm0 = vcmask 130048   ;;  %v276_v1 = vld [vmem:[%s4089_s9] sm:$0xff]  ;;  %v277_v2 = vld [vmem:[%s4089_s9 + $0x8] sm:$0xff]  ;;  %vm385_vm1 = vcmask 523264  }
  0x8b   :  { %v272_v3 = vld [vmem:[%s4084_s5] sm:$0xff]  ;;  %v3391_v4 = vpack.c.bf16 %v277_v2, %v276_v1  ;;  %v273_v5 = vld [vmem:[%s4084_s5 + $0x8] sm:$0xff]  ;;  %v274_v6 = vld [vmem:[%s4084_s5 + $0x10] sm:$0xff]  ;;  %s5232_s9 = sld [smem:[#allocation18_spill]]  ;;  %s5243_s4 = sld [smem:[#allocation25_spill]] }
  0x8c   :  { %3290 = vmatprep.mubr.msk.f32.mxu0 %vm5187_vm0, %v272_v3  ;;  %v275_v7 = vld [vmem:[%s4084_s5 + $0x18] sm:$0xff]  ;;  %v501_v8 = vld [vmem:[%s4109_s25 + $0x80] sm:$0xff]  ;;  %v502_v9 = vld [vmem:[%s4109_s25 + $0x88] sm:$0xff]  ;;  %s4068_s5 = smov 64   ;;  %s5244_s23 = sld [smem:[#allocation28_spill]] }
  0x8d   :  { %3392 = vmatprep.subr.bf16.mxu0 %v3391_v4  ;;  %v485_v10 = vld [vmem:[%s4109_s25] sm:$0xff]  ;;  %v3395_v11 = vpack.c.bf16 %v502_v9, %v501_v8  ;;  %v486_v12 = vld [vmem:[%s4109_s25 + $0x8] sm:$0xff]  ;;  %v503_v13 = vld [vmem:[%s4109_s25 + $0x90] sm:$0xff]  ;;  %s5245_s6 = sld [smem:[#allocation27_spill]]  ;;  %s5246_s28 = sld [smem:[#allocation29_spill]] }
  0x8e   :  { %3394 = vmatpush3.bf16.msra.mxu0 %v3391_v4  ;;  %v504_v14 = vld [vmem:[%s4109_s25 + $0x98] sm:$0xff]  ;;  %v3397_v15 = vpack.c.bf16 %v486_v12, %v485_v10  ;;  %v487_v17 = vld [vmem:[%s4109_s25 + $0x10] sm:$0xff]  ;;  %v505_v19 = vld [vmem:[%s4109_s25 + $0xa0] sm:$0xff]  ;;  %s5247_s2 = sld [smem:[#allocation30_spill]]  ;;  %s5250_s15 = sld [smem:[#allocation34_spill]] }
  0x8f   :  { %v3399_v16 = vpack.c.bf16 %v504_v14, %v503_v13  ;;  %v488_v18 = vld [vmem:[%s4109_s25 + $0x18] sm:$0xff]  ;;  %3396 = vmatprep.subr.bf16.mxu1 %v3395_v11  ;;  %v506_v20 = vld [vmem:[%s4109_s25 + $0xa8] sm:$0xff]  ;;  %v489_v23 = vld [vmem:[%s4109_s25 + $0x20] sm:$0xff]  ;;  %s5251_s10 = sld [smem:[#allocation31_spill]]  ;;  %s5253_s11 = sld [smem:[#allocation33_spill]] }
  0x90   :  { %3398 = vmatpush3.bf16.msra.mxu1 %v3397_v15  ;;  %v3401_v21 = vpack.c.bf16 %v488_v18, %v487_v17  ;;  %v3403_v22 = vpack.c.bf16 %v506_v20, %v505_v19  ;;  %v490_v24 = vld [vmem:[%s4109_s25 + $0x28] sm:$0xff]  ;;  %v507_v25 = vld [vmem:[%s4109_s25 + $0xb0] sm:$0xff]  ;;  %v508_v26 = vld [vmem:[%s4109_s25 + $0xb8] sm:$0xff]  ;;  %s5254_s30 = sld [smem:[#allocation38_spill]]  ;;  %s5255_s16 = sld [smem:[#allocation35_spill]] }
  0x91   :  { %3291 = vmatmul.mubr.msk.f32.vlgmr.msra.gmra.mrb[0].mxu0 %vm5187_vm0, %v273_v5  ;;  %3400 = vmatprep.subr.bf16.mxu1 %v3399_v16  ;;  %v3405_v27 = vpack.c.bf16 %v490_v24, %v489_v23  ;;  %v3407_v28 = vpack.c.bf16 %v508_v26, %v507_v25  ;;  %v491_v29 = vld [vmem:[%s4109_s25 + $0x30] sm:$0xff]  ;;  %v492_v30 = vld [vmem:[%s4109_s25 + $0x38] sm:$0xff]  ;;  %v509_v31 = vld [vmem:[%s4109_s25 + $0xc0] sm:$0xff]  ;;  %s5256_s0 = sld [smem:[#allocation36_spill]]  ;;  %s5257_s18 = sld [smem:[#allocation37_spill]] }
  0x92   :  { %3293 = vmatprep.mubr.msk.f32.mxu0 %vm5187_vm0, %v274_v6  ;;  %v510_v32 = vld [vmem:[%s4109_s25 + $0xc8] sm:$0xff]  ;;  %v3409_v33 = vpack.c.bf16 %v492_v30, %v491_v29  ;;  %v493_v35 = vld [vmem:[%s4109_s25 + $0x40] sm:$0xff]  ;;  %v511_v37 = vld [vmem:[%s4109_s25 + $0xd0] sm:$0xff]  ;;  %s5259_s12 = sld [smem:[#allocation42_spill]]  ;;  %s5261_s22 = sld [smem:[#allocation39_spill]] }
  0x93   :  { %v3411_v34 = vpack.c.bf16 %v510_v32, %v509_v31  ;;  %v494_v36 = vld [vmem:[%s4109_s25 + $0x48] sm:$0xff]  ;;  %v512_v38 = vld [vmem:[%s4109_s25 + $0xd8] sm:$0xff]  ;;  %v495_v41 = vld [vmem:[%s4109_s25 + $0x50] sm:$0xff]  ;;  %v241_v31 = vlaneseq  ;;  %s5262_s26 = sld [smem:[#allocation40_spill]] }
  0x94   :  { %3402 = vmatpush3.bf16.msra.mxu1 %v3401_v21  ;;  %v3413_v39 = vpack.c.bf16 %v494_v36, %v493_v35  ;;  %v3415_v40 = vpack.c.bf16 %v512_v38, %v511_v37  ;;  %v496_v42 = vld [vmem:[%s4109_s25 + $0x58] sm:$0xff]  ;;  %v513_v43 = vld [vmem:[%s4109_s25 + $0xe0] sm:$0xff]  ;;  %v514_v44 = vld [vmem:[%s4109_s25 + $0xe8] sm:$0xff] }
  0x95   :  { %3294 = vmatmul.mubr.msk.f32.gmra.mrb[2].mxu0 %vm5187_vm0, %v275_v7  ;;  %3404 = vmatprep.subr.bf16.mxu1 %v3403_v22  ;;  %v3417_v45 = vpack.c.bf16 %v496_v42, %v495_v41  ;;  %v3419_v46 = vpack.c.bf16 %v514_v44, %v513_v43  ;;  %v497_v47 = vld [vmem:[%s4109_s25 + $0x60] sm:$0xff]  ;;  %v498_v48 = vld [vmem:[%s4109_s25 + $0x68] sm:$0xff]  ;;  %v4405_v32 = vshrl.u32 %v241_v31, 7  ;;  %v516_v41 = vld [vmem:[%s4109_s25 + $0xf8] sm:$0xff] }
  0x96   :  { %v3421_v49 = vpack.c.bf16 %v498_v48, %v497_v47  ;;  %v3021_v50 = vld [vmem:[%s4094_s13] ss:$0 sm:$0xff]  ;;  %v499_v44 = vld [vmem:[%s4109_s25 + $0x70] sm:$0xff]  ;;  %s5233_s13 = sld [smem:[#allocation15_spill]] }
  0x97   :  { %v384_v37 = vld [vmem:[%s4104_s21] sm:$0x1]  ;;  %v243_v42 = vadd.s32 8, %v4405_v32  ;;  %vm460_vm3 = vcmp.lt.s32.totalorder %v4405_v32, 7  ;;  %vm5188_vm5 = vcmp.lt.s32.totalorder %v4405_v32, 1  ;;  %s5235_s21 = sld [smem:[#allocation17_spill]] }
  0x98   :  { %3406 = vmatpush3.bf16.msra.mxu1 %v3405_v27 }
  0x99   :  { %3408 = vmatprep.subr.bf16.mxu1 %v3407_v28 }
  0x9c   :  { %3410 = vmatpush3.bf16.msra.mxu1 %v3409_v33  ;;  %v383_v33 = vld [vmem:[%s4099_s17] sm:$0x1]  ;;  %s5234_s17 = sld [smem:[#allocation16_spill]] }
  0x9d   :  { %3412 = vmatprep.subr.bf16.mxu1 %v3411_v34  ;;  %v4409_v34 = vsub.s32 0, %v4405_v32 }
  0xa0   :  { %3414 = vmatpush3.bf16.msra.mxu1 %v3413_v39 }
  0xa1   :  { %3416 = vmatprep.subr.bf16.mxu1 %v3415_v40  ;;  %v515_v40 = vld [vmem:[%s4109_s25 + $0xf0] sm:$0xff] }
  0xa2   :  { %v3423_v43 = vpack.c.bf16 %v516_v41, %v515_v40  ;;  %v629_v40 = vld [vmem:[%s4119_s3 + $0x30] sm:$0xff]  ;;  %v630_v41 = vld [vmem:[%s4119_s3 + $0x38] sm:$0xff] }
  0xa4   :  { %3418 = vmatpush3.bf16.msra.mxu1 %v3417_v45  ;;  %v500_v45 = vld [vmem:[%s4109_s25 + $0x78] sm:$0xff]  ;;  %s5236_s25 = sld [smem:[#allocation22_spill]] }
  0xa5   :  { %3420 = vmatprep.subr.bf16.mxu1 %v3419_v46 }
  0xa8   :  { %3422 = vmatpush3.bf16.msra.mxu1 %v3421_v49 }
  0xa9   :  { %3424 = vmatprep.subr.bf16.mxu1 %v3423_v43  ;;  %v631_v43 = vld [vmem:[%s4119_s3 + $0x40] sm:$0xff] }
 0x164   :  { %v3292_v51 = vpop.f32.mrb[0].mxu0 }
 0x165   :  { %v370_v52 = vadd.f32 %v3292_v51, %v3021_v50  ;;  %v364_v53 = vpop.f32.mrb[1].mxu0 }
 0x166   :  { %v365_v54 = vadd.f32 %v3021_v50, %v364_v53 }
 0x167   :  { %v387_v55 = vsel %vm385_vm1, %v370_v52, 0.0  ;;  %v400_v56 = vmul.f32 %v370_v52, %v370_v52 }
 0x168   :  { %v386_v57 = vsel %vm385_vm1, %v365_v54, 0.0  ;;  %v399_v58 = vmul.f32 %v365_v54, %v365_v54  ;;  %v3295_v59 = vpop.f32.mrb[2].mxu0 }
 0x169   :  { %v404_v60 = vsel %vm385_vm1, %v400_v56, 0.0  ;;  %v388_v61 = vadd.f32 %v387_v55, %v386_v57  ;;  %v380_v62 = vadd.f32 %v3295_v59, %v3021_v50  ;;  %v374_v63 = vpop.f32.mrb[3].mxu0  ;;  %v248_v55 = vand.u32 7, %v4405_v32 }
 0x16a   :  { %v403_v0 = vsel %vm385_vm1, %v399_v58, 0.0  ;;  %v375_v1 = vadd.f32 %v3021_v50, %v374_v63  ;;  %v3425_v50 = vpack.c.bf16 %v500_v45, %v499_v44  ;;  %v255_v56 = vand.u32 7, %v243_v42  ;;  %v632_v44 = vld [vmem:[%s4119_s3 + $0x48] sm:$0xff] }
 0x16b   :  { %v405_v2 = vadd.f32 %v404_v60, %v403_v0  ;;  %v402_v3 = vmul.f32 %v380_v62, %v380_v62  ;;  %v391_v7 = vsel %vm385_vm1, %v380_v62, 0.0  ;;  %vm4420_vm2 = vcmp.eq.s32.totalorder %v248_v55, 7 }
 0x16c   :  { %v389_v4 = vsel %vm385_vm1, %v375_v1, 0.0  ;;  %v401_v5 = vmul.f32 %v375_v1, %v375_v1  ;;  %3426 = vmatpush3.bf16.msra.mxu1 %v3425_v50  ;;  %vm4425_vm4 = vcmp.eq.s32.totalorder %v255_v56, 7  ;;  %vm4444_vm6 = vcmp.eq.s32.totalorder %v248_v55, 0  ;;  %v636_v50 = vld [vmem:[%s4119_s3 + $0x68] sm:$0xff]  ;;  %v638_v55 = vld [vmem:[%s4119_s3 + $0x78] sm:$0xff] }
 0x16d   :  { %v390_v6 = vadd.f32 %v389_v4, %v388_v61  ;;  %v408_v11 = vsel %vm385_vm1, %v402_v3, 0.0  ;;  %vm4452_vm7 = vcmp.eq.s32.totalorder %v255_v56, 0  ;;  %v3437_v42 = vpack.c.bf16 %v630_v41, %v629_v40  ;;  %v788_v41 = vld [vmem:[%s4139_s24 + $0x10] sm:$0xff] }
 0x16e   :  { %v406_v8 = vsel %vm385_vm1, %v401_v5, 0.0  ;;  %v3440_v45 = vpack.c.bf16 %v632_v44, %v631_v43  ;;  %v790_v44 = vld [vmem:[%s4139_s24 + $0x20] sm:$0xff] }
 0x16f   :  { %v392_v9 = vadd.f32 %v391_v7, %v390_v6  ;;  %v407_v10 = vadd.f32 %v406_v8, %v405_v2 }
 0x171   :  { %v393_v12 = vrot.slane %v392_v9, 4  ;;  %v409_v13 = vadd.f32 %v408_v11, %v407_v10 }
 0x173   :  { %v394_v14 = vadd.f32 %v393_v12, %v392_v9  ;;  %v410_v15 = vrot.slane %v409_v13, 4 }
 0x175   :  { %v395_v16 = vrot.slane %v394_v14, 2  ;;  %v411_v17 = vadd.f32 %v410_v15, %v409_v13 }
 0x177   :  { %v396_v18 = vadd.f32 %v395_v16, %v394_v14  ;;  %v412_v19 = vrot.slane %v411_v17, 2 }
 0x179   :  { %v397_v20 = vrot.slane %v396_v18, 1  ;;  %v413_v21 = vadd.f32 %v412_v19, %v411_v17 }
 0x17b   :  { %v398_v22 = vadd.f32 %v397_v20, %v396_v18  ;;  %v414_v23 = vrot.slane %v413_v21, 1 }
 0x17d   :  { %v415_v24 = vadd.f32 %v414_v23, %v413_v21  ;;  %v417_v25 = vmul.f32 0.03125, %v398_v22 }
 0x17f   :  { %v418_v26 = vmul.f32 0.03125, %v415_v24  ;;  %v419_v27 = vmul.f32 %v417_v25, %v417_v25 }
 0x181   :  { %v420_v28 = vsub.f32 %v418_v26, %v419_v27  ;;  %v623_v27 = vld [vmem:[%s4119_s3] sm:$0xff] }
 0x183   :  { %v421_v29 = vmax.f32 %v420_v28, 0.0  ;;  %v624_v28 = vld [vmem:[%s4119_s3 + $0x8] sm:$0xff] }
 0x185   :  { %v422_v30 = vadd.f32 1e-05, %v421_v29  ;;  %v625_v29 = vld [vmem:[%s4119_s3 + $0x10] sm:$0xff] }
 0x187   :  { %3893 = vrsqrt.f32 %v422_v30  ;;  %v4069_v30 = vmov 0.0|0.0  }
 0x188   :  { %3427 = vmatprep.subr.bf16.mxu0 %v4069_v30 }
 0x191   :  { %v3894_v35 = vpop.eup %3893 }
 0x192   :  { %v424_v36 = vmul.f32 %v3894_v35, %v383_v33  ;;  %v3428_v33 = vpack.c.bf16 %v624_v28, %v623_v27  ;;  %v626_v35 = vld [vmem:[%s4119_s3 + $0x18] sm:$0xff] }
 0x194   :  { %v431_v38 = vrot.slane %v424_v36, %v4409_v34  ;;  %v425_v39 = vmul.f32 %v424_v36, %v417_v25  ;;  %3429 = vmatpush1.bf16.msra.mxu0 %v3428_v33  ;;  %v3431_v36 = vpack.c.bf16 %v626_v35, %v625_v29 }
 0x195   :  { %3430 = vmatprep.subr.bf16.mxu0 %v4069_v30 }
 0x196   :  { %v435_v46 = vmul.f32 %v431_v38, %v375_v1  ;;  %v426_v47 = vsub.f32 %v384_v37, %v425_v39  ;;  %v433_v48 = vmul.f32 %v431_v38, %v365_v54  ;;  %v434_v49 = vmul.f32 %v431_v38, %v370_v52  ;;  %v627_v37 = vld [vmem:[%s4119_s3 + $0x20] sm:$0xff] }
 0x197   :  { %v436_v51 = vmul.f32 %v431_v38, %v380_v62  ;;  %v628_v38 = vld [vmem:[%s4119_s3 + $0x28] sm:$0xff] }
 0x198   :  { %v441_v53 = vrot.slane %v426_v47, %v4409_v34  ;;  %3432 = vmatpush1.bf16.msra.mxu0 %v3431_v36  ;;  %v3434_v39 = vpack.c.bf16 %v628_v38, %v627_v37  ;;  %v634_v47 = vld [vmem:[%s4119_s3 + $0x58] sm:$0xff]  ;;  %v786_v38 = vld [vmem:[%s4139_s24] sm:$0xff] }
 0x199   :  { %3433 = vmatprep.subr.bf16.mxu0 %v4069_v30 }
 0x19a   :  { %v443_v57 = vadd.f32 %v441_v53, %v433_v48  ;;  %v444_v58 = vadd.f32 %v441_v53, %v434_v49  ;;  %v445_v59 = vadd.f32 %v441_v53, %v435_v46  ;;  %v446_v60 = vadd.f32 %v441_v53, %v436_v51  ;;  %v633_v46 = vld [vmem:[%s4119_s3 + $0x50] sm:$0xff]  ;;  %v635_v49 = vld [vmem:[%s4119_s3 + $0x60] sm:$0xff] }
 0x19b   :  { %v3443_v48 = vpack.c.bf16 %v634_v47, %v633_v46  ;;  %v3446_v51 = vpack.c.bf16 %v636_v50, %v635_v49  ;;  %v637_v53 = vld [vmem:[%s4119_s3 + $0x70] sm:$0xff]  ;;  %v3027_v50 = vld [vmem:[%s4124_s8] ss:$0 sm:$0xff]  ;;  %s5239_s8 = sld [smem:[#allocation21_spill]] }
 0x19c   :  { %v447_v61 = vmax.f32 %v443_v57, 0.0  ;;  %v448_v63 = vmax.f32 %v444_v58, 0.0  ;;  %v449_v0 = vmax.f32 %v445_v59, 0.0  ;;  %v450_v1 = vmax.f32 %v446_v60, 0.0  ;;  %3435 = vmatpush1.bf16.msra.mxu0 %v3434_v39  ;;  %v639_v57 = vld [vmem:[%s4119_s3 + $0x80] sm:$0xff]  ;;  %v640_v58 = vld [vmem:[%s4119_s3 + $0x88] sm:$0xff] }
 0x19d   :  { %3436 = vmatprep.subr.bf16.mxu0 %v4069_v30  ;;  %v3449_v56 = vpack.c.bf16 %v638_v55, %v637_v53  ;;  %v3452_v59 = vpack.c.bf16 %v640_v58, %v639_v57  ;;  %v641_v60 = vld [vmem:[%s4119_s3 + $0x90] sm:$0xff]  ;;  %v787_v39 = vld [vmem:[%s4139_s24 + $0x8] sm:$0xff] }
 0x19e   :  { %v458_v62 = vrot.slane %v447_v61, 1  ;;  %v459_v2 = vrot.slane %v448_v63, 1  ;;  %v451_v3 = vrot.slane %v449_v0, 7  ;;  %v452_v4 = vrot.slane %v450_v1, 7  ;;  %v792_v47 = vld [vmem:[%s4139_s24 + $0x30] sm:$0xff] }
 0x19f   :  { %v3463_v40 = vpack.c.bf16 %v787_v39, %v786_v38 }
 0x1a0   :  { %v461_v5 = vsel %vm460_vm3, %v458_v62, %v459_v2  ;;  %v462_v6 = vsel %vm460_vm3, %v459_v2, %v458_v62  ;;  %v455_v7 = vsel %vm5188_vm5, %v452_v4, %v451_v3  ;;  %v454_v8 = vsel %vm5188_vm5, %v451_v3, %v452_v4  ;;  %3438 = vmatpush1.bf16.msra.mxu0 %v3437_v42  ;;  %v645_v2 = vld [vmem:[%s4119_s3 + $0xb0] sm:$0xff]  ;;  %v646_v3 = vld [vmem:[%s4119_s3 + $0xb8] sm:$0xff] }
 0x1a1   :  { %v463_v9 = vsel %vm4420_vm2, 0.0, %v461_v5  ;;  %v464_v10 = vsel %vm4425_vm4, 0.0, %v462_v6  ;;  %v456_v17 = vsel %vm4444_vm6, 0.0, %v455_v7  ;;  %v457_v24 = vsel %vm4452_vm7, 0.0, %v454_v8  ;;  %3439 = vmatprep.subr.bf16.mxu0 %v4069_v30  ;;  %v3026_v6 = vld [vmem:[%s4114_s29] ss:$0 sm:$0xff]  ;;  %3464 = vmatprep.subr.bf16.mxu1 %v3463_v40 }
 0x1a2   :  { %v3878_v11 = vpack.i.bf16 %v447_v61, %v463_v9  ;;  %v3883_v12 = vpack.i.bf16 %v448_v63, %v464_v10  ;;  %v642_v61 = vld [vmem:[%s4119_s3 + $0x98] sm:$0xff]  ;;  %v3461_v4 = vpack.c.bf16 %v646_v3, %v645_v2  ;;  %s5237_s29 = sld [smem:[#allocation19_spill]] }
 0x1a3   :  { %v3455_v63 = vpack.c.bf16 %v642_v61, %v641_v60  ;;  %v789_v42 = vld [vmem:[%s4139_s24 + $0x18] sm:$0xff] }
 0x1a4   :  { %3879 = vrot.lane.b32.xlu0 %v3878_v11, %s4068_s5  ;;  %3441 = vmatpush1.bf16.msra.mxu0 %v3440_v45  ;;  %v3467_v43 = vpack.c.bf16 %v789_v42, %v788_v41  ;;  %v791_v45 = vld [vmem:[%s4139_s24 + $0x28] sm:$0xff] }
 0x1a5   :  { %3442 = vmatprep.subr.bf16.mxu0 %v4069_v30  ;;  %v3471_v46 = vpack.c.bf16 %v791_v45, %v790_v44  ;;  %v957_v44 = vld [vmem:[%s5232_s9 + $0x8] sm:$0xff]  ;;  %v958_v45 = vld [vmem:[%s5232_s9 + $0x10] sm:$0xff] }
 0x1a8   :  { %3884 = vrot.lane.b32.xlu0 %v3883_v12, %s4068_s5  ;;  %3444 = vmatpush1.bf16.msra.mxu0 %v3443_v48  ;;  %v793_v48 = vld [vmem:[%s4139_s24 + $0x38] sm:$0xff]  ;;  %s5242_s24 = sld [smem:[#allocation24_spill]] }
 0x1a9   :  { %3445 = vmatprep.subr.bf16.mxu0 %v4069_v30  ;;  %v3475_v49 = vpack.c.bf16 %v793_v48, %v792_v47  ;;  %v959_v47 = vld [vmem:[%s5232_s9 + $0x18] sm:$0xff] }
 0x1aa   :  { %v3483_v48 = vpack.c.bf16 %v959_v47, %v958_v45 }
 0x1ac   :  { %3447 = vmatpush1.bf16.msra.mxu0 %v3446_v51 }
 0x1ad   :  { %3448 = vmatprep.subr.bf16.mxu0 %v4069_v30 }
 0x1b0   :  { %3450 = vmatpush1.bf16.msra.mxu0 %v3449_v56 }
 0x1b1   :  { %3451 = vmatprep.subr.bf16.mxu0 %v4069_v30 }
 0x1b4   :  { %3453 = vmatpush1.bf16.msra.mxu0 %v3452_v59 }
 0x1b5   :  { %3454 = vmatprep.subr.bf16.mxu0 %v4069_v30 }
 0x1b8   :  { %3456 = vmatpush1.bf16.msra.mxu0 %v3455_v63 }
 0x1b9   :  { %3457 = vmatprep.subr.bf16.mxu0 %v4069_v30 }
 0x216   :  { %v3880_v14 = vpop.permute.xlu0 %3879 }
 0x217   :  { %v3882_v15 = vunpack.i.h.bf16 %v3880_v14  ;;  %v3881_v16 = vunpack.i.l.bf16 %v3880_v14 }
 0x219   :  { %v483_v18 = vsel %vm385_vm1, %v449_v0, %v3881_v16  ;;  %v481_v19 = vsel %vm385_vm1, %v456_v17, %v3882_v15  ;;  %v643_v0 = vld [vmem:[%s4119_s3 + $0xa0] sm:$0xff] }
 0x21a   :  { %v3885_v21 = vpop.permute.xlu0 %3884  ;;  %588 = vmatprep.mubr.f32.mxu1 %v483_v18 }
 0x21b   :  { %v3887_v22 = vunpack.i.h.bf16 %v3885_v21  ;;  %v3886_v23 = vunpack.i.l.bf16 %v3885_v21  ;;  %589 = vmatmul.mubr.f32.vlgmr.msra.gmra.mrb[0].mxu1 %v481_v19 }
 0x21c   :  { %3466 = vmatpush3.bf16.msra.mxu1 %v3463_v40 }
 0x21d   :  { %v484_v25 = vsel %vm385_vm1, %v450_v1, %v3886_v23  ;;  %v482_v26 = vsel %vm385_vm1, %v457_v24, %v3887_v22  ;;  %v644_v1 = vld [vmem:[%s4119_s3 + $0xa8] sm:$0xff]  ;;  %3468 = vmatprep.subr.bf16.mxu1 %v3467_v43  ;;  %s5238_s3 = sld [smem:[#allocation20_spill]] }
 0x21e   :  { %593 = vmatprep.mubr.f32.mxu1 %v484_v25  ;;  %v3458_v62 = vpack.c.bf16 %v644_v1, %v643_v0 }
 0x21f   :  { %594 = vmatmul.mubr.f32.gmra.mrb[2].mxu1 %v482_v26 }
 0x220   :  { %3459 = vmatpush1.bf16.msra.mxu0 %v3458_v62  ;;  %3470 = vmatpush3.bf16.msra.mxu1 %v3467_v43  ;;  %v956_v43 = vld [vmem:[%s5232_s9] sm:$0xff] }
 0x221   :  { %3460 = vmatprep.subr.bf16.mxu0 %v4069_v30  ;;  %3472 = vmatprep.subr.bf16.mxu1 %v3471_v46 }
 0x224   :  { %3462 = vmatpush1.bf16.msra.mxu0 %v3461_v4  ;;  %3474 = vmatpush3.bf16.msra.mxu1 %v3471_v46  ;;  %v3480_v46 = vpack.c.bf16 %v957_v44, %v956_v43 }
 0x225   :  { %3476 = vmatprep.subr.bf16.mxu1 %v3475_v49 }
 0x228   :  { %3478 = vmatpush3.bf16.msra.mxu1 %v3475_v49  ;;  %v960_v49 = vld [vmem:[%s5232_s9 + $0x20] sm:$0xff] }
 0x229   :  { %3479 = vmatprep.subr.bf16.mxu1 %v4069_v30 }
 0x2ee   :  { %v3116_v5 = vpop.f32.mrb[0].mxu1 }
 0x2ef   :  { %v3117_v7 = vpop.f32.mrb[1].mxu1 }
 0x2f0   :  { %v3118_v8 = vadd.f32 %v3117_v7, %v3116_v5 }
 0x2f2   :  { %v4497_v9 = vadd.f32 %v3118_v8, %v3026_v6  ;;  %v3119_v10 = vpop.f32.mrb[2].mxu1 }
 0x2f3   :  { %v3120_v11 = vpop.f32.mrb[3].mxu1 }
 0x2f4   :  { %v3121_v12 = vadd.f32 %v3120_v11, %v3119_v10  ;;  %v599_v14 = vmax.f32 %v4497_v9, 0.0 }
 0x2f6   :  { %v4500_v15 = vadd.f32 %v3121_v12, %v3026_v6  ;;  %615 = vrot.lane.b32.xlu1 %v599_v14, %s4068_s5  ;;  %v601_v17 = vrot.slane %v599_v14, 7  ;;  %v607_v18 = vrot.slane %v599_v14, 1 }
 0x2f8   :  { %v600_v16 = vmax.f32 %v4500_v15, 0.0 }
 0x2fa   :  { %v602_v19 = vrot.slane %v600_v16, 7  ;;  %v608_v21 = vrot.slane %v600_v16, 1  ;;  %617 = vrot.lane.b32.xlu1 %v600_v16, %s4068_s5 }
 0x2fc   :  { %v609_v22 = vsel %vm460_vm3, %v607_v18, %v608_v21  ;;  %v604_v23 = vsel %vm5188_vm5, %v602_v19, %v601_v17  ;;  %v610_v24 = vsel %vm460_vm3, %v608_v21, %v607_v18  ;;  %v603_v25 = vsel %vm5188_vm5, %v601_v17, %v602_v19 }
 0x2fd   :  { %v611_v26 = vsel %vm4420_vm2, 0.0, %v609_v22  ;;  %v605_v28 = vsel %vm4444_vm6, 0.0, %v604_v23  ;;  %v612_v33 = vsel %vm4425_vm4, 0.0, %v610_v24  ;;  %v606_v36 = vsel %vm4452_vm7, 0.0, %v603_v25  ;;  %v735_v25 = vld [vmem:[%s4129_s14] sm:$0x1] }
 0x2fe   :  { %3028 = vmatprep.mubr.msk.f32.mxu0 %vm385_vm1, %v611_v26  ;;  %s5240_s14 = sld [smem:[#allocation26_spill]] }
 0x368   :  { %v616_v27 = vpop.permute.xlu1 %615 }
 0x369   :  { %v621_v29 = vsel %vm385_vm1, %v605_v28, %v616_v27  ;;  %v736_v28 = vld [vmem:[%s4134_s19] sm:$0x1]  ;;  %s5241_s19 = sld [smem:[#allocation23_spill]] }
 0x36a   :  { %725 = vmatmul.mubr.f32.vlgmr.msra.gmra.mrb[4].mxu0 %v621_v29 }
 0x36b   :  { %3029 = vmatprep.mubr.msk.f32.mxu0 %vm385_vm1, %v612_v33 }
 0x36c   :  { %v618_v35 = vpop.permute.xlu1 %617 }
 0x36d   :  { %v622_v37 = vsel %vm385_vm1, %v606_v36, %v618_v35 }
 0x36e   :  { %730 = vmatmul.mubr.f32.gmra.mrb[6].mxu0 %v622_v37 }
 0x43d   :  { %v726_v51 = vpop.f32.mrb[4].mxu0 }
 0x43e   :  { %v727_v53 = vadd.f32 %v3027_v50, %v726_v51  ;;  %v728_v55 = vpop.f32.mrb[5].mxu0 }
 0x43f   :  { %v963_v55 = vld [vmem:[%s5232_s9 + $0x38] sm:$0xff] }
 0x440   :  { %v746_v57 = vmul.f32 %v727_v53, %v727_v53  ;;  %v737_v60 = vsel %vm385_vm1, %v727_v53, 0.0 }
 0x441   :  { %v731_v56 = vpop.f32.mrb[6].mxu0 }
 0x442   :  { %v732_v58 = vadd.f32 %v3027_v50, %v731_v56  ;;  %v733_v59 = vpop.f32.mrb[7].mxu0  ;;  %v748_v1 = vsel %vm385_vm1, %v746_v57, 0.0  ;;  %v961_v50 = vld [vmem:[%s5232_s9 + $0x28] sm:$0xff]  ;;  %v964_v57 = vld [vmem:[%s5232_s9 + $0x40] sm:$0xff] }
 0x443   :  { %v3486_v51 = vpack.c.bf16 %v961_v50, %v960_v49 }
 0x444   :  { %v738_v61 = vsel %vm385_vm1, %v732_v58, 0.0  ;;  %v747_v63 = vmul.f32 %v732_v58, %v732_v58 }
 0x445   :  { %v739_v0 = vadd.f32 %v738_v61, %v737_v60  ;;  %v966_v60 = vld [vmem:[%s5232_s9 + $0x50] sm:$0xff]  ;;  %v967_v61 = vld [vmem:[%s5232_s9 + $0x58] sm:$0xff] }
 0x446   :  { %v749_v62 = vsel %vm385_vm1, %v747_v63, 0.0  ;;  %v3495_v63 = vpack.c.bf16 %v967_v61, %v966_v60  ;;  %v883_v61 = vld [vmem:[%s5235_s21] sm:$0x1]  ;;  %s5266_s21 = sld [smem:[#allocation44_spill]] }
 0x447   :  { %v740_v2 = vrot.slane %v739_v0, 4  ;;  %v750_v3 = vadd.f32 %v749_v62, %v748_v1  ;;  %v969_v1 = vld [vmem:[%s5232_s9 + $0x68] sm:$0xff] }
 0x449   :  { %v741_v4 = vadd.f32 %v740_v2, %v739_v0  ;;  %v751_v5 = vrot.slane %v750_v3, 4  ;;  %v968_v0 = vld [vmem:[%s5232_s9 + $0x60] sm:$0xff]  ;;  %v970_v2 = vld [vmem:[%s5232_s9 + $0x70] sm:$0xff] }
 0x44a   :  { %v3498_v62 = vpack.c.bf16 %v969_v1, %v968_v0 }
 0x44b   :  { %v742_v6 = vrot.slane %v741_v4, 2  ;;  %v752_v7 = vadd.f32 %v751_v5, %v750_v3  ;;  %v971_v3 = vld [vmem:[%s5232_s9 + $0x78] sm:$0xff]  ;;  %v972_v5 = vld [vmem:[%s5232_s9 + $0x80] sm:$0xff] }
 0x44d   :  { %v743_v8 = vadd.f32 %v742_v6, %v741_v4  ;;  %v753_v10 = vrot.slane %v752_v7, 2  ;;  %v3501_v4 = vpack.c.bf16 %v971_v3, %v970_v2  ;;  %v973_v6 = vld [vmem:[%s5232_s9 + $0x88] sm:$0xff] }
 0x44f   :  { %v744_v11 = vrot.slane %v743_v8, 1  ;;  %v754_v12 = vadd.f32 %v753_v10, %v752_v7  ;;  %v3504_v7 = vpack.c.bf16 %v973_v6, %v972_v5  ;;  %v975_v10 = vld [vmem:[%s5232_s9 + $0x98] sm:$0xff] }
 0x451   :  { %v745_v14 = vadd.f32 %v744_v11, %v743_v8  ;;  %v755_v16 = vrot.slane %v754_v12, 1  ;;  %v974_v8 = vld [vmem:[%s5232_s9 + $0x90] sm:$0xff] }
 0x452   :  { %v3507_v11 = vpack.c.bf16 %v975_v10, %v974_v8 }
 0x453   :  { %v756_v17 = vadd.f32 %v755_v16, %v754_v12  ;;  %v758_v18 = vmul.f32 0.0625, %v745_v14  ;;  %v976_v12 = vld [vmem:[%s5232_s9 + $0xa0] sm:$0xff]  ;;  %v977_v14 = vld [vmem:[%s5232_s9 + $0xa8] sm:$0xff] }
 0x454   :  { %v3510_v16 = vpack.c.bf16 %v977_v14, %v976_v12 }
 0x455   :  { %v759_v19 = vmul.f32 0.0625, %v756_v17  ;;  %v760_v21 = vmul.f32 %v758_v18, %v758_v18  ;;  %v978_v17 = vld [vmem:[%s5232_s9 + $0xb0] sm:$0xff] }
 0x457   :  { %v761_v22 = vsub.f32 %v759_v19, %v760_v21  ;;  %v3030_v21 = vld [vmem:[%s5233_s13] ss:$0 sm:$0xff]  ;;  %s5264_s13 = sld [smem:[#allocation46_spill]] }
 0x459   :  { %v762_v23 = vmax.f32 %v761_v22, 0.0 }
 0x45b   :  { %v763_v24 = vadd.f32 1e-05, %v762_v23 }
 0x45d   :  { %3895 = vrsqrt.f32 %v763_v24 }
 0x467   :  { %v3896_v26 = vpop.eup %3895 }
 0x468   :  { %v765_v27 = vmul.f32 %v3896_v26, %v735_v25 }
 0x46a   :  { %v766_v29 = vmul.f32 %v765_v27, %v758_v18  ;;  %v772_v33 = vrot.slane %v765_v27, %v4409_v34  ;;  %v979_v18 = vld [vmem:[%s5232_s9 + $0xb8] sm:$0xff] }
 0x46b   :  { %v3513_v19 = vpack.c.bf16 %v979_v18, %v978_v17 }
 0x46c   :  { %v767_v35 = vsub.f32 %v736_v28, %v766_v29  ;;  %v774_v36 = vmul.f32 %v772_v33, %v727_v53  ;;  %v775_v37 = vmul.f32 %v772_v33, %v732_v58  ;;  %v962_v53 = vld [vmem:[%s5232_s9 + $0x30] sm:$0xff]  ;;  %v965_v58 = vld [vmem:[%s5232_s9 + $0x48] sm:$0xff]  ;;  %s5263_s9 = sld [smem:[#allocation41_spill]] }
 0x46d   :  { %v3489_v56 = vpack.c.bf16 %v963_v55, %v962_v53  ;;  %v3492_v59 = vpack.c.bf16 %v965_v58, %v964_v57  ;;  %v882_v58 = vld [vmem:[%s5234_s17] sm:$0x1]  ;;  %s5265_s17 = sld [smem:[#allocation43_spill]] }
 0x46e   :  { %v780_v38 = vrot.slane %v767_v35, %v4409_v34 }
 0x470   :  { %v783_v39 = vadd.f32 %v780_v38, %v775_v37  ;;  %v782_v40 = vadd.f32 %v780_v38, %v774_v36 }
 0x472   :  { %v785_v41 = vmax.f32 %v783_v39, 0.0  ;;  %v784_v42 = vmax.f32 %v782_v40, 0.0 }
 0x474   :  { %3312 = vmatprep.mubr.msk.f32.mxu1 %vm385_vm1, %v784_v42 }
 0x475   :  { %3313 = vmatmul.mubr.msk.f32.vlgmr.msra.gmra.mrb[4].mxu1 %vm385_vm1, %v785_v41 }
 0x476   :  { %3481 = vmatpush1.bf16.msra.mxu1 %v3480_v46 }
 0x477   :  { %3482 = vmatprep.subr.bf16.mxu1 %v4069_v30 }
 0x47a   :  { %3484 = vmatpush1.bf16.msra.mxu1 %v3483_v48 }
 0x47b   :  { %3485 = vmatprep.subr.bf16.mxu1 %v4069_v30 }
 0x47e   :  { %3487 = vmatpush1.bf16.msra.mxu1 %v3486_v51 }
 0x47f   :  { %3488 = vmatprep.subr.bf16.mxu1 %v4069_v30 }
 0x482   :  { %3490 = vmatpush1.bf16.msra.mxu1 %v3489_v56 }
 0x483   :  { %3491 = vmatprep.subr.bf16.mxu1 %v4069_v30 }
 0x486   :  { %3493 = vmatpush1.bf16.msra.mxu1 %v3492_v59 }
 0x487   :  { %3494 = vmatprep.subr.bf16.mxu1 %v4069_v30 }
 0x48a   :  { %3496 = vmatpush1.bf16.msra.mxu1 %v3495_v63 }
 0x48b   :  { %3497 = vmatprep.subr.bf16.mxu1 %v4069_v30 }
 0x48e   :  { %3499 = vmatpush1.bf16.msra.mxu1 %v3498_v62 }
 0x48f   :  { %3500 = vmatprep.subr.bf16.mxu1 %v4069_v30 }
 0x492   :  { %3502 = vmatpush1.bf16.msra.mxu1 %v3501_v4 }
 0x493   :  { %3503 = vmatprep.subr.bf16.mxu1 %v4069_v30 }
 0x496   :  { %3505 = vmatpush1.bf16.msra.mxu1 %v3504_v7 }
 0x497   :  { %3506 = vmatprep.subr.bf16.mxu1 %v4069_v30 }
 0x49a   :  { %3508 = vmatpush1.bf16.msra.mxu1 %v3507_v11 }
 0x49b   :  { %3509 = vmatprep.subr.bf16.mxu1 %v4069_v30 }
 0x49e   :  { %3511 = vmatpush1.bf16.msra.mxu1 %v3510_v16 }
 0x49f   :  { %3512 = vmatprep.subr.bf16.mxu1 %v4069_v30 }
 0x4a2   :  { %3514 = vmatpush1.bf16.msra.mxu1 %v3513_v19 }
 0x548   :  { %v3314_v22 = vpop.f32.mrb[4].mxu1 }
 0x549   :  { %v879_v23 = vadd.f32 %v3314_v22, %v3030_v21  ;;  %v873_v24 = vpop.f32.mrb[5].mxu1 }
 0x54a   :  { %v874_v25 = vadd.f32 %v3030_v21, %v873_v24 }
 0x54b   :  { %v885_v26 = vsel %vm385_vm1, %v879_v23, 0.0  ;;  %v894_v27 = vmul.f32 %v879_v23, %v879_v23 }
 0x54c   :  { %v884_v28 = vsel %vm385_vm1, %v874_v25, 0.0  ;;  %v893_v29 = vmul.f32 %v874_v25, %v874_v25 }
 0x54d   :  { %v896_v33 = vsel %vm385_vm1, %v894_v27, 0.0  ;;  %v886_v35 = vadd.f32 %v885_v26, %v884_v28  ;;  %v1118_v28 = vld [vmem:[%s5236_s25] sm:$0xff] }
 0x54e   :  { %v895_v36 = vsel %vm385_vm1, %v893_v29, 0.0  ;;  %v1119_v29 = vld [vmem:[%s5236_s25 + $0x8] sm:$0xff] }
 0x54f   :  { %v887_v37 = vrot.slane %v886_v35, 4  ;;  %v897_v38 = vadd.f32 %v896_v33, %v895_v36  ;;  %v3515_v33 = vpack.c.bf16 %v1119_v29, %v1118_v28  ;;  %v1121_v36 = vld [vmem:[%s5236_s25 + $0x18] sm:$0xff] }
 0x551   :  { %v888_v39 = vadd.f32 %v887_v37, %v886_v35  ;;  %v898_v40 = vrot.slane %v897_v38, 4  ;;  %3516 = vmatprep.subr.bf16.mxu0 %v3515_v33  ;;  %v1120_v35 = vld [vmem:[%s5236_s25 + $0x10] sm:$0xff] }
 0x552   :  { %3518 = vmatpush3.bf16.msra.mxu0 %v3515_v33  ;;  %v3519_v37 = vpack.c.bf16 %v1121_v36, %v1120_v35 }
 0x553   :  { %v889_v41 = vrot.slane %v888_v39, 2  ;;  %v899_v42 = vadd.f32 %v898_v40, %v897_v38  ;;  %v1122_v38 = vld [vmem:[%s5236_s25 + $0x20] sm:$0xff] }
 0x554   :  { %3520 = vmatprep.subr.bf16.mxu0 %v3519_v37 }
 0x555   :  { %v890_v43 = vadd.f32 %v889_v41, %v888_v39  ;;  %v900_v44 = vrot.slane %v899_v42, 2  ;;  %v1123_v39 = vld [vmem:[%s5236_s25 + $0x28] sm:$0xff]  ;;  %v1124_v41 = vld [vmem:[%s5236_s25 + $0x30] sm:$0xff] }
 0x556   :  { %3522 = vmatpush3.bf16.msra.mxu0 %v3519_v37  ;;  %v3523_v40 = vpack.c.bf16 %v1123_v39, %v1122_v38  ;;  %v1267_v37 = vld [vmem:[%s5240_s14 + $0x8] sm:$0xff] }
 0x557   :  { %v891_v45 = vrot.slane %v890_v43, 1  ;;  %v901_v46 = vadd.f32 %v900_v44, %v899_v42  ;;  %v1125_v42 = vld [vmem:[%s5236_s25 + $0x38] sm:$0xff]  ;;  %v3033_v44 = vld [vmem:[%s5237_s29] ss:$0 sm:$0xff]  ;;  %v1271_v38 = vld [vmem:[%s5240_s14 + $0x28] sm:$0xff]  ;;  %s5267_s25 = sld [smem:[#allocation45_spill]] }
 0x558   :  { %3524 = vmatprep.subr.bf16.mxu0 %v3523_v40  ;;  %v3531_v39 = vpack.c.bf16 %v1271_v38, %v1267_v37  ;;  %s5269_s29 = sld [smem:[#allocation47_spill]] }
 0x559   :  { %v892_v47 = vadd.f32 %v891_v45, %v890_v43  ;;  %v902_v48 = vrot.slane %v901_v46, 1  ;;  %v3527_v43 = vpack.c.bf16 %v1125_v42, %v1124_v41  ;;  %v1270_v41 = vld [vmem:[%s5240_s14 + $0x20] sm:$0xff] }
 0x55a   :  { %3526 = vmatpush3.bf16.msra.mxu0 %v3523_v40  ;;  %v1266_v40 = vld [vmem:[%s5240_s14] sm:$0xff] }
 0x55b   :  { %v903_v49 = vadd.f32 %v902_v48, %v901_v46  ;;  %v904_v50 = vmul.f32 0.0625, %v892_v47  ;;  %3528 = vmatprep.subr.bf16.mxu0 %v3527_v43  ;;  %v3533_v42 = vpack.c.bf16 %v1270_v41, %v1266_v40 }
 0x55d   :  { %v905_v51 = vmul.f32 0.0625, %v903_v49  ;;  %v906_v53 = vmul.f32 %v904_v50, %v904_v50 }
 0x55e   :  { %3530 = vmatpush3.bf16.msra.mxu0 %v3527_v43  ;;  %v1275_v43 = vld [vmem:[%s5240_s14 + $0x48] sm:$0xff] }
 0x55f   :  { %v907_v55 = vsub.f32 %v905_v51, %v906_v53  ;;  %3532 = vmatprep.subr.bf16.mxu0 %v3531_v39 }
 0x561   :  { %v908_v56 = vmax.f32 %v907_v55, 0.0 }
 0x563   :  { %v909_v57 = vadd.f32 1e-05, %v908_v56 }
 0x565   :  { %3897 = vrsqrt.f32 %v909_v57 }
 0x56f   :  { %v3898_v59 = vpop.eup %3897 }
 0x570   :  { %v911_v60 = vmul.f32 %v3898_v59, %v882_v58 }
 0x572   :  { %v912_v63 = vmul.f32 %v911_v60, %v904_v50  ;;  %v918_v0 = vrot.slane %v911_v60, %v4409_v34 }
 0x574   :  { %v913_v1 = vsub.f32 %v883_v61, %v912_v63  ;;  %v920_v62 = vmul.f32 %v918_v0, %v874_v25  ;;  %v921_v2 = vmul.f32 %v918_v0, %v879_v23 }
 0x576   :  { %v926_v3 = vrot.slane %v913_v1, %v4409_v34 }
 0x578   :  { %v928_v4 = vadd.f32 %v926_v3, %v920_v62  ;;  %v929_v5 = vadd.f32 %v926_v3, %v921_v2 }
 0x57a   :  { %v4590_v6 = vadd.f32 %v929_v5, %v4500_v15  ;;  %v4593_v7 = vadd.f32 %v928_v4, %v4497_v9 }
 0x57c   :  { %v933_v8 = vmax.f32 %v4590_v6, 0.0  ;;  %v932_v10 = vmax.f32 %v4593_v7, 0.0 }
 0x57e   :  { %950 = vrot.lane.b32.xlu1 %v933_v8, %s4068_s5  ;;  %v935_v11 = vrot.slane %v933_v8, 7  ;;  %v941_v12 = vrot.slane %v933_v8, 1  ;;  %948 = vrot.lane.b32.xlu0 %v932_v10, %s4068_s5  ;;  %v934_v14 = vrot.slane %v932_v10, 7  ;;  %v940_v16 = vrot.slane %v932_v10, 1 }
 0x580   :  { %v942_v17 = vsel %vm460_vm3, %v940_v16, %v941_v12  ;;  %v937_v9 = vsel %vm5188_vm5, %v935_v11, %v934_v14  ;;  %v943_v15 = vsel %vm460_vm3, %v941_v12, %v940_v16  ;;  %v936_v18 = vsel %vm5188_vm5, %v934_v14, %v935_v11 }
 0x581   :  { %v944_v19 = vsel %vm4420_vm2, 0.0, %v942_v17  ;;  %v938_v22 = vsel %vm4444_vm6, 0.0, %v937_v9  ;;  %v945_v25 = vsel %vm4425_vm4, 0.0, %v943_v15  ;;  %v939_v26 = vsel %vm4452_vm7, 0.0, %v936_v18  ;;  %v1068_v18 = vld [vmem:[%s5238_s3] sm:$0x1] }
 0x582   :  { %3034 = vmatprep.mubr.msk.f32.mxu1 %vm385_vm1, %v944_v19  ;;  %s5271_s3 = sld [smem:[#allocation48_spill]] }
 0x5f0   :  { %v949_v21 = vpop.permute.xlu0 %948  ;;  %v951_v24 = vpop.permute.xlu1 %950 }
 0x5f1   :  { %v954_v23 = vsel %vm385_vm1, %v938_v22, %v949_v21  ;;  %v955_v27 = vsel %vm385_vm1, %v939_v26, %v951_v24  ;;  %v1069_v22 = vld [vmem:[%s5239_s8] sm:$0x1] }
 0x5f2   :  { %1058 = vmatmul.mubr.f32.vlgmr.msra.gmra.mrb[6].mxu1 %v954_v23 }
 0x5f3   :  { %3035 = vmatprep.mubr.msk.f32.mxu1 %vm385_vm1, %v945_v25 }
 0x5f6   :  { %1063 = vmatmul.mubr.f32.gmra.mrb[8].mxu1 %v955_v27 }
 0x6c5   :  { %v1059_v45 = vpop.f32.mrb[6].mxu1 }
 0x6c6   :  { %v1060_v46 = vadd.f32 %v3033_v44, %v1059_v45  ;;  %v1061_v47 = vpop.f32.mrb[7].mxu1 }
 0x6c7   :  { %v1278_v47 = vld [vmem:[%s5240_s14 + $0x60] sm:$0xff] }
 0x6c8   :  { %v1079_v49 = vmul.f32 %v1060_v46, %v1060_v46  ;;  %v1070_v53 = vsel %vm385_vm1, %v1060_v46, 0.0 }
 0x6c9   :  { %v1064_v48 = vpop.f32.mrb[8].mxu1 }
 0x6ca   :  { %v1065_v50 = vadd.f32 %v3033_v44, %v1064_v48  ;;  %v1066_v51 = vpop.f32.mrb[9].mxu1  ;;  %v1081_v58 = vsel %vm385_vm1, %v1079_v49, 0.0  ;;  %v1279_v44 = vld [vmem:[%s5240_s14 + $0x68] sm:$0xff] }
 0x6cb   :  { %v3535_v45 = vpack.c.bf16 %v1279_v44, %v1275_v43  ;;  %v1283_v49 = vld [vmem:[%s5240_s14 + $0x88] sm:$0xff] }
 0x6cc   :  { %v1071_v55 = vsel %vm385_vm1, %v1065_v50, 0.0  ;;  %v1080_v56 = vmul.f32 %v1065_v50, %v1065_v50 }
 0x6cd   :  { %v1072_v57 = vadd.f32 %v1071_v55, %v1070_v53  ;;  %v1282_v53 = vld [vmem:[%s5240_s14 + $0x80] sm:$0xff] }
 0x6ce   :  { %v1082_v59 = vsel %vm385_vm1, %v1080_v56, 0.0  ;;  %v1286_v55 = vld [vmem:[%s5240_s14 + $0xa0] sm:$0xff] }
 0x6cf   :  { %v1073_v60 = vrot.slane %v1072_v57, 4  ;;  %v1083_v61 = vadd.f32 %v1082_v59, %v1081_v58  ;;  %v3541_v56 = vpack.c.bf16 %v1286_v55, %v1282_v53  ;;  %v1295_v58 = vld [vmem:[%s5240_s14 + $0xe8] sm:$0xff]  ;;  %v1268_v53 = vld [vmem:[%s5240_s14 + $0x10] sm:$0xff] }
 0x6d0   :  { %v1272_v55 = vld [vmem:[%s5240_s14 + $0x30] sm:$0xff] }
 0x6d1   :  { %v1074_v63 = vadd.f32 %v1073_v60, %v1072_v57  ;;  %v1084_v0 = vrot.slane %v1083_v61, 4  ;;  %v1291_v57 = vld [vmem:[%s5240_s14 + $0xc8] sm:$0xff]  ;;  %v1290_v60 = vld [vmem:[%s5240_s14 + $0xc0] sm:$0xff] }
 0x6d2   :  { %v3543_v59 = vpack.c.bf16 %v1295_v58, %v1291_v57  ;;  %v1281_v57 = vld [vmem:[%s5240_s14 + $0x78] sm:$0xff] }
 0x6d3   :  { %v1075_v1 = vrot.slane %v1074_v63, 2  ;;  %v1085_v62 = vadd.f32 %v1084_v0, %v1083_v61  ;;  %v1294_v61 = vld [vmem:[%s5240_s14 + $0xe0] sm:$0xff]  ;;  %v1269_v0 = vld [vmem:[%s5240_s14 + $0x18] sm:$0xff] }
 0x6d5   :  { %v1076_v2 = vadd.f32 %v1075_v1, %v1074_v63  ;;  %v1086_v3 = vrot.slane %v1085_v62, 2  ;;  %v3545_v63 = vpack.c.bf16 %v1294_v61, %v1290_v60  ;;  %v1273_v1 = vld [vmem:[%s5240_s14 + $0x38] sm:$0xff]  ;;  %v3549_v60 = vpack.c.bf16 %v1272_v55, %v1268_v53 }
 0x6d7   :  { %v1077_v4 = vrot.slane %v1076_v2, 1  ;;  %v1087_v5 = vadd.f32 %v1086_v3, %v1085_v62  ;;  %v3547_v62 = vpack.c.bf16 %v1273_v1, %v1269_v0  ;;  %v3036_v3 = vld [vmem:[%s5241_s19] ss:$0 sm:$0xff]  ;;  %v1276_v1 = vld [vmem:[%s5240_s14 + $0x50] sm:$0xff] }
 0x6d9   :  { %v1078_v8 = vadd.f32 %v1077_v4, %v1076_v2  ;;  %v1088_v10 = vrot.slane %v1087_v5, 1  ;;  %v4070_v2 = vmov 0.0  }
 0x6db   :  { %v1089_v11 = vadd.f32 %v1088_v10, %v1087_v5  ;;  %v1090_v12 = vmul.f32 0.0625, %v1078_v8 }
 0x6dd   :  { %v1091_v14 = vmul.f32 0.0625, %v1089_v11  ;;  %v1092_v16 = vmul.f32 %v1090_v12, %v1090_v12 }
 0x6df   :  { %v1093_v17 = vsub.f32 %v1091_v14, %v1092_v16 }
 0x6e1   :  { %v1094_v9 = vmax.f32 %v1093_v17, 0.0 }
 0x6e3   :  { %v1095_v15 = vadd.f32 1e-05, %v1094_v9 }
 0x6e5   :  { %3899 = vrsqrt.f32 %v1095_v15 }
 0x6ef   :  { %v3900_v19 = vpop.eup %3899 }
 0x6f0   :  { %v1097_v21 = vmul.f32 %v3900_v19, %v1068_v18 }
 0x6f2   :  { %v1098_v23 = vmul.f32 %v1097_v21, %v1090_v12  ;;  %v1104_v24 = vrot.slane %v1097_v21, %v4409_v34 }
 0x6f4   :  { %v1099_v25 = vsub.f32 %v1069_v22, %v1098_v23  ;;  %v1106_v26 = vmul.f32 %v1104_v24, %v1060_v46  ;;  %v1107_v27 = vmul.f32 %v1104_v24, %v1065_v50  ;;  %v1274_v46 = vld [vmem:[%s5240_s14 + $0x40] sm:$0xff]  ;;  %v1287_v50 = vld [vmem:[%s5240_s14 + $0xa8] sm:$0xff] }
 0x6f5   :  { %v3537_v48 = vpack.c.bf16 %v1278_v47, %v1274_v46  ;;  %v3539_v51 = vpack.c.bf16 %v1287_v50, %v1283_v49 }
 0x6f6   :  { %v1112_v28 = vrot.slane %v1099_v25, %v4409_v34 }
 0x6f8   :  { %v1115_v29 = vadd.f32 %v1112_v28, %v1107_v27  ;;  %v1114_v33 = vadd.f32 %v1112_v28, %v1106_v26 }
 0x6fa   :  { %v1117_v35 = vmax.f32 %v1115_v29, 0.0  ;;  %v1116_v36 = vmax.f32 %v1114_v33, 0.0 }
 0x6fc   :  { %3331 = vmatprep.mubr.msk.f32.mxu0 %vm385_vm1, %v1116_v36 }
 0x6fd   :  { %3332 = vmatmul.mubr.msk.f32.vlgmr.msra.gmra.mrb[8].mxu0 %vm385_vm1, %v1117_v35 }
 0x6fe   :  { %3534 = vmatpush1.bf16.msra.mxu0 %v3533_v42  ;;  %1368 = vmatprep.mubr.f32.mxu0 %v4070_v2  ;;  %v1214_v42 = vld [vmem:[%s5242_s24] sm:$0x1] }
 0x6ff   :  { %3536 = vmatprep.subr.bf16.mxu0 %v3535_v45  ;;  %v1215_v45 = vld [vmem:[%s5243_s4] sm:$0x1] }
 0x702   :  { %3538 = vmatpush1.bf16.msra.mxu0 %v3537_v48 }
 0x703   :  { %3540 = vmatprep.subr.bf16.mxu0 %v3539_v51 }
 0x706   :  { %3542 = vmatpush1.bf16.msra.mxu0 %v3541_v56  ;;  %v1277_v56 = vld [vmem:[%s5240_s14 + $0x58] sm:$0xff] }
 0x707   :  { %3544 = vmatprep.subr.bf16.mxu0 %v3543_v59 }
 0x70a   :  { %3546 = vmatpush1.bf16.msra.mxu0 %v3545_v63  ;;  %v3551_v63 = vpack.c.bf16 %v1281_v57, %v1277_v56 }
 0x70b   :  { %3548 = vmatprep.subr.bf16.mxu0 %v3547_v62  ;;  %v1280_v62 = vld [vmem:[%s5240_s14 + $0x70] sm:$0xff] }
 0x7d0   :  { %v3333_v4 = vpop.f32.mrb[8].mxu0 }
 0x7d1   :  { %v1211_v5 = vadd.f32 %v3333_v4, %v3036_v3  ;;  %v1205_v8 = vpop.f32.mrb[9].mxu0  ;;  %v1289_v4 = vld [vmem:[%s5240_s14 + $0xb8] sm:$0xff] }
 0x7d2   :  { %v1206_v10 = vadd.f32 %v3036_v3, %v1205_v8  ;;  %v1285_v3 = vld [vmem:[%s5240_s14 + $0x98] sm:$0xff]  ;;  %v1288_v8 = vld [vmem:[%s5240_s14 + $0xb0] sm:$0xff] }
 0x7d3   :  { %v1217_v11 = vsel %vm385_vm1, %v1211_v5, 0.0  ;;  %v1226_v12 = vmul.f32 %v1211_v5, %v1211_v5 }
 0x7d4   :  { %v1216_v14 = vsel %vm385_vm1, %v1206_v10, 0.0  ;;  %v1225_v16 = vmul.f32 %v1206_v10, %v1206_v10 }
 0x7d5   :  { %v1228_v17 = vsel %vm385_vm1, %v1226_v12, 0.0  ;;  %v1218_v9 = vadd.f32 %v1217_v11, %v1216_v14  ;;  %v1297_v11 = vld [vmem:[%s5240_s14 + $0xf8] sm:$0xff] }
 0x7d6   :  { %v1227_v15 = vsel %vm385_vm1, %v1225_v16, 0.0  ;;  %v1292_v16 = vld [vmem:[%s5240_s14 + $0xd0] sm:$0xff] }
 0x7d7   :  { %v1219_v18 = vrot.slane %v1218_v9, 4  ;;  %v1229_v19 = vadd.f32 %v1228_v17, %v1227_v15  ;;  %v1296_v17 = vld [vmem:[%s5240_s14 + $0xf0] sm:$0xff] }
 0x7d9   :  { %v1220_v21 = vadd.f32 %v1219_v18, %v1218_v9  ;;  %v1230_v22 = vrot.slane %v1229_v19, 4  ;;  %v3561_v9 = vpack.c.bf16 %v1296_v17, %v1292_v16 }
 0x7db   :  { %v1221_v23 = vrot.slane %v1220_v21, 2  ;;  %v1231_v24 = vadd.f32 %v1230_v22, %v1229_v19  ;;  %v1478_v22 = vsub.s32 2, %v4405_v32 }
 0x7dd   :  { %v1222_v25 = vadd.f32 %v1221_v23, %v1220_v21  ;;  %v1232_v26 = vrot.slane %v1231_v24, 2  ;;  %v1458_v23 = vld [vmem:[%s5244_s23] sm:$0xf] }
 0x7df   :  { %v1223_v27 = vrot.slane %v1222_v25, 1  ;;  %v1233_v28 = vadd.f32 %v1232_v26, %v1231_v24  ;;  %v1474_v24 = vsub.s32 1, %v4405_v32 }
 0x7e1   :  { %v1224_v29 = vadd.f32 %v1223_v27, %v1222_v25  ;;  %v1234_v33 = vrot.slane %v1233_v28, 1  ;;  %v1482_v25 = vsub.s32 3, %v4405_v32  ;;  %v1471_v27 = vrot.slane %v1458_v23, %v4409_v34 }
 0x7e3   :  { %v1235_v35 = vadd.f32 %v1234_v33, %v1233_v28  ;;  %v1236_v36 = vmul.f32 0.0625, %v1224_v29  ;;  %v1479_v28 = vrot.slane %v1458_v23, %v1478_v22  ;;  %v1475_v33 = vrot.slane %v1458_v23, %v1474_v24  ;;  %v1608_v24 = vld [vmem:[%s5245_s6 + $0x88] sm:$0xff] }
 0x7e5   :  { %v1237_v37 = vmul.f32 0.0625, %v1235_v35  ;;  %v1238_v38 = vmul.f32 %v1236_v36, %v1236_v36  ;;  %v1483_v35 = vrot.slane %v1458_v23, %v1482_v25  ;;  %v1607_v23 = vld [vmem:[%s5245_s6 + $0x80] sm:$0xff] }
 0x7e6   :  { %v1639_v25 = vld [vmem:[%s5245_s6 + $0x180] sm:$0xff] }
 0x7e7   :  { %v1239_v39 = vsub.f32 %v1237_v37, %v1238_v38 }
 0x7e9   :  { %v1240_v40 = vmax.f32 %v1239_v39, 0.0 }
 0x7eb   :  { %v1241_v41 = vadd.f32 1e-05, %v1240_v40 }
 0x7ed   :  { %3901 = vrsqrt.f32 %v1241_v41 }
 0x7f7   :  { %v3902_v43 = vpop.eup %3901 }
 0x7f8   :  { %v1243_v44 = vmul.f32 %v3902_v43, %v1214_v42 }
 0x7fa   :  { %v1244_v46 = vmul.f32 %v1243_v44, %v1236_v36  ;;  %v1250_v47 = vrot.slane %v1243_v44, %v4409_v34 }
 0x7fc   :  { %v1245_v48 = vsub.f32 %v1215_v45, %v1244_v46  ;;  %v1252_v49 = vmul.f32 %v1250_v47, %v1206_v10  ;;  %v1253_v50 = vmul.f32 %v1250_v47, %v1211_v5  ;;  %v3555_v5 = vpack.c.bf16 %v1289_v4, %v1285_v3  ;;  %v1293_v10 = vld [vmem:[%s5240_s14 + $0xd8] sm:$0xff] }
 0x7fd   :  { %v3559_v14 = vpack.c.bf16 %v1297_v11, %v1293_v10 }
 0x7fe   :  { %v1258_v51 = vrot.slane %v1245_v48, %v4409_v34 }
 0x800   :  { %v1260_v58 = vadd.f32 %v1258_v51, %v1252_v49  ;;  %v1261_v59 = vadd.f32 %v1258_v51, %v1253_v50 }
 0x802   :  { %v1262_v61 = vadd.f32 %v1260_v58, %v4593_v7  ;;  %v1263_v0 = vadd.f32 %v1261_v59, %v4590_v6  ;;  %v3553_v7 = vpack.c.bf16 %v1280_v62, %v1276_v1  ;;  %v1284_v6 = vld [vmem:[%s5240_s14 + $0x90] sm:$0xff]  ;;  %s4073_s14 = smov [#allocation9]  }
 0x803   :  { %v3557_v12 = vpack.c.bf16 %v1288_v8, %v1284_v6  ;;  %s2943_s19 = sshll.u32 %s4073_s14, 4  ;;  %s5155_s19 = int_to_ptr.vmem [resolvable:$true] %s2943_s19 }
 0x804   :  { %1264 = vst.msk [vmem:[#allocation8] sm:$0xff] %vm385_vm1, %v1262_v61  ;;  %3039 = vmatmul.mubr.msk.f32.vlgmr.msra.gmra.mrb[10].mxu0 %vm385_vm1, %v1262_v61  ;;  %1265 = vst.msk [vmem:[#allocation8 + $0x8] sm:$0xff] %vm385_vm1, %v1263_v0 }
 0x805   :  { %3550 = vmatpush1.bf16.msra.mxu0 %v3549_v60  ;;  %1374 = vmatprep.mubr.f32.mxu0 %v4070_v2 }
 0x806   :  { %3552 = vmatprep.subr.bf16.mxu0 %v3551_v63 }
 0x808   :  { %3040 = vmatmul.mubr.msk.f32.gmra.mrb[12].mxu0 %vm385_vm1, %v1263_v0 }
 0x809   :  { %3554 = vmatpush1.bf16.msra.mxu0 %v3553_v7  ;;  %1445 = vmatprep.mubr.f32.mxu0 %v4070_v2 }
 0x80a   :  { %3556 = vmatprep.subr.bf16.mxu0 %v3555_v5 }
 0x80d   :  { %3558 = vmatpush1.bf16.msra.mxu0 %v3557_v12 }
 0x80e   :  { %3560 = vmatprep.subr.bf16.mxu0 %v3559_v14 }
 0x811   :  { %3562 = vmatpush1.bf16.msra.mxu0 %v3561_v9 }
 0x814   :  { %3041 = vmatmul.mubr.msk.f32.vlgmr.msra.gmra.mrb[14].mxu0 %vm385_vm1, %v1262_v61  ;;  %v4697_v61 = vand.u32 127, %v241_v31 }
 0x815   :  { %1451 = vmatprep.mubr.f32.mxu0 %v4070_v2 }
 0x816   :  { %v4700_v63 = vadd.s32 128, %v4697_v61  ;;  %v4706_v1 = vadd.s32 384, %v4697_v61 }
 0x818   :  { %3042 = vmatmul.mubr.msk.f32.gmra.mrb[16].mxu0 %vm385_vm1, %v1263_v0  ;;  %v4703_v0 = vadd.s32 256, %v4697_v61 }
 0x8d7   :  { %v1370_v15 = vpop.f32.mrb[10].mxu0 }
 0x8d8   :  { %v1372_v18 = vpop.f32.mrb[11].mxu0  ;;  %v1459_v26 = vmul.f32 2.0, %v1370_v15 }
 0x8d9   :  { %v1460_v29 = vmul.f32 2.0, %v1372_v18 }
 0x8da   :  { %v1488_v39 = vsub.f32 %v1471_v27, %v1459_v26  ;;  %v3563_v26 = vpack.c.bf16 %v1608_v24, %v1607_v23  ;;  %v1648_v23 = vld [vmem:[%s5245_s6 + $0x1c8] sm:$0xff] }
 0x8db   :  { %v1376_v19 = vpop.f32.mrb[12].mxu0  ;;  %v1489_v42 = vsub.f32 %v1475_v33, %v1460_v29  ;;  %v1592_v29 = vld [vmem:[%s5245_s6 + $0x8] sm:$0xff] }
 0x8dc   :  { %v1378_v21 = vpop.f32.mrb[13].mxu0  ;;  %v1463_v40 = vmul.f32 2.0, %v1376_v19  ;;  %3564 = vmatprep.subr.bf16.mxu1 %v3563_v26 }
 0x8dd   :  { %v1464_v43 = vmul.f32 2.0, %v1378_v21 }
 0x8de   :  { %v1492_v51 = vsub.f32 %v1471_v27, %v1463_v40  ;;  %v1640_v27 = vld [vmem:[%s5245_s6 + $0x188] sm:$0xff]  ;;  %v1641_v40 = vld [vmem:[%s5245_s6 + $0x190] sm:$0xff] }
 0x8df   :  { %v1493_v55 = vsub.f32 %v1475_v33, %v1464_v43  ;;  %v3595_v33 = vpack.c.bf16 %v1640_v27, %v1639_v25  ;;  %v1599_v27 = vld [vmem:[%s5245_s6 + $0x40] sm:$0xff] }
 0x8e1   :  { %3596 = vmatprep.subr.bf16.mxu0 %v3595_v33 }
 0x8e7   :  { %v1447_v2 = vpop.f32.mrb[14].mxu0 }
 0x8e8   :  { %v1461_v36 = vmul.f32 2.0, %v1447_v2  ;;  %v1449_v37 = vpop.f32.mrb[15].mxu0 }
 0x8e9   :  { %v1462_v38 = vmul.f32 2.0, %v1449_v37  ;;  %v1609_v37 = vld [vmem:[%s5245_s6 + $0x90] sm:$0xff] }
 0x8ea   :  { %v1490_v41 = vsub.f32 %v1479_v28, %v1461_v36  ;;  %v1624_v36 = vld [vmem:[%s5245_s6 + $0x108] sm:$0xff] }
 0x8eb   :  { %v1491_v44 = vsub.f32 %v1483_v35, %v1462_v38  ;;  %v1453_v45 = vpop.f32.mrb[16].mxu0 }
 0x8ec   :  { %v1465_v46 = vmul.f32 2.0, %v1453_v45  ;;  %v1455_v47 = vpop.f32.mrb[17].mxu0  ;;  %v1496_v48 = vmin.f32 %v1488_v39, %v1490_v41  ;;  %v1594_v45 = vld [vmem:[%s5245_s6 + $0x18] sm:$0xff] }
 0x8ed   :  { %v1466_v49 = vmul.f32 2.0, %v1455_v47  ;;  %v1497_v50 = vmin.f32 %v1489_v42, %v1491_v44 }
 0x8ee   :  { %v1494_v53 = vsub.f32 %v1479_v28, %v1465_v46  ;;  %v1591_v28 = vld [vmem:[%s5245_s6] sm:$0xff]  ;;  %v1625_v46 = vld [vmem:[%s5245_s6 + $0x110] sm:$0xff] }
 0x8ef   :  { %v1495_v56 = vsub.f32 %v1483_v35, %v1466_v49  ;;  %v1498_v57 = vmin.f32 %v1496_v48, %v1497_v50  ;;  %v3565_v2 = vpack.c.bf16 %v1592_v29, %v1591_v28  ;;  %v1623_v35 = vld [vmem:[%s5245_s6 + $0x100] sm:$0xff]  ;;  %v1626_v48 = vld [vmem:[%s5245_s6 + $0x118] sm:$0xff]  ;;  %v1612_v50 = vld [vmem:[%s5245_s6 + $0xa8] sm:$0xff] }
 0x8f0   :  { %v1501_v58 = vmin.f32 %v1492_v51, %v1494_v53  ;;  %v3597_v38 = vpack.c.bf16 %v1624_v36, %v1623_v35  ;;  %v1611_v49 = vld [vmem:[%s5245_s6 + $0xa0] sm:$0xff]  ;;  %v1600_v28 = vld [vmem:[%s5245_s6 + $0x48] sm:$0xff]  ;;  %v1617_v35 = vld [vmem:[%s5245_s6 + $0xd0] sm:$0xff] }
 0x8f1   :  { %1499 = vmin.xlane.f32.xlu0 %v1498_v57  ;;  %v1502_v59 = vmin.f32 %v1493_v55, %v1495_v56  ;;  %3566 = vmatpush3.bf16.msra.mxu1 %v3565_v2  ;;  %v1595_v57 = vld [vmem:[%s5245_s6 + $0x20] sm:$0xff]  ;;  %v1632_v2 = vld [vmem:[%s5245_s6 + $0x148] sm:$0xff]  ;;  %v1618_v36 = vld [vmem:[%s5245_s6 + $0xd8] sm:$0xff] }
 0x8f2   :  { %3598 = vmatpush3.bf16.msra.mxu0 %v3597_v38  ;;  %v1631_v29 = vld [vmem:[%s5245_s6 + $0x140] sm:$0xff]  ;;  %v1650_v38 = vld [vmem:[%s5245_s6 + $0x1d8] sm:$0xff] }
 0x8f3   :  { %v1503_v60 = vmin.f32 %v1501_v58, %v1502_v59  ;;  %v1596_v59 = vld [vmem:[%s5245_s6 + $0x28] sm:$0xff] }
 0x8f5   :  { %1504 = vmin.xlane.f32.xlu1 %v1503_v60  ;;  %v1627_v60 = vld [vmem:[%s5245_s6 + $0x120] sm:$0xff] }
 0x97e   :  { %v1500_v62 = vpop.xlane.xlu0 %1499 }
 0x97f   :  { %vm1511_vm8 = vcmp.le.f32.partialorder %v1488_v39, %v1500_v62  ;;  %vm1512_vm9 = vcmp.le.f32.partialorder %v1489_v42, %v1500_v62  ;;  %vm1513_vm10 = vcmp.le.f32.partialorder %v1490_v41, %v1500_v62  ;;  %vm1514_vm11 = vcmp.le.f32.partialorder %v1491_v44, %v1500_v62  ;;  %v1610_v39 = vld [vmem:[%s5245_s6 + $0x98] sm:$0xff]  ;;  %v1593_v44 = vld [vmem:[%s5245_s6 + $0x10] sm:$0xff]  ;;  %v1628_v62 = vld [vmem:[%s5245_s6 + $0x128] sm:$0xff] }
 0x980   :  { %v1519_v3 = vsel %vm1511_vm8, %v4697_v61, 512  ;;  %v1520_v4 = vsel %vm1512_vm9, %v4700_v63, 512  ;;  %v1521_v31 = vsel %vm1513_vm10, %v4703_v0, 512  ;;  %v1522_v7 = vsel %vm1514_vm11, %v4706_v1, 512  ;;  %v1642_v41 = vld [vmem:[%s5245_s6 + $0x198] sm:$0xff] }
 0x981   :  { %vm1527_vm12 = vcmp.lt.s32.totalorder %v1519_v3, %v1521_v31  ;;  %vm1529_vm13 = vcmp.lt.s32.totalorder %v1520_v4, %v1522_v7  ;;  %v3567_v42 = vpack.c.bf16 %v1610_v39, %v1609_v37  ;;  %v3599_v43 = vpack.c.bf16 %v1642_v41, %v1641_v40  ;;  %v1649_v37 = vld [vmem:[%s5245_s6 + $0x1d0] sm:$0xff] }
 0x982   :  { %v1505_v5 = vpop.xlane.xlu1 %1504  ;;  %v1528_v6 = vsel %vm1527_vm12, %v1519_v3, %v1521_v31  ;;  %v1530_v8 = vsel %vm1529_vm13, %v1520_v4, %v1522_v7  ;;  %v3569_v47 = vpack.c.bf16 %v1594_v45, %v1593_v44  ;;  %v3573_v3 = vpack.c.bf16 %v1596_v59, %v1595_v57  ;;  %v1613_v4 = vld [vmem:[%s5245_s6 + $0xb0] sm:$0xff]  ;;  %v1614_v31 = vld [vmem:[%s5245_s6 + $0xb8] sm:$0xff]  ;;  %v1604_v57 = vld [vmem:[%s5245_s6 + $0x68] sm:$0xff] }
 0x983   :  { %vm1515_vm14 = vcmp.le.f32.partialorder %v1492_v51, %v1505_v5  ;;  %vm1516_vm15 = vcmp.le.f32.partialorder %v1493_v55, %v1505_v5  ;;  %vm1517_vm0 = vcmp.le.f32.partialorder %v1494_v53, %v1505_v5  ;;  %vm1518_vm5 = vcmp.le.f32.partialorder %v1495_v56, %v1505_v5  ;;  %3568 = vmatprep.subr.bf16.mxu1 %v3567_v42  ;;  %v1643_v55 = vld [vmem:[%s5245_s6 + $0x1a0] sm:$0xff]  ;;  %v1644_v56 = vld [vmem:[%s5245_s6 + $0x1a8] sm:$0xff]  ;;  %v1645_v7 = vld [vmem:[%s5245_s6 + $0x1b0] sm:$0xff] }
 0x984   :  { %v1523_v10 = vsel %vm1515_vm14, %v4697_v61, 512  ;;  %v1524_v11 = vsel %vm1516_vm15, %v4700_v63, 512  ;;  %v1525_v12 = vsel %vm1517_vm0, %v4703_v0, 512  ;;  %v1526_v14 = vsel %vm1518_vm5, %v4706_v1, 512  ;;  %3600 = vmatprep.subr.bf16.mxu0 %v3599_v43  ;;  %3570 = vmatpush3.bf16.msra.mxu1 %v3569_v47  ;;  %v1601_v42 = vld [vmem:[%s5245_s6 + $0x50] sm:$0xff]  ;;  %v1602_v43 = vld [vmem:[%s5245_s6 + $0x58] sm:$0xff] }
 0x985   :  { %vm1531_vm8 = vcmp.lt.s32.totalorder %v1528_v6, %v1530_v8  ;;  %vm1547_vm9 = vcmp.lt.s32.totalorder %v1523_v10, %v1525_v12  ;;  %vm1549_vm10 = vcmp.lt.s32.totalorder %v1524_v11, %v1526_v14  ;;  %v3601_v51 = vpack.c.bf16 %v1626_v48, %v1625_v46  ;;  %v1633_v44 = vld [vmem:[%s5245_s6 + $0x150] sm:$0xff]  ;;  %v1634_v46 = vld [vmem:[%s5245_s6 + $0x158] sm:$0xff]  ;;  %v1619_v47 = vld [vmem:[%s5245_s6 + $0xe0] sm:$0xff] }
 0x986   :  { %v4716_v16 = vsel %vm1531_vm8, %v1528_v6, %v1530_v8  ;;  %v1548_v17 = vsel %vm1547_vm9, %v1523_v10, %v1525_v12  ;;  %v1550_v9 = vsel %vm1549_vm10, %v1524_v11, %v1526_v14  ;;  %v3571_v53 = vpack.c.bf16 %v1612_v50, %v1611_v49  ;;  %v1646_v8 = vld [vmem:[%s5245_s6 + $0x1b8] sm:$0xff]  ;;  %v1597_v10 = vld [vmem:[%s5245_s6 + $0x30] sm:$0xff]  ;;  %v1620_v48 = vld [vmem:[%s5245_s6 + $0xe8] sm:$0xff] }
 0x987   :  { %v1534_v15 = vshra.s32 %v4716_v16, 16  ;;  %vm1551_vm11 = vcmp.lt.s32.totalorder %v1548_v17, %v1550_v9  ;;  %v3603_v58 = vpack.c.bf16 %v1644_v56, %v1643_v55  ;;  %3602 = vmatpush3.bf16.msra.mxu0 %v3601_v51  ;;  %v3605_v5 = vpack.c.bf16 %v1628_v62, %v1627_v60  ;;  %v1598_v11 = vld [vmem:[%s5245_s6 + $0x38] sm:$0xff]  ;;  %v1629_v14 = vld [vmem:[%s5245_s6 + $0x130] sm:$0xff]  ;;  %v1651_v49 = vld [vmem:[%s5245_s6 + $0x1e0] sm:$0xff] }
 0x988   :  { %v4719_v18 = vsel %vm1551_vm11, %v1548_v17, %v1550_v9  ;;  %3572 = vmatprep.subr.bf16.mxu1 %v3571_v53  ;;  %v3575_v6 = vpack.c.bf16 %v1614_v31, %v1613_v4  ;;  %v3607_v12 = vpack.c.bf16 %v1646_v8, %v1645_v7  ;;  %v1630_v17 = vld [vmem:[%s5245_s6 + $0x138] sm:$0xff]  ;;  %v1615_v9 = vld [vmem:[%s5245_s6 + $0xc0] sm:$0xff]  ;;  %v3577_v24 = vpack.c.bf16 %v1598_v11, %v1597_v10  ;;  %v1652_v50 = vld [vmem:[%s5245_s6 + $0x1e8] sm:$0xff] }
 0x989   :  { %v4721_v19 = vcvt.s32.f32 %v1534_v15  ;;  %v1554_v21 = vshra.s32 %v4719_v18, 16  ;;  %3604 = vmatprep.subr.bf16.mxu0 %v3603_v58  ;;  %v1616_v15 = vld [vmem:[%s5245_s6 + $0xc8] sm:$0xff]  ;;  %3574 = vmatpush3.bf16.msra.mxu1 %v3573_v3  ;;  %v3609_v25 = vpack.c.bf16 %v1630_v17, %v1629_v14  ;;  %v3581_v39 = vpack.c.bf16 %v1600_v28, %v1599_v27  ;;  %v1603_v56 = vld [vmem:[%s5245_s6 + $0x60] sm:$0xff]  ;;  %v1653_v14 = vld [vmem:[%s5245_s6 + $0x1f0] sm:$0xff] }
 0x98a   :  { %3576 = vmatprep.subr.bf16.mxu1 %v3575_v6  ;;  %v3579_v26 = vpack.c.bf16 %v1616_v15, %v1615_v9  ;;  %v3613_v40 = vpack.c.bf16 %v1632_v2, %v1631_v29  ;;  %v3583_v41 = vpack.c.bf16 %v1618_v36, %v1617_v35  ;;  %v3615_v45 = vpack.c.bf16 %v1650_v38, %v1649_v37  ;;  %v1635_v59 = vld [vmem:[%s5245_s6 + $0x160] sm:$0xff]  ;;  %v1636_v60 = vld [vmem:[%s5245_s6 + $0x168] sm:$0xff]  ;;  %v1654_v9 = vld [vmem:[%s5245_s6 + $0x1f8] sm:$0xff] }
 0x98b   :  { %1537 = vmin.xlane.f32.xlu0 %v4721_v19  ;;  %v4725_v22 = vcvt.s32.f32 %v1554_v21  ;;  %v1647_v21 = vld [vmem:[%s5245_s6 + $0x1c0] sm:$0xff]  ;;  %3606 = vmatpush3.bf16.msra.mxu0 %v3605_v5  ;;  %v3585_v51 = vpack.c.bf16 %v1602_v43, %v1601_v42  ;;  %v3617_v53 = vpack.c.bf16 %v1634_v46, %v1633_v44  ;;  %v3587_v55 = vpack.c.bf16 %v1620_v48, %v1619_v47  ;;  %v1606_v15 = vld [vmem:[%s5245_s6 + $0x78] sm:$0xff]  ;;  %v1809_v36 = vld [vmem:[%s5246_s28 + $0x10] sm:$0xff] }
 0x98c   :  { %3608 = vmatprep.subr.bf16.mxu0 %v3607_v12  ;;  %v3611_v33 = vpack.c.bf16 %v1648_v23, %v1647_v21  ;;  %v3619_v58 = vpack.c.bf16 %v1652_v50, %v1651_v49  ;;  %v3589_v62 = vpack.c.bf16 %v1604_v57, %v1603_v56  ;;  %v3621_v3 = vpack.c.bf16 %v1636_v60, %v1635_v59  ;;  %v1622_v12 = vld [vmem:[%s5245_s6 + $0xf8] sm:$0xff]  ;;  %v1637_v23 = vld [vmem:[%s5245_s6 + $0x170] sm:$0xff]  ;;  %v1812_v46 = vld [vmem:[%s5246_s28 + $0x28] sm:$0xff] }
 0x98d   :  { %3578 = vmatpush3.bf16.msra.mxu1 %v3577_v24  ;;  %v1533_v4 = vand.u32 65535, %v4716_v16  ;;  %v1553_v5 = vand.u32 65535, %v4719_v18  ;;  %v1621_v16 = vld [vmem:[%s5245_s6 + $0xf0] sm:$0xff]  ;;  %v1638_v24 = vld [vmem:[%s5245_s6 + $0x178] sm:$0xff]  ;;  %v4071_v43 = vmov 1.0   ;;  %v1930_v47 = vld [vmem:[%s5247_s2] sm:$0xff] }
 0x98e   :  { %3580 = vmatprep.subr.bf16.mxu1 %v3579_v26  ;;  %v3591_v17 = vpack.c.bf16 %v1622_v12, %v1621_v16  ;;  %v1605_v18 = vld [vmem:[%s5245_s6 + $0x70] sm:$0xff]  ;;  %v1808_v26 = vld [vmem:[%s5246_s28 + $0x8] sm:$0xff]  ;;  %v1810_v37 = vld [vmem:[%s5246_s28 + $0x18] sm:$0xff] }
 0x98f   :  { %1557 = vmin.xlane.f32.xlu0 %v4725_v22  ;;  %3610 = vmatpush3.bf16.msra.mxu0 %v3609_v25  ;;  %v1535_v7 = vcvt.s32.f32 %v1533_v4  ;;  %v1555_v10 = vcvt.s32.f32 %v1553_v5  ;;  %v3593_v21 = vpack.c.bf16 %v1606_v15, %v1605_v18  ;;  %v3625_v25 = vpack.c.bf16 %v1638_v24, %v1637_v23  ;;  %v1931_v48 = vld [vmem:[%s5247_s2 + $0x8] sm:$0xff]  ;;  %v1932_v49 = vld [vmem:[%s5247_s2 + $0x10] sm:$0xff]  ;;  %v1937_v59 = vld [vmem:[%s5247_s2 + $0x38] sm:$0xff] }
 0x990   :  { %3612 = vmatprep.subr.bf16.mxu0 %v3611_v33  ;;  %v3644_v50 = vpack.c.bf16 %v1931_v48, %v1930_v47  ;;  %v1935_v56 = vld [vmem:[%s5247_s2 + $0x28] sm:$0xff]  ;;  %v1945_v16 = vld [vmem:[%s5247_s2 + $0x78] sm:$0xff]  ;;  %v1948_v18 = vld [vmem:[%s5247_s2 + $0x90] sm:$0xff] }
 0x991   :  { %3582 = vmatpush3.bf16.msra.mxu1 %v3581_v39  ;;  %v1949_v15 = vld [vmem:[%s5247_s2 + $0x98] sm:$0xff]  ;;  %v1951_v23 = vld [vmem:[%s5247_s2 + $0xa8] sm:$0xff] }
 0x992   :  { %3584 = vmatprep.subr.bf16.mxu1 %v3583_v41  ;;  %v3631_v41 = vpack.c.bf16 %v1810_v37, %v1809_v36 }
 0x993   :  { %3614 = vmatpush3.bf16.msra.mxu0 %v3613_v40 }
 0x994   :  { %3616 = vmatprep.subr.bf16.mxu0 %v3615_v45  ;;  %v1811_v45 = vld [vmem:[%s5246_s28 + $0x20] sm:$0xff] }
 0x995   :  { %3586 = vmatpush3.bf16.msra.mxu1 %v3585_v51  ;;  %v1933_v51 = vld [vmem:[%s5247_s2 + $0x18] sm:$0xff] }
 0x996   :  { %3588 = vmatprep.subr.bf16.mxu1 %v3587_v55  ;;  %v1934_v55 = vld [vmem:[%s5247_s2 + $0x20] sm:$0xff] }
 0x997   :  { %3618 = vmatpush3.bf16.msra.mxu0 %v3617_v53  ;;  %v3647_v53 = vpack.c.bf16 %v1933_v51, %v1932_v49  ;;  %v3650_v57 = vpack.c.bf16 %v1935_v56, %v1934_v55 }
 0x998   :  { %3620 = vmatprep.subr.bf16.mxu0 %v3619_v58  ;;  %v1936_v58 = vld [vmem:[%s5247_s2 + $0x30] sm:$0xff] }
 0x999   :  { %3590 = vmatpush3.bf16.msra.mxu1 %v3589_v62  ;;  %v3653_v60 = vpack.c.bf16 %v1937_v59, %v1936_v58  ;;  %v1938_v62 = vld [vmem:[%s5247_s2 + $0x40] sm:$0xff] }
 0x99a   :  { %3592 = vmatprep.subr.bf16.mxu1 %v3591_v17  ;;  %v1947_v17 = vld [vmem:[%s5247_s2 + $0x88] sm:$0xff] }
 0x99b   :  { %3622 = vmatpush3.bf16.msra.mxu0 %v3621_v3  ;;  %v1939_v3 = vld [vmem:[%s5247_s2 + $0x48] sm:$0xff] }
 0x99c   :  { %v3656_v4 = vpack.c.bf16 %v1939_v3, %v1938_v62 }
 0x99d   :  { %3594 = vmatpush3.bf16.msra.mxu1 %v3593_v21  ;;  %v1950_v21 = vld [vmem:[%s5247_s2 + $0xa0] sm:$0xff] }
 0x99e   :  { %v3674_v24 = vpack.c.bf16 %v1951_v23, %v1950_v21 }
 0xa18   :  { %v1538_v31 = vpop.xlane.xlu0 %1537 }
 0xa19   :  { %vm1539_vm0 = vcmp.eq.f32.partialorder %v4721_v19, %v1538_v31  ;;  %v3623_v19 = vpack.c.bf16 %v1654_v9, %v1653_v14  ;;  %v1544_v28 = vcvt.f32.s32 %v1538_v31  ;;  %v1940_v31 = vld [vmem:[%s5247_s2 + $0x50] sm:$0xff]  ;;  %v1946_v14 = vld [vmem:[%s5247_s2 + $0x80] sm:$0xff] }
 0xa1a   :  { %v1540_v6 = vsel %vm1539_vm0, %v1535_v7, inf  ;;  %v1941_v7 = vld [vmem:[%s5247_s2 + $0x58] sm:$0xff]  ;;  %v3668_v9 = vpack.c.bf16 %v1947_v17, %v1946_v14  ;;  %vm5248_vm0 = vcmp.lt.s32.totalorder %v4405_v32, 1  ;;  %v2098_v17 = vld [vmem:[%s5250_s15 + $0x30] sm:$0xff] }
 0xa1b   :  { %1541 = vmin.xlane.f32.xlu1 %v1540_v6  ;;  %3624 = vmatprep.subr.bf16.mxu0 %v3623_v19  ;;  %v1545_v2 = vshll.u32 %v1544_v28, 16  ;;  %v3659_v5 = vpack.c.bf16 %v1941_v7, %v1940_v31  ;;  %v1942_v6 = vld [vmem:[%s5247_s2 + $0x60] sm:$0xff]  ;;  %v3671_v19 = vpack.c.bf16 %v1949_v15, %v1948_v18 }
 0xa1c   :  { %v1558_v8 = vpop.xlane.xlu0 %1557  ;;  %3626 = vmatpush3.bf16.msra.mxu0 %v3625_v25  ;;  %v1952_v25 = vld [vmem:[%s5247_s2 + $0xb0] sm:$0xff]  ;;  %v2092_v7 = vld [vmem:[%s5250_s15] sm:$0xff] }
 0xa1d   :  { %vm1559_vm5 = vcmp.eq.f32.partialorder %v4725_v22, %v1558_v8  ;;  %3643 = vmatprep.subr.bf16.mxu0 %v4069_v30  ;;  %v1807_v22 = vld [vmem:[%s5246_s28] sm:$0xff]  ;;  %v1564_v29 = vcvt.f32.s32 %v1558_v8  ;;  %v1943_v8 = vld [vmem:[%s5247_s2 + $0x68] sm:$0xff] }
 0xa1e   :  { %v1560_v11 = vsel %vm1559_vm5, %v1555_v10, inf  ;;  %v3627_v27 = vpack.c.bf16 %v1808_v26, %v1807_v22  ;;  %v3662_v10 = vpack.c.bf16 %v1943_v8, %v1942_v6  ;;  %v1953_v22 = vld [vmem:[%s5247_s2 + $0xb8] sm:$0xff]  ;;  %vm5249_vm5 = vmmov %vm5248_vm0  ;;  %v2094_v8 = vld [vmem:[%s5250_s15 + $0x10] sm:$0xff] }
 0xa1f   :  { %1561 = vmin.xlane.f32.xlu0 %v1560_v11  ;;  %v1565_v39 = vshll.u32 %v1564_v29, 16  ;;  %v1944_v11 = vld [vmem:[%s5247_s2 + $0x70] sm:$0xff]  ;;  %v3677_v26 = vpack.c.bf16 %v1953_v22, %v1952_v25  ;;  %v3062_v15 = vld [vmem:[%s5251_s10] ss:$0 sm:$0xff] }
 0xa20   :  { %3628 = vmatprep.subr.bf16.mxu1 %v3627_v27  ;;  %v3665_v12 = vpack.c.bf16 %v1945_v16, %v1944_v11  ;;  %v2096_v16 = vld [vmem:[%s5250_s15 + $0x20] sm:$0xff] }
 0xaa8   :  { %v1542_v33 = vpop.xlane.xlu1 %1541 }
 0xaa9   :  { %v1543_v35 = vcvt.f32.s32 %v1542_v33 }
 0xaab   :  { %v1546_v38 = vadd.s32 %v1545_v2, %v1543_v35 }
 0xaac   :  { %v1562_v40 = vpop.xlane.xlu0 %1561 }
 0xaad   :  { %v1563_v42 = vcvt.f32.s32 %v1562_v40  ;;  %vm1568_vm12 = vcmp.eq.s32.totalorder %v4700_v63, %v1546_v38  ;;  %vm1570_vm13 = vcmp.eq.s32.totalorder %v4706_v1, %v1546_v38  ;;  %vm1567_vm14 = vcmp.eq.s32.totalorder %v4697_v61, %v1546_v38 }
 0xaae   :  { %3051 = vmatprep.mubr.msk.f32.mxu1 %vm1568_vm12, %v4071_v43  ;;  %3055 = vmatprep.mubr.msk.f32.mxu0 %vm1570_vm13, %v4071_v43  ;;  %vm1569_vm15 = vcmp.eq.s32.totalorder %v4703_v0, %v1546_v38  ;;  %vm1903_vm12 = vcmask 7168   ;;  %vm5258_vm13 = vmmov %vm5248_vm0 }
 0xaaf   :  { %v1566_v44 = vadd.s32 %v1565_v39, %v1563_v42  ;;  %3052 = vmatmul.mubr.msk.f32.vlgmr.msra.gmra.mrb[10].mxu1 %vm1567_vm14, %v4071_v43  ;;  %3056 = vmatmul.mubr.msk.f32.vlgmr.msra.gmra.mrb[18].mxu0 %vm1569_vm15, %v4071_v43  ;;  %vm5260_vm14 = vmmov %vm5248_vm0 }
 0xab0   :  { %3630 = vmatpush3.bf16.msra.mxu1 %v3627_v27  ;;  %3645 = vmatpush1.bf16.msra.mxu0 %v3644_v50  ;;  %vm5268_vm15 = vmmov %vm5248_vm0 }
 0xab1   :  { %vm1572_vm8 = vcmp.eq.s32.totalorder %v4700_v63, %v1566_v44  ;;  %vm1574_vm9 = vcmp.eq.s32.totalorder %v4706_v1, %v1566_v44  ;;  %vm1571_vm10 = vcmp.eq.s32.totalorder %v4697_v61, %v1566_v44  ;;  %vm1573_vm11 = vcmp.eq.s32.totalorder %v4703_v0, %v1566_v44  ;;  %3632 = vmatprep.subr.bf16.mxu1 %v3631_v41  ;;  %v1813_v61 = vld [vmem:[%s5246_s28 + $0x30] sm:$0xff]  ;;  %v1814_v1 = vld [vmem:[%s5246_s28 + $0x38] sm:$0xff] }
 0xab2   :  { %3053 = vmatprep.mubr.msk.f32.mxu1 %vm1572_vm8, %v4071_v43  ;;  %3057 = vmatprep.mubr.msk.f32.mxu0 %vm1574_vm9, %v4071_v43  ;;  %v3635_v63 = vpack.c.bf16 %v1812_v46, %v1811_v45  ;;  %v3639_v0 = vpack.c.bf16 %v1814_v1, %v1813_v61  ;;  %vm5270_vm8 = vmmov %vm5248_vm0 }
 0xab3   :  { %3054 = vmatmul.mubr.msk.f32.gmra.mrb[12].mxu1 %vm1571_vm10, %v4071_v43  ;;  %3058 = vmatmul.mubr.msk.f32.gmra.mrb[20].mxu0 %vm1573_vm11, %v4071_v43 }
 0xab4   :  { %3634 = vmatpush3.bf16.msra.mxu1 %v3631_v41  ;;  %3646 = vmatprep.subr.bf16.mxu0 %v4069_v30 }
 0xab5   :  { %3636 = vmatprep.subr.bf16.mxu1 %v3635_v63  ;;  %3648 = vmatpush1.bf16.msra.mxu0 %v3647_v53 }
 0xab6   :  { %3649 = vmatprep.subr.bf16.mxu0 %v4069_v30 }
 0xab8   :  { %3638 = vmatpush3.bf16.msra.mxu1 %v3635_v63 }
 0xab9   :  { %3640 = vmatprep.subr.bf16.mxu1 %v3639_v0  ;;  %3651 = vmatpush1.bf16.msra.mxu0 %v3650_v57 }
 0xaba   :  { %3652 = vmatprep.subr.bf16.mxu0 %v4069_v30 }
 0xabc   :  { %3642 = vmatpush3.bf16.msra.mxu1 %v3639_v0 }
 0xabd   :  { %3654 = vmatpush1.bf16.msra.mxu0 %v3653_v60  ;;  %v3059_v60 = vld [vmem:[#allocation2] ss:$0 sm:$0xff] }
 0xabe   :  { %3655 = vmatprep.subr.bf16.mxu0 %v4069_v30 }
 0xac1   :  { %3657 = vmatpush1.bf16.msra.mxu0 %v3656_v4 }
 0xac2   :  { %3658 = vmatprep.subr.bf16.mxu0 %v4069_v30 }
 0xac5   :  { %3660 = vmatpush1.bf16.msra.mxu0 %v3659_v5  ;;  %v2093_v5 = vld [vmem:[%s5250_s15 + $0x8] sm:$0xff] }
 0xac6   :  { %3661 = vmatprep.subr.bf16.mxu0 %v4069_v30  ;;  %v3679_v6 = vpack.c.bf16 %v2093_v5, %v2092_v7 }
 0xac8   :  { %3680 = vmatprep.subr.bf16.mxu1 %v3679_v6 }
 0xac9   :  { %3663 = vmatpush1.bf16.msra.mxu0 %v3662_v10  ;;  %v2095_v10 = vld [vmem:[%s5250_s15 + $0x18] sm:$0xff] }
 0xaca   :  { %3664 = vmatprep.subr.bf16.mxu0 %v4069_v30  ;;  %v3683_v11 = vpack.c.bf16 %v2095_v10, %v2094_v8  ;;  %v2262_v10 = vld [vmem:[%s5254_s30] sm:$0xff] }
 0xacd   :  { %3666 = vmatpush1.bf16.msra.mxu0 %v3665_v12  ;;  %v2097_v12 = vld [vmem:[%s5250_s15 + $0x28] sm:$0xff] }
 0xace   :  { %3667 = vmatprep.subr.bf16.mxu0 %v4069_v30  ;;  %v3687_v14 = vpack.c.bf16 %v2097_v12, %v2096_v16  ;;  %v2264_v16 = vld [vmem:[%s5254_s30 + $0x10] sm:$0xff] }
 0xad1   :  { %3669 = vmatpush1.bf16.msra.mxu0 %v3668_v9  ;;  %v2099_v9 = vld [vmem:[%s5250_s15 + $0x38] sm:$0xff] }
 0xad2   :  { %3670 = vmatprep.subr.bf16.mxu0 %v4069_v30  ;;  %v3691_v18 = vpack.c.bf16 %v2099_v9, %v2098_v17  ;;  %v2266_v9 = vld [vmem:[%s5254_s30 + $0x20] sm:$0xff] }
 0xad5   :  { %3672 = vmatpush1.bf16.msra.mxu0 %v3671_v19 }
 0xad6   :  { %3673 = vmatprep.subr.bf16.mxu0 %v4069_v30 }
 0xad9   :  { %3675 = vmatpush1.bf16.msra.mxu0 %v3674_v24 }
 0xada   :  { %3676 = vmatprep.subr.bf16.mxu0 %v4069_v30 }
 0xadd   :  { %3678 = vmatpush1.bf16.msra.mxu0 %v3677_v26 }
 0xb82   :  { %v3174_v27 = vpop.f32.mrb[10].mxu1  ;;  %v3212_v28 = vpop.f32.mrb[18].mxu0 }
 0xb83   :  { %v3175_v29 = vpop.f32.mrb[11].mxu1  ;;  %v3213_v33 = vpop.f32.mrb[19].mxu0 }
 0xb84   :  { %v3176_v2 = vadd.f32 %v3175_v29, %v3174_v27  ;;  %v3214_v35 = vadd.f32 %v3213_v33, %v3212_v28 }
 0xb86   :  { %v4848_v36 = vadd.f32 %v3214_v35, %v3176_v2  ;;  %v3177_v37 = vpop.f32.mrb[12].mxu1  ;;  %v3215_v38 = vpop.f32.mrb[20].mxu0 }
 0xb87   :  { %v3178_v39 = vpop.f32.mrb[13].mxu1  ;;  %v3216_v40 = vpop.f32.mrb[21].mxu0 }
 0xb88   :  { %1805 = vst.msk [vmem:[#allocation9] sm:$0xff] %vm385_vm1, %v4848_v36  ;;  %v3179_v41 = vadd.f32 %v3178_v39, %v3177_v37  ;;  %v3217_v42 = vadd.f32 %v3216_v40, %v3215_v38  ;;  %3350 = vmatprep.mubr.msk.f32.mxu1 %vm385_vm1, %v4848_v36  ;;  %v1906_v43 = vmax.f32 %v4848_v36, 0.0 }
 0xb8a   :  { %v4855_v44 = vadd.f32 %v3217_v42, %v3179_v41  ;;  %1922 = vrot.lane.b32.xlu1 %v1906_v43, %s4068_s5  ;;  %v1908_v46 = vrot.slane %v1906_v43, 7  ;;  %v1914_v63 = vrot.slane %v1906_v43, 1 }
 0xb8c   :  { %1806 = vst.msk [vmem:[#allocation9 + $0x8] sm:$0xff] %vm385_vm1, %v4855_v44  ;;  %3351 = vmatmul.mubr.msk.f32.vlgmr.msra.gmra.mrb[14].mxu1 %vm385_vm1, %v4855_v44  ;;  %v1907_v45 = vmax.f32 %v4855_v44, 0.0 }
 0xb8d   :  { %3682 = vmatpush3.bf16.msra.mxu1 %v3679_v6 }
 0xb8e   :  { %1924 = vrot.lane.b32.xlu0 %v1907_v45, %s4068_s5  ;;  %v1909_v61 = vrot.slane %v1907_v45, 7  ;;  %v1915_v1 = vrot.slane %v1907_v45, 1  ;;  %3684 = vmatprep.subr.bf16.mxu1 %v3683_v11 }
 0xb90   :  { %v1916_v0 = vsel %vm460_vm3, %v1914_v63, %v1915_v1  ;;  %v1911_v47 = vsel %vm5248_vm0, %v1909_v61, %v1908_v46  ;;  %v1917_v48 = vsel %vm460_vm3, %v1915_v1, %v1914_v63  ;;  %v1910_v49 = vsel %vm5249_vm5, %v1908_v46, %v1909_v61 }
 0xb91   :  { %v1918_v50 = vsel %vm4420_vm2, 0.0, %v1916_v0  ;;  %v1912_v53 = vsel %vm4444_vm6, 0.0, %v1911_v47  ;;  %v1919_v56 = vsel %vm4425_vm4, 0.0, %v1917_v48  ;;  %v1913_v58 = vsel %vm4452_vm7, 0.0, %v1910_v49  ;;  %3686 = vmatpush3.bf16.msra.mxu1 %v3683_v11  ;;  %v2263_v11 = vld [vmem:[%s5254_s30 + $0x8] sm:$0xff] }
 0xb92   :  { %3063 = vmatprep.mubr.msk.f32.mxu0 %vm385_vm1, %v1918_v50  ;;  %3688 = vmatprep.subr.bf16.mxu1 %v3687_v14  ;;  %v3696_v12 = vpack.c.bf16 %v2263_v11, %v2262_v10 }
 0xb95   :  { %3690 = vmatpush3.bf16.msra.mxu1 %v3687_v14  ;;  %v2265_v14 = vld [vmem:[%s5254_s30 + $0x18] sm:$0xff] }
 0xb96   :  { %3692 = vmatprep.subr.bf16.mxu1 %v3691_v18  ;;  %v3699_v17 = vpack.c.bf16 %v2265_v14, %v2264_v16 }
 0xb99   :  { %3694 = vmatpush3.bf16.msra.mxu1 %v3691_v18  ;;  %v2267_v18 = vld [vmem:[%s5254_s30 + $0x28] sm:$0xff] }
 0xb9a   :  { %3695 = vmatprep.subr.bf16.mxu1 %v4069_v30 }
 0xbfc   :  { %v1923_v51 = vpop.permute.xlu1 %1922 }
 0xbfd   :  { %v1928_v55 = vsel %vm385_vm1, %v1912_v53, %v1923_v51 }
 0xbfe   :  { %2032 = vmatmul.mubr.f32.vlgmr.msra.gmra.mrb[22].mxu0 %v1928_v55 }
 0xbff   :  { %3064 = vmatprep.mubr.msk.f32.mxu0 %vm385_vm1, %v1919_v56 }
 0xc00   :  { %v1925_v57 = vpop.permute.xlu0 %1924 }
 0xc01   :  { %v1929_v59 = vsel %vm385_vm1, %v1913_v58, %v1925_v57  ;;  %v2043_v58 = vld [vmem:[%s5253_s11] sm:$0x1] }
 0xc02   :  { %2037 = vmatmul.mubr.f32.gmra.mrb[24].mxu0 %v1929_v59 }
 0xc5f   :  { %v3352_v62 = vpop.f32.mrb[14].mxu1 }
 0xc60   :  { %v1900_v3 = vadd.f32 %v3352_v62, %v3059_v60  ;;  %v1894_v4 = vpop.f32.mrb[15].mxu1 }
 0xc61   :  { %v1895_v31 = vadd.f32 %v3059_v60, %v1894_v4 }
 0xc62   :  { %1905 = vst.msk [vmem:[%s4342_s1 + $0x8] sm:$0xff] %vm1903_vm12, %v1900_v3 }
 0xc63   :  { %1904 = vst.msk [vmem:[%s4342_s1] sm:$0xff] %vm1903_vm12, %v1895_v31  ;;  %s5252_s1 = sld [smem:[#allocation32_spill]] }
 0xc69   :  { %v2042_v55 = vld [vmem:[%s5252_s1] sm:$0x1] }
 0xcd1   :  { %v2033_v19 = vpop.f32.mrb[22].mxu0 }
 0xcd2   :  { %v2034_v21 = vadd.f32 %v3062_v15, %v2033_v19  ;;  %v2035_v23 = vpop.f32.mrb[23].mxu0  ;;  %v2268_v19 = vld [vmem:[%s5254_s30 + $0x30] sm:$0xff] }
 0xcd4   :  { %v2053_v25 = vmul.f32 %v2034_v21, %v2034_v21  ;;  %v2044_v27 = vsel %vm385_vm1, %v2034_v21, 0.0 }
 0xcd5   :  { %v2038_v24 = vpop.f32.mrb[24].mxu0 }
 0xcd6   :  { %v2039_v22 = vadd.f32 %v3062_v15, %v2038_v24  ;;  %v2040_v26 = vpop.f32.mrb[25].mxu0  ;;  %v2055_v2 = vsel %vm385_vm1, %v2053_v25, 0.0  ;;  %v3702_v15 = vpack.c.bf16 %v2267_v18, %v2266_v9  ;;  %v2270_v24 = vld [vmem:[%s5254_s30 + $0x40] sm:$0xff]  ;;  %v2271_v25 = vld [vmem:[%s5254_s30 + $0x48] sm:$0xff] }
 0xcd7   :  { %v2272_v26 = vld [vmem:[%s5254_s30 + $0x50] sm:$0xff] }
 0xcd8   :  { %v2045_v28 = vsel %vm385_vm1, %v2039_v22, 0.0  ;;  %v2054_v29 = vmul.f32 %v2039_v22, %v2039_v22 }
 0xcd9   :  { %v2046_v33 = vadd.f32 %v2045_v28, %v2044_v27  ;;  %v2273_v27 = vld [vmem:[%s5254_s30 + $0x58] sm:$0xff] }
 0xcda   :  { %v2056_v35 = vsel %vm385_vm1, %v2054_v29, 0.0  ;;  %v3711_v28 = vpack.c.bf16 %v2273_v27, %v2272_v26  ;;  %v2274_v29 = vld [vmem:[%s5254_s30 + $0x60] sm:$0xff] }
 0xcdb   :  { %v2047_v37 = vrot.slane %v2046_v33, 4  ;;  %v2057_v38 = vadd.f32 %v2056_v35, %v2055_v2  ;;  %v2276_v35 = vld [vmem:[%s5254_s30 + $0x70] sm:$0xff]  ;;  %v2189_v26 = vld [vmem:[%s5257_s18] sm:$0x1] }
 0xcdd   :  { %v2048_v39 = vadd.f32 %v2047_v37, %v2046_v33  ;;  %v2058_v40 = vrot.slane %v2057_v38, 4  ;;  %v2275_v33 = vld [vmem:[%s5254_s30 + $0x68] sm:$0xff]  ;;  %v2277_v37 = vld [vmem:[%s5254_s30 + $0x78] sm:$0xff] }
 0xcde   :  { %v3714_v2 = vpack.c.bf16 %v2275_v33, %v2274_v29 }
 0xcdf   :  { %v2049_v41 = vrot.slane %v2048_v39, 2  ;;  %v2059_v42 = vadd.f32 %v2058_v40, %v2057_v38  ;;  %v3717_v38 = vpack.c.bf16 %v2277_v37, %v2276_v35  ;;  %v2279_v40 = vld [vmem:[%s5254_s30 + $0x88] sm:$0xff] }
 0xce1   :  { %v2050_v43 = vadd.f32 %v2049_v41, %v2048_v39  ;;  %v2060_v45 = vrot.slane %v2059_v42, 2  ;;  %v2278_v39 = vld [vmem:[%s5254_s30 + $0x80] sm:$0xff] }
 0xce2   :  { %v3720_v41 = vpack.c.bf16 %v2279_v40, %v2278_v39 }
 0xce3   :  { %v2051_v46 = vrot.slane %v2050_v43, 1  ;;  %v2061_v63 = vadd.f32 %v2060_v45, %v2059_v42  ;;  %v2280_v42 = vld [vmem:[%s5254_s30 + $0x90] sm:$0xff] }
 0xce5   :  { %v2052_v61 = vadd.f32 %v2051_v46, %v2050_v43  ;;  %v2062_v1 = vrot.slane %v2061_v63, 1  ;;  %v2281_v43 = vld [vmem:[%s5254_s30 + $0x98] sm:$0xff]  ;;  %v2282_v46 = vld [vmem:[%s5254_s30 + $0xa0] sm:$0xff] }
 0xce6   :  { %v3723_v45 = vpack.c.bf16 %v2281_v43, %v2280_v42 }
 0xce7   :  { %v2063_v0 = vadd.f32 %v2062_v1, %v2061_v63  ;;  %v2064_v47 = vmul.f32 0.0625, %v2052_v61  ;;  %v2283_v63 = vld [vmem:[%s5254_s30 + $0xa8] sm:$0xff]  ;;  %v2284_v1 = vld [vmem:[%s5254_s30 + $0xb0] sm:$0xff] }
 0xce8   :  { %v3726_v61 = vpack.c.bf16 %v2283_v63, %v2282_v46 }
 0xce9   :  { %v2065_v48 = vmul.f32 0.0625, %v2063_v0  ;;  %v2066_v49 = vmul.f32 %v2064_v47, %v2064_v47  ;;  %v2285_v0 = vld [vmem:[%s5254_s30 + $0xb8] sm:$0xff] }
 0xceb   :  { %v2067_v50 = vsub.f32 %v2065_v48, %v2066_v49  ;;  %v3065_v48 = vld [vmem:[%s5255_s16] ss:$0 sm:$0xff] }
 0xced   :  { %v2068_v51 = vmax.f32 %v2067_v50, 0.0 }
 0xcef   :  { %v2069_v53 = vadd.f32 1e-05, %v2068_v51 }
 0xcf1   :  { %3903 = vrsqrt.f32 %v2069_v53 }
 0xcfb   :  { %v3904_v56 = vpop.eup %3903 }
 0xcfc   :  { %v2071_v57 = vmul.f32 %v3904_v56, %v2042_v55 }
 0xcfe   :  { %v2072_v59 = vmul.f32 %v2071_v57, %v2064_v47  ;;  %v2078_v60 = vrot.slane %v2071_v57, %v4409_v34  ;;  %v3729_v47 = vpack.c.bf16 %v2285_v0, %v2284_v1 }
 0xd00   :  { %v2073_v62 = vsub.f32 %v2043_v58, %v2072_v59  ;;  %v2080_v3 = vmul.f32 %v2078_v60, %v2034_v21  ;;  %v2081_v4 = vmul.f32 %v2078_v60, %v2039_v22  ;;  %v2269_v21 = vld [vmem:[%s5254_s30 + $0x38] sm:$0xff]  ;;  %v3708_v22 = vpack.c.bf16 %v2271_v25, %v2270_v24  ;;  %v2188_v24 = vld [vmem:[%s5256_s0] sm:$0x1] }
 0xd01   :  { %v3705_v23 = vpack.c.bf16 %v2269_v21, %v2268_v19 }
 0xd02   :  { %v2086_v31 = vrot.slane %v2073_v62, %v4409_v34 }
 0xd04   :  { %v2089_v7 = vadd.f32 %v2086_v31, %v2081_v4  ;;  %v2088_v5 = vadd.f32 %v2086_v31, %v2080_v3 }
 0xd06   :  { %v2091_v6 = vmax.f32 %v2089_v7, 0.0  ;;  %v2090_v8 = vmax.f32 %v2088_v5, 0.0 }
 0xd08   :  { %3369 = vmatprep.mubr.msk.f32.mxu1 %vm385_vm1, %v2090_v8 }
 0xd09   :  { %3370 = vmatmul.mubr.msk.f32.vlgmr.msra.gmra.mrb[16].mxu1 %vm385_vm1, %v2091_v6 }
 0xd0a   :  { %3697 = vmatpush1.bf16.msra.mxu1 %v3696_v12 }
 0xd0b   :  { %3698 = vmatprep.subr.bf16.mxu1 %v4069_v30 }
 0xd0e   :  { %3700 = vmatpush1.bf16.msra.mxu1 %v3699_v17 }
 0xd0f   :  { %3701 = vmatprep.subr.bf16.mxu1 %v4069_v30 }
 0xd12   :  { %3703 = vmatpush1.bf16.msra.mxu1 %v3702_v15 }
 0xd13   :  { %3704 = vmatprep.subr.bf16.mxu1 %v4069_v30 }
 0xd16   :  { %3706 = vmatpush1.bf16.msra.mxu1 %v3705_v23 }
 0xd17   :  { %3707 = vmatprep.subr.bf16.mxu1 %v4069_v30 }
 0xd1a   :  { %3709 = vmatpush1.bf16.msra.mxu1 %v3708_v22 }
 0xd1b   :  { %3710 = vmatprep.subr.bf16.mxu1 %v4069_v30 }
 0xd1e   :  { %3712 = vmatpush1.bf16.msra.mxu1 %v3711_v28 }
 0xd1f   :  { %3713 = vmatprep.subr.bf16.mxu1 %v4069_v30 }
 0xd22   :  { %3715 = vmatpush1.bf16.msra.mxu1 %v3714_v2 }
 0xd23   :  { %3716 = vmatprep.subr.bf16.mxu1 %v4069_v30 }
 0xd26   :  { %3718 = vmatpush1.bf16.msra.mxu1 %v3717_v38 }
 0xd27   :  { %3719 = vmatprep.subr.bf16.mxu1 %v4069_v30 }
 0xd2a   :  { %3721 = vmatpush1.bf16.msra.mxu1 %v3720_v41 }
 0xd2b   :  { %3722 = vmatprep.subr.bf16.mxu1 %v4069_v30 }
 0xd2e   :  { %3724 = vmatpush1.bf16.msra.mxu1 %v3723_v45 }
 0xd2f   :  { %3725 = vmatprep.subr.bf16.mxu1 %v4069_v30 }
 0xd32   :  { %3727 = vmatpush1.bf16.msra.mxu1 %v3726_v61 }
 0xd33   :  { %3728 = vmatprep.subr.bf16.mxu1 %v4069_v30 }
 0xd36   :  { %3730 = vmatpush1.bf16.msra.mxu1 %v3729_v47 }
 0xddc   :  { %v3371_v49 = vpop.f32.mrb[16].mxu1 }
 0xddd   :  { %v2185_v50 = vadd.f32 %v3371_v49, %v3065_v48  ;;  %v2179_v51 = vpop.f32.mrb[17].mxu1 }
 0xdde   :  { %v2180_v53 = vadd.f32 %v3065_v48, %v2179_v51 }
 0xddf   :  { %v2191_v55 = vsel %vm385_vm1, %v2185_v50, 0.0  ;;  %v2200_v56 = vmul.f32 %v2185_v50, %v2185_v50 }
 0xde0   :  { %v2190_v57 = vsel %vm385_vm1, %v2180_v53, 0.0  ;;  %v2199_v58 = vmul.f32 %v2180_v53, %v2180_v53 }
 0xde1   :  { %v2202_v59 = vsel %vm385_vm1, %v2200_v56, 0.0  ;;  %v2192_v60 = vadd.f32 %v2191_v55, %v2190_v57  ;;  %v2424_v56 = vld [vmem:[%s5259_s12] sm:$0xff]  ;;  %v2425_v57 = vld [vmem:[%s5259_s12 + $0x8] sm:$0xff] }
 0xde2   :  { %v2201_v62 = vsel %vm385_vm1, %v2199_v58, 0.0  ;;  %v3731_v58 = vpack.c.bf16 %v2425_v57, %v2424_v56 }
 0xde3   :  { %v2193_v3 = vrot.slane %v2192_v60, 4  ;;  %v2203_v4 = vadd.f32 %v2202_v59, %v2201_v62  ;;  %v2426_v59 = vld [vmem:[%s5259_s12 + $0x10] sm:$0xff] }
 0xde4   :  { %3732 = vmatprep.subr.bf16.mxu0 %v3731_v58 }
 0xde5   :  { %v2194_v31 = vadd.f32 %v2193_v3, %v2192_v60  ;;  %v2204_v7 = vrot.slane %v2203_v4, 4  ;;  %3734 = vmatpush3.bf16.msra.mxu0 %v3731_v58  ;;  %v2427_v60 = vld [vmem:[%s5259_s12 + $0x18] sm:$0xff]  ;;  %v2428_v3 = vld [vmem:[%s5259_s12 + $0x20] sm:$0xff] }
 0xde6   :  { %v3735_v62 = vpack.c.bf16 %v2427_v60, %v2426_v59  ;;  %v2594_v60 = vld [vmem:[%s5264_s13] sm:$0xff] }
 0xde7   :  { %v2195_v5 = vrot.slane %v2194_v31, 2  ;;  %v2205_v6 = vadd.f32 %v2204_v7, %v2203_v4  ;;  %v2429_v4 = vld [vmem:[%s5259_s12 + $0x28] sm:$0xff]  ;;  %v2430_v7 = vld [vmem:[%s5259_s12 + $0x30] sm:$0xff] }
 0xde8   :  { %3736 = vmatprep.subr.bf16.mxu0 %v3735_v62 }
 0xde9   :  { %v2196_v8 = vadd.f32 %v2195_v5, %v2194_v31  ;;  %v2206_v10 = vrot.slane %v2205_v6, 2  ;;  %3738 = vmatpush3.bf16.msra.mxu0 %v3735_v62  ;;  %v3739_v31 = vpack.c.bf16 %v2429_v4, %v2428_v3  ;;  %v2431_v5 = vld [vmem:[%s5259_s12 + $0x38] sm:$0xff]  ;;  %v2595_v62 = vld [vmem:[%s5264_s13 + $0x8] sm:$0xff]  ;;  %v2596_v3 = vld [vmem:[%s5264_s13 + $0x10] sm:$0xff] }
 0xdea   :  { %v3748_v4 = vpack.c.bf16 %v2595_v62, %v2594_v60 }
 0xdeb   :  { %v2197_v11 = vrot.slane %v2196_v8, 1  ;;  %v2207_v16 = vadd.f32 %v2206_v10, %v2205_v6  ;;  %3740 = vmatprep.subr.bf16.mxu0 %v3739_v31  ;;  %v3743_v6 = vpack.c.bf16 %v2431_v5, %v2430_v7  ;;  %v2598_v5 = vld [vmem:[%s5264_s13 + $0x20] sm:$0xff] }
 0xded   :  { %v2198_v12 = vadd.f32 %v2197_v11, %v2196_v8  ;;  %v2208_v14 = vrot.slane %v2207_v16, 1  ;;  %3742 = vmatpush3.bf16.msra.mxu0 %v3739_v31  ;;  %v3068_v8 = vld [vmem:[%s5261_s22] ss:$0 sm:$0xff]  ;;  %v2597_v31 = vld [vmem:[%s5264_s13 + $0x18] sm:$0xff] }
 0xdee   :  { %3744 = vmatprep.subr.bf16.mxu0 %v3743_v6  ;;  %v3751_v7 = vpack.c.bf16 %v2597_v31, %v2596_v3 }
 0xdef   :  { %v2209_v17 = vadd.f32 %v2208_v14, %v2207_v16  ;;  %v2210_v9 = vmul.f32 0.0625, %v2198_v12 }
 0xdf1   :  { %v2211_v18 = vmul.f32 0.0625, %v2209_v17  ;;  %v2212_v15 = vmul.f32 %v2210_v9, %v2210_v9  ;;  %3746 = vmatpush3.bf16.msra.mxu0 %v3743_v6  ;;  %v2599_v6 = vld [vmem:[%s5264_s13 + $0x28] sm:$0xff] }
 0xdf2   :  { %3747 = vmatprep.subr.bf16.mxu0 %v4069_v30 }
 0xdf3   :  { %v2213_v19 = vsub.f32 %v2211_v18, %v2212_v15 }
 0xdf5   :  { %v2214_v21 = vmax.f32 %v2213_v19, 0.0 }
 0xdf7   :  { %v2215_v23 = vadd.f32 1e-05, %v2214_v21 }
 0xdf9   :  { %3905 = vrsqrt.f32 %v2215_v23 }
 0xe03   :  { %v3906_v25 = vpop.eup %3905 }
 0xe04   :  { %v2217_v22 = vmul.f32 %v3906_v25, %v2188_v24 }
 0xe06   :  { %v2218_v27 = vmul.f32 %v2217_v22, %v2210_v9  ;;  %v2224_v28 = vrot.slane %v2217_v22, %v4409_v34 }
 0xe08   :  { %v2219_v29 = vsub.f32 %v2189_v26, %v2218_v27  ;;  %v2226_v33 = vmul.f32 %v2224_v28, %v2180_v53  ;;  %v2227_v2 = vmul.f32 %v2224_v28, %v2185_v50 }
 0xe0a   :  { %v2232_v35 = vrot.slane %v2219_v29, %v4409_v34 }
 0xe0c   :  { %v2234_v37 = vadd.f32 %v2232_v35, %v2226_v33  ;;  %v2235_v38 = vadd.f32 %v2232_v35, %v2227_v2 }
 0xe0e   :  { %v4951_v39 = vadd.f32 %v2234_v37, %v4848_v36  ;;  %v4954_v40 = vadd.f32 %v2235_v38, %v4855_v44 }
 0xe10   :  { %v2238_v41 = vmax.f32 %v4951_v39, 0.0  ;;  %v2239_v42 = vmax.f32 %v4954_v40, 0.0 }
 0xe12   :  { %2254 = vrot.lane.b32.xlu1 %v2238_v41, %s4068_s5  ;;  %v2240_v43 = vrot.slane %v2238_v41, 7  ;;  %v2246_v45 = vrot.slane %v2238_v41, 1  ;;  %v2241_v46 = vrot.slane %v2239_v42, 7  ;;  %v2247_v63 = vrot.slane %v2239_v42, 1 }
 0xe14   :  { %v2248_v61 = vsel %vm460_vm3, %v2246_v45, %v2247_v63  ;;  %v2243_v36 = vsel %vm5258_vm13, %v2241_v46, %v2240_v43  ;;  %v2249_v44 = vsel %vm460_vm3, %v2247_v63, %v2246_v45  ;;  %v2242_v1 = vsel %vm5260_vm14, %v2240_v43, %v2241_v46 }
 0xe15   :  { %v2250_v0 = vsel %vm4420_vm2, 0.0, %v2248_v61  ;;  %v2244_v48 = vsel %vm4444_vm6, 0.0, %v2243_v36  ;;  %v2251_v50 = vsel %vm4425_vm4, 0.0, %v2249_v44  ;;  %v2245_v53 = vsel %vm4452_vm7, 0.0, %v2242_v1  ;;  %v2374_v44 = vld [vmem:[%s5262_s26] sm:$0x1] }
 0xe16   :  { %2256 = vrot.lane.b32.xlu1 %v2239_v42, %s4068_s5  ;;  %3069 = vmatprep.mubr.msk.f32.mxu1 %vm385_vm1, %v2250_v0 }
 0xe84   :  { %v2255_v47 = vpop.permute.xlu1 %2254 }
 0xe85   :  { %v2260_v49 = vsel %vm385_vm1, %v2244_v48, %v2255_v47  ;;  %v2375_v47 = vld [vmem:[%s5263_s9] sm:$0x1] }
 0xe86   :  { %2364 = vmatmul.mubr.f32.vlgmr.msra.gmra.mrb[18].mxu1 %v2260_v49 }
 0xe87   :  { %3070 = vmatprep.mubr.msk.f32.mxu1 %vm385_vm1, %v2251_v50 }
 0xe88   :  { %v2257_v51 = vpop.permute.xlu1 %2256 }
 0xe89   :  { %v2261_v55 = vsel %vm385_vm1, %v2245_v53, %v2257_v51 }
 0xe8a   :  { %2369 = vmatmul.mubr.f32.gmra.mrb[20].mxu1 %v2261_v55 }
 0xf59   :  { %v2365_v10 = vpop.f32.mrb[18].mxu1 }
 0xf5a   :  { %v2366_v11 = vadd.f32 %v3068_v8, %v2365_v10  ;;  %v2367_v16 = vpop.f32.mrb[19].mxu1  ;;  %v2600_v10 = vld [vmem:[%s5264_s13 + $0x30] sm:$0xff] }
 0xf5c   :  { %v2385_v14 = vmul.f32 %v2366_v11, %v2366_v11  ;;  %v2376_v18 = vsel %vm385_vm1, %v2366_v11, 0.0 }
 0xf5d   :  { %v2370_v12 = vpop.f32.mrb[20].mxu1 }
 0xf5e   :  { %v2371_v17 = vadd.f32 %v3068_v8, %v2370_v12  ;;  %v2372_v9 = vpop.f32.mrb[21].mxu1  ;;  %v2387_v23 = vsel %vm385_vm1, %v2385_v14, 0.0  ;;  %v3754_v8 = vpack.c.bf16 %v2599_v6, %v2598_v5  ;;  %v2602_v12 = vld [vmem:[%s5264_s13 + $0x40] sm:$0xff]  ;;  %v2603_v14 = vld [vmem:[%s5264_s13 + $0x48] sm:$0xff] }
 0xf5f   :  { %v2604_v9 = vld [vmem:[%s5264_s13 + $0x50] sm:$0xff] }
 0xf60   :  { %v2377_v15 = vsel %vm385_vm1, %v2371_v17, 0.0  ;;  %v2386_v19 = vmul.f32 %v2371_v17, %v2371_v17 }
 0xf61   :  { %v2378_v21 = vadd.f32 %v2377_v15, %v2376_v18  ;;  %v2605_v18 = vld [vmem:[%s5264_s13 + $0x58] sm:$0xff] }
 0xf62   :  { %v2388_v24 = vsel %vm385_vm1, %v2386_v19, 0.0  ;;  %v3763_v15 = vpack.c.bf16 %v2605_v18, %v2604_v9  ;;  %v2606_v19 = vld [vmem:[%s5264_s13 + $0x60] sm:$0xff] }
 0xf63   :  { %v2379_v25 = vrot.slane %v2378_v21, 4  ;;  %v2389_v22 = vadd.f32 %v2388_v24, %v2387_v23  ;;  %v2608_v24 = vld [vmem:[%s5264_s13 + $0x70] sm:$0xff] }
 0xf65   :  { %v2380_v26 = vadd.f32 %v2379_v25, %v2378_v21  ;;  %v2390_v27 = vrot.slane %v2389_v22, 4  ;;  %v2607_v21 = vld [vmem:[%s5264_s13 + $0x68] sm:$0xff]  ;;  %v2609_v25 = vld [vmem:[%s5264_s13 + $0x78] sm:$0xff] }
 0xf66   :  { %v3766_v23 = vpack.c.bf16 %v2607_v21, %v2606_v19 }
 0xf67   :  { %v2381_v28 = vrot.slane %v2380_v26, 2  ;;  %v2391_v29 = vadd.f32 %v2390_v27, %v2389_v22  ;;  %v3769_v22 = vpack.c.bf16 %v2609_v25, %v2608_v24  ;;  %v2611_v27 = vld [vmem:[%s5264_s13 + $0x88] sm:$0xff] }
 0xf69   :  { %v2382_v33 = vadd.f32 %v2381_v28, %v2380_v26  ;;  %v2392_v2 = vrot.slane %v2391_v29, 2  ;;  %v2610_v26 = vld [vmem:[%s5264_s13 + $0x80] sm:$0xff] }
 0xf6a   :  { %v3772_v28 = vpack.c.bf16 %v2611_v27, %v2610_v26 }
 0xf6b   :  { %v2383_v35 = vrot.slane %v2382_v33, 1  ;;  %v2393_v37 = vadd.f32 %v2392_v2, %v2391_v29  ;;  %v2612_v29 = vld [vmem:[%s5264_s13 + $0x90] sm:$0xff] }
 0xf6d   :  { %v2384_v38 = vadd.f32 %v2383_v35, %v2382_v33  ;;  %v2394_v41 = vrot.slane %v2393_v37, 1  ;;  %v2613_v33 = vld [vmem:[%s5264_s13 + $0x98] sm:$0xff]  ;;  %v2614_v35 = vld [vmem:[%s5264_s13 + $0xa0] sm:$0xff] }
 0xf6e   :  { %v3775_v2 = vpack.c.bf16 %v2613_v33, %v2612_v29 }
 0xf6f   :  { %v2395_v42 = vadd.f32 %v2394_v41, %v2393_v37  ;;  %v2396_v43 = vmul.f32 0.0625, %v2384_v38  ;;  %v2615_v37 = vld [vmem:[%s5264_s13 + $0xa8] sm:$0xff]  ;;  %v2616_v41 = vld [vmem:[%s5264_s13 + $0xb0] sm:$0xff] }
 0xf70   :  { %v3778_v38 = vpack.c.bf16 %v2615_v37, %v2614_v35 }
 0xf71   :  { %v2397_v45 = vmul.f32 0.0625, %v2395_v42  ;;  %v2398_v46 = vmul.f32 %v2396_v43, %v2396_v43  ;;  %v2617_v42 = vld [vmem:[%s5264_s13 + $0xb8] sm:$0xff] }
 0xf73   :  { %v2399_v63 = vsub.f32 %v2397_v45, %v2398_v46  ;;  %v3071_v45 = vld [vmem:[%s5265_s17] ss:$0 sm:$0xff] }
 0xf75   :  { %v2400_v61 = vmax.f32 %v2399_v63, 0.0 }
 0xf77   :  { %v2401_v36 = vadd.f32 1e-05, %v2400_v61 }
 0xf79   :  { %3907 = vrsqrt.f32 %v2401_v36 }
 0xf83   :  { %v3908_v1 = vpop.eup %3907 }
 0xf84   :  { %v2403_v0 = vmul.f32 %v3908_v1, %v2374_v44 }
 0xf86   :  { %v2404_v48 = vmul.f32 %v2403_v0, %v2396_v43  ;;  %v2410_v49 = vrot.slane %v2403_v0, %v4409_v34  ;;  %v3781_v43 = vpack.c.bf16 %v2617_v42, %v2616_v41 }
 0xf88   :  { %v2405_v50 = vsub.f32 %v2375_v47, %v2404_v48  ;;  %v2412_v51 = vmul.f32 %v2410_v49, %v2366_v11  ;;  %v2413_v53 = vmul.f32 %v2410_v49, %v2371_v17  ;;  %v2601_v11 = vld [vmem:[%s5264_s13 + $0x38] sm:$0xff]  ;;  %v3760_v17 = vpack.c.bf16 %v2603_v14, %v2602_v12 }
 0xf89   :  { %v3757_v16 = vpack.c.bf16 %v2601_v11, %v2600_v10 }
 0xf8a   :  { %v2418_v55 = vrot.slane %v2405_v50, %v4409_v34 }
 0xf8c   :  { %v2421_v56 = vadd.f32 %v2418_v55, %v2413_v53  ;;  %v2420_v57 = vadd.f32 %v2418_v55, %v2412_v51 }
 0xf8e   :  { %v2423_v58 = vmax.f32 %v2421_v56, 0.0  ;;  %v2422_v59 = vmax.f32 %v2420_v57, 0.0 }
 0xf90   :  { %3388 = vmatprep.mubr.msk.f32.mxu0 %vm385_vm1, %v2422_v59 }
 0xf91   :  { %3389 = vmatmul.mubr.msk.f32.vlgmr.msra.gmra.mrb[26].mxu0 %vm385_vm1, %v2423_v58 }
 0xf92   :  { %3749 = vmatpush1.bf16.msra.mxu0 %v3748_v4 }
 0xf93   :  { %3750 = vmatprep.subr.bf16.mxu0 %v4069_v30 }
 0xf96   :  { %3752 = vmatpush1.bf16.msra.mxu0 %v3751_v7 }
 0xf97   :  { %3753 = vmatprep.subr.bf16.mxu0 %v4069_v30 }
 0xf9a   :  { %3755 = vmatpush1.bf16.msra.mxu0 %v3754_v8 }
 0xf9b   :  { %3756 = vmatprep.subr.bf16.mxu0 %v4069_v30 }
 0xf9e   :  { %3758 = vmatpush1.bf16.msra.mxu0 %v3757_v16  ;;  %v2520_v16 = vld [vmem:[%s5266_s21] sm:$0x1] }
 0xf9f   :  { %3759 = vmatprep.subr.bf16.mxu0 %v4069_v30 }
 0xfa2   :  { %3761 = vmatpush1.bf16.msra.mxu0 %v3760_v17  ;;  %v2521_v17 = vld [vmem:[%s5267_s25] sm:$0x1] }
 0xfa3   :  { %3762 = vmatprep.subr.bf16.mxu0 %v4069_v30 }
 0xfa6   :  { %3764 = vmatpush1.bf16.msra.mxu0 %v3763_v15 }
 0xfa7   :  { %3765 = vmatprep.subr.bf16.mxu0 %v4069_v30 }
 0xfaa   :  { %3767 = vmatpush1.bf16.msra.mxu0 %v3766_v23 }
 0xfab   :  { %3768 = vmatprep.subr.bf16.mxu0 %v4069_v30 }
 0xfae   :  { %3770 = vmatpush1.bf16.msra.mxu0 %v3769_v22 }
 0xfaf   :  { %3771 = vmatprep.subr.bf16.mxu0 %v4069_v30 }
 0xfb2   :  { %3773 = vmatpush1.bf16.msra.mxu0 %v3772_v28 }
 0xfb3   :  { %3774 = vmatprep.subr.bf16.mxu0 %v4069_v30 }
 0xfb6   :  { %3776 = vmatpush1.bf16.msra.mxu0 %v3775_v2 }
 0xfb7   :  { %3777 = vmatprep.subr.bf16.mxu0 %v4069_v30 }
 0xfba   :  { %3779 = vmatpush1.bf16.msra.mxu0 %v3778_v38 }
 0xfbb   :  { %3780 = vmatprep.subr.bf16.mxu0 %v4069_v30 }
 0xfbe   :  { %3782 = vmatpush1.bf16.msra.mxu0 %v3781_v43 }
0x1064   :  { %v3390_v46 = vpop.f32.mrb[26].mxu0 }
0x1065   :  { %v2517_v63 = vadd.f32 %v3390_v46, %v3071_v45  ;;  %v2511_v61 = vpop.f32.mrb[27].mxu0 }
0x1066   :  { %v2512_v36 = vadd.f32 %v3071_v45, %v2511_v61 }
0x1067   :  { %v2523_v44 = vsel %vm385_vm1, %v2517_v63, 0.0  ;;  %v2532_v1 = vmul.f32 %v2517_v63, %v2517_v63 }
0x1068   :  { %v2522_v0 = vsel %vm385_vm1, %v2512_v36, 0.0  ;;  %v2531_v47 = vmul.f32 %v2512_v36, %v2512_v36 }
0x1069   :  { %v2534_v48 = vsel %vm385_vm1, %v2532_v1, 0.0  ;;  %v2524_v49 = vadd.f32 %v2523_v44, %v2522_v0  ;;  %v3074_v44 = vld [vmem:[%s5269_s29] ss:$0 sm:$0xff] }
0x106a   :  { %v2533_v50 = vsel %vm385_vm1, %v2531_v47, 0.0 }
0x106b   :  { %v2525_v51 = vrot.slane %v2524_v49, 4  ;;  %v2535_v53 = vadd.f32 %v2534_v48, %v2533_v50 }
0x106d   :  { %v2526_v30 = vadd.f32 %v2525_v51, %v2524_v49  ;;  %v2536_v55 = vrot.slane %v2535_v53, 4 }
0x106f   :  { %v2527_v56 = vrot.slane %v2526_v30, 2  ;;  %v2537_v57 = vadd.f32 %v2536_v55, %v2535_v53 }
0x1071   :  { %v2528_v58 = vadd.f32 %v2527_v56, %v2526_v30  ;;  %v2538_v59 = vrot.slane %v2537_v57, 2 }
0x1073   :  { %v2529_v60 = vrot.slane %v2528_v58, 1  ;;  %v2539_v62 = vadd.f32 %v2538_v59, %v2537_v57 }
0x1075   :  { %v2530_v3 = vadd.f32 %v2529_v60, %v2528_v58  ;;  %v2540_v4 = vrot.slane %v2539_v62, 1 }
0x1077   :  { %v2541_v31 = vadd.f32 %v2540_v4, %v2539_v62  ;;  %v2542_v7 = vmul.f32 0.0625, %v2530_v3 }
0x1079   :  { %v2543_v5 = vmul.f32 0.0625, %v2541_v31  ;;  %v2544_v6 = vmul.f32 %v2542_v7, %v2542_v7 }
0x107b   :  { %v2545_v8 = vsub.f32 %v2543_v5, %v2544_v6 }
0x107d   :  { %v2546_v10 = vmax.f32 %v2545_v8, 0.0 }
0x107f   :  { %v2547_v11 = vadd.f32 1e-05, %v2546_v10 }
0x1081   :  { %3909 = vrsqrt.f32 %v2547_v11 }
0x108b   :  { %v3910_v12 = vpop.eup %3909 }
0x108c   :  { %v2549_v14 = vmul.f32 %v3910_v12, %v2520_v16 }
0x108e   :  { %v2550_v9 = vmul.f32 %v2549_v14, %v2542_v7  ;;  %v2556_v18 = vrot.slane %v2549_v14, %v4409_v34 }
0x1090   :  { %v2558_v15 = vmul.f32 %v2556_v18, %v2512_v36  ;;  %v2551_v19 = vsub.f32 %v2521_v17, %v2550_v9  ;;  %v2559_v21 = vmul.f32 %v2556_v18, %v2517_v63 }
0x1092   :  { %v2564_v23 = vrot.slane %v2551_v19, %v4409_v34  ;;  %v2732_v19 = vld [vmem:[#allocation3] sm:$0x1] }
0x1094   :  { %v2567_v24 = vadd.f32 %v2564_v23, %v2559_v21  ;;  %v2566_v25 = vadd.f32 %v2564_v23, %v2558_v15 }
0x1096   :  { %v2569_v22 = vadd.f32 %v2567_v24, %v4954_v40  ;;  %v2568_v26 = vadd.f32 %v2566_v25, %v4951_v39  ;;  %v2733_v24 = vld [vmem:[#allocation6] sm:$0x1] }
0x1098   :  { %v2571_v27 = vmax.f32 %v2569_v22, 0.0  ;;  %v2570_v28 = vmax.f32 %v2568_v26, 0.0 }
0x109a   :  { %2588 = vrot.lane.b32.xlu1 %v2571_v27, %s4068_s5  ;;  %v2573_v29 = vrot.slane %v2571_v27, 7  ;;  %v2579_v33 = vrot.slane %v2571_v27, 1  ;;  %2586 = vrot.lane.b32.xlu0 %v2570_v28, %s4068_s5  ;;  %v2572_v2 = vrot.slane %v2570_v28, 7  ;;  %v2578_v35 = vrot.slane %v2570_v28, 1  ;;  %v2824_v28 = vld [vmem:[%s5271_s3 + $0x80] sm:$0xff] }
0x109c   :  { %v2580_v37 = vsel %vm460_vm3, %v2578_v35, %v2579_v33  ;;  %v2575_v38 = vsel %vm5268_vm15, %v2573_v29, %v2572_v2  ;;  %v2581_v39 = vsel %vm460_vm3, %v2579_v33, %v2578_v35  ;;  %v2574_v40 = vsel %vm5270_vm8, %v2572_v2, %v2573_v29  ;;  %v2825_v29 = vld [vmem:[%s5271_s3 + $0x88] sm:$0xff]  ;;  %v2808_v33 = vld [vmem:[%s5271_s3] sm:$0xff] }
0x109d   :  { %v2582_v41 = vsel %vm4420_vm2, 0.0, %v2580_v37  ;;  %v2576_v43 = vsel %vm4444_vm6, 0.0, %v2575_v38  ;;  %v2583_v63 = vsel %vm4425_vm4, 0.0, %v2581_v39  ;;  %v2577_v61 = vsel %vm4452_vm7, 0.0, %v2574_v40  ;;  %v2809_v35 = vld [vmem:[%s5271_s3 + $0x8] sm:$0xff]  ;;  %v2826_v37 = vld [vmem:[%s5271_s3 + $0x90] sm:$0xff] }
0x109e   :  { %3075 = vmatprep.mubr.msk.f32.mxu0 %vm385_vm1, %v2582_v41  ;;  %v3783_v2 = vpack.c.bf16 %v2825_v29, %v2824_v28  ;;  %v2827_v38 = vld [vmem:[%s5271_s3 + $0x98] sm:$0xff]  ;;  %v3785_v39 = vpack.c.bf16 %v2809_v35, %v2808_v33  ;;  %v2810_v41 = vld [vmem:[%s5271_s3 + $0x10] sm:$0xff] }
0x109f   :  { %v3787_v40 = vpack.c.bf16 %v2827_v38, %v2826_v37 }
0x10a0   :  { %3784 = vmatprep.subr.bf16.mxu1 %v3783_v2 }
0x10a1   :  { %3786 = vmatpush3.bf16.msra.mxu1 %v3785_v39 }
0x10a2   :  { %3788 = vmatprep.subr.bf16.mxu1 %v3787_v40 }
0x110c   :  { %v2587_v42 = vpop.permute.xlu0 %2586  ;;  %v2589_v46 = vpop.permute.xlu1 %2588 }
0x110d   :  { %v2592_v45 = vsel %vm385_vm1, %v2576_v43, %v2587_v42  ;;  %v2593_v36 = vsel %vm385_vm1, %v2577_v61, %v2589_v46  ;;  %v2811_v42 = vld [vmem:[%s5271_s3 + $0x18] sm:$0xff]  ;;  %v2828_v43 = vld [vmem:[%s5271_s3 + $0xa0] sm:$0xff] }
0x110e   :  { %2696 = vmatmul.mubr.f32.vlgmr.msra.gmra.mrb[28].mxu0 %v2592_v45  ;;  %v2829_v45 = vld [vmem:[%s5271_s3 + $0xa8] sm:$0xff]  ;;  %v3789_v46 = vpack.c.bf16 %v2811_v42, %v2810_v41  ;;  %v2812_v61 = vld [vmem:[%s5271_s3 + $0x20] sm:$0xff] }
0x110f   :  { %3076 = vmatprep.mubr.msk.f32.mxu0 %vm385_vm1, %v2583_v63  ;;  %v3791_v63 = vpack.c.bf16 %v2829_v45, %v2828_v43 }
0x1110   :  { %3790 = vmatpush3.bf16.msra.mxu1 %v3789_v46 }
0x1111   :  { %3792 = vmatprep.subr.bf16.mxu1 %v3791_v63 }
0x1112   :  { %2701 = vmatmul.mubr.f32.gmra.mrb[30].mxu0 %v2593_v36  ;;  %v2813_v36 = vld [vmem:[%s5271_s3 + $0x28] sm:$0xff] }
0x11e1   :  { %v2697_v1 = vpop.f32.mrb[28].mxu0 }
0x11e2   :  { %v2699_v0 = vpop.f32.mrb[29].mxu0  ;;  %v5069_v47 = vadd.f32 %v3074_v44, %v2697_v1  ;;  %v2831_v1 = vld [vmem:[%s5271_s3 + $0xb8] sm:$0xff] }
0x11e3   :  { %v3793_v0 = vpack.c.bf16 %v2813_v36, %v2812_v61 }
0x11e4   :  { %v2713_v51 = vmul.f32 %v5069_v47, %v5069_v47 }
0x11e5   :  { %v2702_v48 = vpop.f32.mrb[30].mxu0  ;;  %3794 = vmatpush3.bf16.msra.mxu1 %v3793_v0 }
0x11e6   :  { %v5071_v49 = vadd.f32 %v3074_v44, %v2702_v48  ;;  %v2704_v50 = vpop.f32.mrb[31].mxu0  ;;  %v2830_v44 = vld [vmem:[%s5271_s3 + $0xb0] sm:$0xff] }
0x11e7   :  { %v3795_v48 = vpack.c.bf16 %v2831_v1, %v2830_v44  ;;  %v2814_v50 = vld [vmem:[%s5271_s3 + $0x30] sm:$0xff] }
0x11e8   :  { %v2706_v53 = vadd.f32 %v5071_v49, %v5069_v47  ;;  %v2714_v30 = vmul.f32 %v5071_v49, %v5071_v49 }
0x11e9   :  { %3796 = vmatprep.subr.bf16.mxu1 %v3795_v48 }
0x11ea   :  { %v2707_v55 = vrot.slane %v2706_v53, 4  ;;  %v2715_v56 = vadd.f32 %v2714_v30, %v2713_v51  ;;  %v2815_v51 = vld [vmem:[%s5271_s3 + $0x38] sm:$0xff]  ;;  %v2833_v30 = vld [vmem:[%s5271_s3 + $0xc8] sm:$0xff] }
0x11ec   :  { %v2708_v57 = vadd.f32 %v2707_v55, %v2706_v53  ;;  %v2716_v58 = vrot.slane %v2715_v56, 4  ;;  %v2832_v53 = vld [vmem:[%s5271_s3 + $0xc0] sm:$0xff]  ;;  %v3797_v55 = vpack.c.bf16 %v2815_v51, %v2814_v50 }
0x11ee   :  { %v2709_v59 = vrot.slane %v2708_v57, 2  ;;  %v2717_v60 = vadd.f32 %v2716_v58, %v2715_v56  ;;  %v3799_v56 = vpack.c.bf16 %v2833_v30, %v2832_v53  ;;  %v2817_v58 = vld [vmem:[%s5271_s3 + $0x48] sm:$0xff]  ;;  %3798 = vmatpush3.bf16.msra.mxu1 %v3797_v55 }
0x11f0   :  { %v2710_v62 = vadd.f32 %v2709_v59, %v2708_v57  ;;  %v2718_v3 = vrot.slane %v2717_v60, 2  ;;  %v2816_v57 = vld [vmem:[%s5271_s3 + $0x40] sm:$0xff]  ;;  %v2834_v59 = vld [vmem:[%s5271_s3 + $0xd0] sm:$0xff]  ;;  %3800 = vmatprep.subr.bf16.mxu1 %v3799_v56 }
0x11f2   :  { %v2711_v4 = vrot.slane %v2710_v62, 1  ;;  %v2719_v31 = vadd.f32 %v2718_v3, %v2717_v60  ;;  %v2835_v60 = vld [vmem:[%s5271_s3 + $0xd8] sm:$0xff] }
0x11f3   :  { %v3803_v3 = vpack.c.bf16 %v2835_v60, %v2834_v59 }
0x11f4   :  { %v2712_v7 = vadd.f32 %v2711_v4, %v2710_v62  ;;  %v2720_v5 = vrot.slane %v2719_v31, 1  ;;  %v3801_v62 = vpack.c.bf16 %v2817_v58, %v2816_v57  ;;  %v2818_v4 = vld [vmem:[%s5271_s3 + $0x50] sm:$0xff] }
0x11f6   :  { %2723 = vrot.lane.b32.xlu0 %v2712_v7, %s4068_s5  ;;  %v2721_v6 = vadd.f32 %v2720_v5, %v2719_v31  ;;  %v2819_v31 = vld [vmem:[%s5271_s3 + $0x58] sm:$0xff]  ;;  %v2837_v5 = vld [vmem:[%s5271_s3 + $0xe8] sm:$0xff]  ;;  %3802 = vmatpush3.bf16.msra.mxu1 %v3801_v62 }
0x11f7   :  { %3804 = vmatprep.subr.bf16.mxu1 %v3803_v3 }
0x11f8   :  { %2728 = vrot.lane.b32.xlu1 %v2721_v6, %s4068_s5 }
0x1268   :  { %v2724_v8 = vpop.permute.xlu0 %2723 }
0x1269   :  { %v2726_v10 = vadd.f32 %v2724_v8, %v2712_v7  ;;  %v2836_v7 = vld [vmem:[%s5271_s3 + $0xe0] sm:$0xff] }
0x126a   :  { %v2729_v11 = vpop.permute.xlu1 %2728  ;;  %v3807_v8 = vpack.c.bf16 %v2837_v5, %v2836_v7 }
0x126b   :  { %v2734_v16 = vmul.f32 0.03125, %v2726_v10  ;;  %v2731_v12 = vadd.f32 %v2729_v11, %v2721_v6  ;;  %v3805_v6 = vpack.c.bf16 %v2819_v31, %v2818_v4  ;;  %v2820_v10 = vld [vmem:[%s5271_s3 + $0x60] sm:$0xff]  ;;  %v2821_v11 = vld [vmem:[%s5271_s3 + $0x68] sm:$0xff] }
0x126d   :  { %v2736_v14 = vmul.f32 %v2734_v16, %v2734_v16  ;;  %v2735_v17 = vmul.f32 0.03125, %v2731_v12  ;;  %3806 = vmatpush3.bf16.msra.mxu1 %v3805_v6  ;;  %v3809_v12 = vpack.c.bf16 %v2821_v11, %v2820_v10 }
0x126e   :  { %3808 = vmatprep.subr.bf16.mxu1 %v3807_v8 }
0x126f   :  { %v2737_v9 = vsub.f32 %v2735_v17, %v2736_v14 }
0x1271   :  { %v2738_v18 = vmax.f32 %v2737_v9, 0.0  ;;  %3810 = vmatpush3.bf16.msra.mxu1 %v3809_v12  ;;  %v2838_v9 = vld [vmem:[%s5271_s3 + $0xf0] sm:$0xff] }
0x1273   :  { %v2739_v15 = vadd.f32 1e-05, %v2738_v18  ;;  %v2839_v18 = vld [vmem:[%s5271_s3 + $0xf8] sm:$0xff] }
0x1275   :  { %3911 = vrsqrt.f32 %v2739_v15  ;;  %v3811_v15 = vpack.c.bf16 %v2839_v18, %v2838_v9 }
0x1277   :  { %3812 = vmatprep.subr.bf16.mxu1 %v3811_v15 }
0x127f   :  { %v3912_v21 = vpop.eup %3911 }
0x1280   :  { %v5081_v23 = vmul.f32 %v3912_v21, %v2732_v19  ;;  %v2822_v19 = vld [vmem:[%s5271_s3 + $0x70] sm:$0xff]  ;;  %v2823_v21 = vld [vmem:[%s5271_s3 + $0x78] sm:$0xff] }
0x1282   :  { %v2748_v25 = vrot.slane %v5081_v23, %v4409_v34  ;;  %v2742_v22 = vmul.f32 %v5081_v23, %v2734_v16 }
0x1284   :  { %2749 = vrot.lane.b32.xlu0 %v2748_v25, %s4068_s5  ;;  %v5087_v26 = vsub.f32 %v2733_v24, %v2742_v22  ;;  %v3813_v25 = vpack.c.bf16 %v2823_v21, %v2822_v19 }
0x1286   :  { %v2763_v27 = vrot.slane %v5087_v26, %v4409_v34  ;;  %3814 = vmatpush3.bf16.msra.mxu1 %v3813_v25 }
0x1288   :  { %2764 = vrot.lane.b32.xlu1 %v2763_v27, %s4068_s5 }
0x12f6   :  { %v2750_v16 = vpop.permute.xlu0 %2749 }
0x12f7   :  { %v2752_v14 = vsel %vm385_vm1, %v5081_v23, %v2750_v16 }
0x12f8   :  { %v2756_v17 = vrot.slane %v2752_v14, %v4409_v34 }
0x12fa   :  { %v2765_v24 = vpop.permute.xlu1 %2764  ;;  %v2757_v27 = vmul.f32 %v2756_v17, %v5069_v47  ;;  %v2758_v28 = vmul.f32 %v2756_v17, %v5071_v49 }
0x12fb   :  { %v2767_v22 = vsel %vm385_vm1, %v5087_v26, %v2765_v24 }
0x12fc   :  { %v2771_v23 = vrot.slane %v2767_v22, %v4409_v34 }
0x12fe   :  { %v2772_v29 = vadd.f32 %v2771_v23, %v2757_v27  ;;  %v2773_v33 = vadd.f32 %v2771_v23, %v2758_v28 }
0x1300   :  { %v2774_v2 = vmax.f32 %v2772_v29, 0.0  ;;  %v2775_v35 = vmax.f32 %v2773_v33, 0.0 }
0x1302   :  { %v3888_v37 = vpack.i.bf16 %v2775_v35, %v2774_v2  ;;  %v2790_v38 = vrot.slane %v2774_v2, 1  ;;  %v2791_v39 = vrot.slane %v2775_v35, 1 }
0x1304   :  { %3889 = vrot.lane.b32.xlu0 %v3888_v37, %s4068_s5  ;;  %v2792_v26 = vsel %vm460_vm3, %v2790_v38, %v2791_v39  ;;  %v2793_v47 = vsel %vm460_vm3, %v2791_v39, %v2790_v38  ;;  %vm5272_vm3 = vmmov %vm5248_vm0 }
0x1305   :  { %v2794_v49 = vsel %vm4420_vm2, 0.0, %v2792_v26  ;;  %v2795_v34 = vsel %vm4425_vm4, 0.0, %v2793_v47  ;;  %vm5273_vm2 = vmmov %vm5248_vm0 }
0x1306   :  { %2798 = vrot.lane.b32.xlu1 %v2794_v49, %s4068_s5 }
0x1308   :  { %2800 = vrot.lane.b32.xlu0 %v2795_v34, %s4068_s5  ;;  %s4072_s5 = smov [#allocation8]  }
0x1309   :  { %s2931_s8 = sshll.u32 %s4072_s5, 4  ;;  %s2932_s8 = int_to_ptr.vmem [resolvable:$true] %s2931_s8 }
0x130a   :  { %s3961_s24 = scalar_lea.vmem %s2932_s8, 256  ;;  %p3966_p3 = scmp.lt.s32.totalorder %s2932_s8, %s2932_s8 }
0x130b   :  { %p3962_p2 = scmp.ne.s32.totalorder %s2932_s8, %s3961_s24  ;;  %p3967_p4 = scmp.lt.s32.totalorder %s3961_s24, %s3961_s24 }
0x130d   :  { %p3968_p5 = por %p3967_p4, %p3966_p3 }
0x130f   :  { %p3969_p6 = pnand %p3968_p5, %p3962_p2 }
0x1376   :  { %v3890_v40 = vpop.permute.xlu0 %3889 }
0x1377   :  { %v3892_v41 = vunpack.i.h.bf16 %v3890_v40  ;;  %v3891_v42 = vunpack.i.l.bf16 %v3890_v40 }
0x1378   :  { %v2799_v43 = vpop.permute.xlu1 %2798 }
0x1379   :  { %v2785_v45 = vrot.slane %v3892_v41, 7  ;;  %v2784_v46 = vrot.slane %v3891_v42, 7  ;;  %v2806_v63 = vsel %vm385_vm1, %v3891_v42, %v2799_v43 }
0x137a   :  { %2911 = vmatprep.mubr.f32.mxu1 %v2806_v63  ;;  %v2801_v61 = vpop.permute.xlu0 %2800 }
0x137b   :  { %v2787_v54 = vsel %vm5272_vm3, %v2785_v45, %v2784_v46  ;;  %v2786_v36 = vsel %vm5273_vm2, %v2784_v46, %v2785_v45  ;;  %v2807_v1 = vsel %vm385_vm1, %v3892_v41, %v2801_v61 }
0x137c   :  { %v2788_v52 = vsel %vm4444_vm6, 0.0, %v2787_v54  ;;  %v2789_v0 = vsel %vm4452_vm7, 0.0, %v2786_v36 }
0x137d   :  { %v2804_v44 = vsel %vm385_vm1, %v2788_v52, %v3891_v42  ;;  %v2805_v48 = vsel %vm385_vm1, %v2789_v0, %v3892_v41 }
0x137e   :  { %2912 = vmatmul.mubr.f32.vlgmr.msra.gmra.mrb[22].mxu1 %v2804_v44 }
0x137f   :  { %2916 = vmatprep.mubr.f32.mxu1 %v2807_v1 }
0x1382   :  { %2917 = vmatmul.mubr.f32.gmra.mrb[24].mxu1 %v2805_v48 }
0x1383   :  { %3972 = shalt.err (!%p3969_p6)
}
0x1384   :  { %s3973_s4 = scalar_lea.hbm %s4332_s27, 256 }
0x1385   :  { %p3974_p7 = scmp.ne.s32.totalorder %s4332_s27, %s3973_s4  ;;  %p3977_p8 = scmp.lt.u32.totalorder %s3973_s4, %s4332_s27 }
0x1387   :  { %p3979_p9 = pnand %p3977_p8, %p3974_p7 }
0x1389   :  { %3982 = shalt.err (!%p3979_p9)
}
0x138a   :  { %s4074_s23 = smov 128   ;;  %s4075_s6 = smov 8  }
0x138b   :  { %2937 = dma.vmem_to_hbm [thread:$0]  %s2932_s8, 256, %s4332_s27, [#allocation5], %s4074_s23, %s4074_s23, %s4075_s6  }
0x138c   :  { %s3983_s28 = scalar_lea.vmem %s5155_s19, 256  ;;  %p3988_p11 = scmp.lt.s32.totalorder %s5155_s19, %s5155_s19 }
0x138d   :  { %p3984_p10 = scmp.ne.s32.totalorder %s5155_s19, %s3983_s28  ;;  %p3989_p12 = scmp.lt.s32.totalorder %s3983_s28, %s3983_s28 }
0x138f   :  { %p3990_p13 = por %p3989_p12, %p3988_p11 }
0x1391   :  { %p3991_p0 = pnand %p3990_p13, %p3984_p10 }
0x1393   :  { %3994 = shalt.err (!%p3991_p0)
}
0x1394   :  { %s3995_s2 = scalar_lea.hbm %s4337_s20, 256 }
0x1395   :  { %p3996_p1 = scmp.ne.s32.totalorder %s4337_s20, %s3995_s2  ;;  %p3999_p2 = scmp.lt.u32.totalorder %s3995_s2, %s4337_s20 }
0x1397   :  { %p4001_p3 = pnand %p3999_p2, %p3996_p1 }
0x1399   :  { %4004 = shalt.err (!%p4001_p3)
}
0x139a   :  { %s5274_s15 = sld [smem:[#allocation49_spill]]  ;;  %vm5275_vm1 = vcmask 130048  }
0x139b   :  { %2949 = dma.vmem_to_hbm [thread:$0]  %s5155_s19, 256, %s4337_s20, [#allocation10], %s4074_s23, %s4074_s23, %s4075_s6   ;;  %vm5276_vm4 = vmmov %vm5275_vm1 }
0x13a0   :  { %v3077_v13 = vld [vmem:[%s5274_s15] ss:$0 sm:$0xff] }
0x1451   :  { %v3280_v32 = vpop.f32.mrb[22].mxu1 }
0x1452   :  { %v3281_v20 = vpop.f32.mrb[23].mxu1 }
0x1453   :  { %v3282_v50 = vadd.f32 %v3281_v20, %v3280_v32 }
0x1455   :  { %v2914_v51 = vadd.f32 %v3282_v50, %v3077_v13  ;;  %v3283_v53 = vpop.f32.mrb[24].mxu1 }
0x1456   :  { %v3284_v30 = vpop.f32.mrb[25].mxu1 }
0x1457   :  { %3913 = vtanh.f32 %v2914_v51  ;;  %v3285_v55 = vadd.f32 %v3284_v30, %v3283_v53 }
0x1459   :  { %v2919_v56 = vadd.f32 %v3285_v55, %v3077_v13 }
0x145b   :  { %3915 = vtanh.f32 %v2919_v56 }
0x1461   :  { %v3914_v57 = vpop.eup %3913 }
0x1462   :  { %2924 = vst.msk [vmem:[%s4347_s7] sm:$0xff] %vm5275_vm1, %v3914_v57 }
0x1465   :  { %v3916_v58 = vpop.eup %3915 }
0x1466   :  { %2925 = vst.msk [vmem:[%s4347_s7 + $0x8] sm:$0xff] %vm5276_vm4, %v3916_v58 }
0x1467   :  { %4009 = dma.done.wait [#allocation5], 256  }
0x1468   :  { %4010 = vsyncadd [#allocation5], 4294967040 }
0x1469   :  { %4011 = dma.done.wait [#allocation10], 256  }
0x146a   :  { %4012 = vsyncadd [#allocation10], 4294967040 }
0x146b   :  { %2964 = vsyncpa [#allocation4], 1 }
0x146c   :  { %2965 = vsyncpa [#allocation7], 1 }
0x146d   :  { %2966 = vsyncpa [#allocation5], 1 }
0x146e   :  { %2967 = vsyncpa [#allocation10], 1 }

</bundles_post_ra>
